<compile_context>
chip_gen: v7x
topology: tpu7x:2x2x1
jax: 0.10.0
libtpu: 0.0.40
codegen_flags: <defaults>
</compile_context>

<pallas_src>
import functools
import math

import jax
import jax.numpy as jnp
from jax.experimental import pallas as pl
from jax.experimental.pallas import tpu as pltpu

D_MODEL = 128 + 4 + 8       # 140
PAD_D = 256                 # lane-padded model dim (multiple of 128, MXU-friendly)
SEQ = 8 * 4                 # 32
DFF = 1024
N_HEADS = 1
D_K = D_MODEL // N_HEADS
LN_EPS = 1e-5               # torch.nn.LayerNorm default
NEG_MASK = -1e30            # Python float (finite "-inf" -> no NaN on fully-masked rows)
_ATTN_SCALE = 1.0 / math.sqrt(D_K)   # folded into W_q / b_q


# ----------------------------------------------------------------------------
# Kernel
# ----------------------------------------------------------------------------
def _masked_layernorm(x, gamma, beta, valid):
    """LayerNorm over the real D_MODEL lanes of a (rows, PAD_D) slab.

    x has zeros in lanes >= D_MODEL; gamma/beta are zero-padded there, so the
    output keeps zero padding.
    """
    mu = jnp.sum(x, axis=-1, keepdims=True) * (1.0 / D_MODEL)
    xc = (x - mu) * valid                       # re-zero the padded lanes
    var = jnp.sum(xc * xc, axis=-1, keepdims=True) * (1.0 / D_MODEL)
    return xc * jax.lax.rsqrt(var + LN_EPS) * gamma + beta


def _transformer_block_kernel(state_ref, mask_ref,
                              wqkv_ref, bqkv_ref,
                              w1_ref, b1_ref, w2_ref, b2_ref,
                              g1_ref, be1_ref, g2_ref, be2_ref,
                              src_ref, a_ref, *, bt):
    rows = bt * SEQ
    x = state_ref[...]                                   # (bt, SEQ, PAD_D) f32
    x2 = x.reshape(rows, PAD_D)
    xb = x2.astype(jnp.bfloat16)

    # lane-validity mask (lanes >= D_MODEL are zero padding)
    lane = jax.lax.broadcasted_iota(jnp.int32, (1, PAD_D), 1)
    valid = (lane < D_MODEL).astype(jnp.float32)

    # Fused QKV projection: batch folded into the matmul rows (M = bt*SEQ),
    # single MXU pass over a (PAD_D, 3*PAD_D) weight. 1/sqrt(d_k) is already
    # folded into the Q columns / bias.
    qkv = jnp.dot(xb, wqkv_ref[...],
                  preferred_element_type=jnp.float32) + bqkv_ref[...]
    q3 = qkv[:, 0 * PAD_D:1 * PAD_D].reshape(bt, SEQ, PAD_D)
    k3 = qkv[:, 1 * PAD_D:2 * PAD_D].reshape(bt, SEQ, PAD_D)
    v3 = qkv[:, 2 * PAD_D:3 * PAD_D].reshape(bt, SEQ, PAD_D)

    # scores = q @ k^T (scale pre-folded), per batch element -> (bt, SEQ, SEQ)
    scores = jnp.einsum("bqd,bkd->bqk", q3, k3,
                        preferred_element_type=jnp.float32)
    scores = jnp.where(mask_ref[...] > 0.5, NEG_MASK, scores)

    # softmax over keys (approx reciprocal on the EUP slot)
    m_ = jnp.max(scores, axis=-1, keepdims=True)
    e = jnp.exp(scores - m_)
    A = e * pl.reciprocal(jnp.sum(e, axis=-1, keepdims=True), approx=True)

    attn = jnp.einsum("bqk,bkd->bqd", A, v3,
                      preferred_element_type=jnp.float32)

    # TODO(synk): nn.Dropout(p=0.01) is stochastic; implemented as identity (eval mode).
    z1 = (x + attn).reshape(rows, PAD_D)
    z2 = _masked_layernorm(z1, g1_ref[...], be1_ref[...], valid)

    z3 = jnp.maximum(
        jnp.dot(z2.astype(jnp.bfloat16), w1_ref[...],
                preferred_element_type=jnp.float32) + b1_ref[...],
        0.0)
    z4 = jnp.dot(z3.astype(jnp.bfloat16), w2_ref[...],
                 preferred_element_type=jnp.float32) + b2_ref[...]

    src = _masked_layernorm(z2 + z4, g2_ref[...], be2_ref[...], valid)

    src_ref[...] = src.reshape(bt, SEQ, PAD_D)
    a_ref[...] = A


# ----------------------------------------------------------------------------
# Wrapper
# ----------------------------------------------------------------------------
def _full_spec(shape):
    zeros = (0,) * len(shape)
    return pl.BlockSpec(shape, lambda b, _z=zeros: _z)


@functools.partial(jax.jit, static_argnames=("bt",))
def transformer_block(state, m, prepped, *, bt=8):
    """state: reshapable to (-1, SEQ, D_MODEL); m: (B, SEQ) bool (True == masked).

    `prepped` comes from prepare_params() (padded / bf16 / scale-folded weights).
    """
    state = state.reshape(-1, SEQ, D_MODEL).astype(jnp.float32)
    B = state.shape[0]
    bt = min(int(bt), B)
    n_blocks = pl.cdiv(B, bt)
    Bp = n_blocks * bt

    # zero-pad batch (to a multiple of bt) and lane dim (140 -> 256)
    xs = jnp.zeros((Bp, SEQ, PAD_D), jnp.float32).at[:B, :, :D_MODEL].set(state)
    mf = jnp.zeros((Bp, 1, SEQ), jnp.float32).at[:B, 0, :].set(
        m.reshape(B, SEQ).astype(jnp.float32))

    weight_args = (
        prepped["wqkv"], prepped["bqkv"],
        prepped["w1"], prepped["b1"], prepped["w2"], prepped["b2"],
        prepped["g1"], prepped["be1"], prepped["g2"], prepped["be2"],
    )

    in_specs = [
        pl.BlockSpec((bt, SEQ, PAD_D), lambda b: (b, 0, 0)),   # state block
        pl.BlockSpec((bt, 1, SEQ), lambda b: (b, 0, 0)),       # mask block
    ] + [_full_spec(w.shape) for w in weight_args]

    out_shape = (
        jax.ShapeDtypeStruct((Bp, SEQ, PAD_D), jnp.float32),   # src (lane-padded)
        jax.ShapeDtypeStruct((Bp, SEQ, SEQ), jnp.float32),     # A
    )
    out_specs = (
        pl.BlockSpec((bt, SEQ, PAD_D), lambda b: (b, 0, 0)),
        pl.BlockSpec((bt, SEQ, SEQ), lambda b: (b, 0, 0)),
    )

    kernel = functools.partial(_transformer_block_kernel, bt=bt)
    src_p, A_p = pl.pallas_call(
        kernel,
        out_shape=out_shape,
        grid=(n_blocks,),
        in_specs=in_specs,
        out_specs=out_specs,
        compiler_params=pltpu.CompilerParams(
            dimension_semantics=("parallel",)),
    )(xs, mf, *weight_args)

    src = src_p[:B, :, :D_MODEL]
    A = A_p[:B].reshape(B, N_HEADS, SEQ, SEQ)
    return src, A


# ----------------------------------------------------------------------------
# Parameter init / preprocessing / reference
# ----------------------------------------------------------------------------
def init_params(key):
    """Deterministic parameter init (PyTorch-Linear-style uniform bounds), f32, unpadded."""
    ks = jax.random.split(key, 10)

    def lin(kw, kb, fan_in, fan_out):
        bound = 1.0 / jnp.sqrt(jnp.float32(fan_in))
        w = jax.random.uniform(kw, (fan_in, fan_out), jnp.float32, -bound, bound)
        b = jax.random.uniform(kb, (1, fan_out), jnp.float32, -bound, bound)
        return w, b

    wq, bq = lin(ks[0], ks[1], D_MODEL, D_K * N_HEADS)
    wk, bk = lin(ks[2], ks[3], D_MODEL, D_K * N_HEADS)
    wv, bv = lin(ks[4], ks[5], D_MODEL, D_K * N_HEADS)
    w1, b1 = lin(ks[6], ks[7], N_HEADS * D_K, DFF)
    w2, b2 = lin(ks[8], ks[9], DFF, D_MODEL)
    return dict(
        wq=wq, bq=bq, wk=wk, bk=bk, wv=wv, bv=bv,
        w1=w1, b1=b1, w2=w2, b2=b2,
        g1=jnp.ones((1, D_MODEL), jnp.float32), be1=jnp.zeros((1, D_MODEL), jnp.float32),
        g2=jnp.ones((1, D_MODEL), jnp.float32), be2=jnp.zeros((1, D_MODEL), jnp.float32),
    )


def _pad2(w, rows, cols):
    out = jnp.zeros((rows, cols), jnp.float32)
    return out.at[: w.shape[0], : w.shape[1]].set(w.astype(jnp.float32))


def prepare_params(p):
    """One-time preprocessing: fold 1/sqrt(d_k) into W_q/b_q, zero-pad the 140-lane
    model dim to 256, fuse the QKV weights into a single (256, 768) matrix and cast
    the big matmul weights to bf16 (f32 accumulate in-kernel)."""
    wq = _pad2(p["wq"] * _ATTN_SCALE, PAD_D, PAD_D)
    wk = _pad2(p["wk"], PAD_D, PAD_D)
    wv = _pad2(p["wv"], PAD_D, PAD_D)
    bq = _pad2(p["bq"] * _ATTN_SCALE, 1, PAD_D)
    bk = _pad2(p["bk"], 1, PAD_D)
    bv = _pad2(p["bv"], 1, PAD_D)
    return dict(
        wqkv=jnp.concatenate([wq, wk, wv], axis=1).astype(jnp.bfloat16),  # (256, 768)
        bqkv=jnp.concatenate([bq, bk, bv], axis=1),                       # (1, 768) f32
        w1=_pad2(p["w1"], PAD_D, DFF).astype(jnp.bfloat16),
        b1=p["b1"].astype(jnp.float32),
        w2=_pad2(p["w2"], DFF, PAD_D).astype(jnp.bfloat16),
        b2=_pad2(p["b2"], 1, PAD_D),
        g1=_pad2(p["g1"], 1, PAD_D),
        be1=_pad2(p["be1"], 1, PAD_D),
        g2=_pad2(p["g2"], 1, PAD_D),
        be2=_pad2(p["be2"], 1, PAD_D),
    )


def _reference(state, m, p):
    """Plain-JAX f32 reference of the torch forward (eval mode)."""
    state = state.reshape(-1, SEQ, D_MODEL)
    q = state @ p["wq"] + p["bq"]
    k = state @ p["wk"] + p["bk"]
    v = state @ p["wv"] + p["bv"]
    scores = jnp.einsum("bqd,bkd->bqk", q, k) / jnp.sqrt(jnp.float32(D_K))
    scores = jnp.where(m[:, None, :], -jnp.inf, scores)
    A = jax.nn.softmax(scores, axis=-1)
    attn = jnp.einsum("bqk,bkd->bqd", A, v)

    def ln(x, g, b):
        mu = x.mean(-1, keepdims=True)
        var = ((x - mu) ** 2).mean(-1, keepdims=True)
        return (x - mu) * jax.lax.rsqrt(var + LN_EPS) * g + b

    z2 = ln(state + attn, p["g1"], p["be1"])
    z4 = jnp.maximum(z2 @ p["w1"] + p["b1"], 0.0) @ p["w2"] + p["b2"]
    src = ln(z2 + z4, p["g2"], p["be2"])
    return src, A[:, None, :, :]


if __name__ == "__main__":
    key = jax.random.PRNGKey(0)
    k_param, k_state = jax.random.split(key)

    params = init_params(k_param)
    prepped = prepare_params(params)

    B = 2
    state = jax.random.normal(k_state, (B, SEQ, D_MODEL), jnp.float32)
    # deterministic padding-style mask: last 4 key positions masked out
    m = jnp.zeros((B, SEQ), jnp.bool_).at[:, SEQ - 4:].set(True)

    src, A = transformer_block(state, m, prepped)
    jax.block_until_ready((src, A))

    src_ref, A_ref = _reference(state, m, params)
    assert src.shape == (B, SEQ, D_MODEL) and A.shape == (B, N_HEADS, SEQ, SEQ)
    # bf16 weights + approx reciprocal => looser tolerance than pure f32
    assert jnp.allclose(src, src_ref, atol=5e-2, rtol=5e-2), \
        float(jnp.max(jnp.abs(src - src_ref)))
    assert jnp.allclose(A, A_ref, atol=2e-2), float(jnp.max(jnp.abs(A - A_ref)))

    print("KERNEL_OK")
</pallas_src>

<mosaic_0001>
module attributes {stable_mosaic.version = 11 : i64} {
  func.func @_transformer_block_kernel(%arg0: i32, %arg1: memref<2x32x256xf32, #tpu.memory_space<vmem>>, %arg2: memref<2x1x32xf32, #tpu.memory_space<vmem>>, %arg3: memref<256x768xbf16, #tpu.memory_space<vmem>>, %arg4: memref<1x768xf32, #tpu.memory_space<vmem>>, %arg5: memref<256x1024xbf16, #tpu.memory_space<vmem>>, %arg6: memref<1x1024xf32, #tpu.memory_space<vmem>>, %arg7: memref<1024x256xbf16, #tpu.memory_space<vmem>>, %arg8: memref<1x256xf32, #tpu.memory_space<vmem>>, %arg9: memref<1x256xf32, #tpu.memory_space<vmem>>, %arg10: memref<1x256xf32, #tpu.memory_space<vmem>>, %arg11: memref<1x256xf32, #tpu.memory_space<vmem>>, %arg12: memref<1x256xf32, #tpu.memory_space<vmem>>, %arg13: memref<2x32x256xf32, #tpu.memory_space<vmem>>, %arg14: memref<2x32x32xf32, #tpu.memory_space<vmem>>) attributes {dimension_semantics = [#tpu.dimension_semantics<parallel>], iteration_bounds = array<i64: 1>, scalar_prefetch = 0 : i64, scratch_operands = 0 : i64, tpu.core_type = #tpu.core_type<tc>, window_params = [{transform_indices = @transform_0, window_bounds = array<i64: 2, 32, 256>}, {transform_indices = @transform_1, window_bounds = array<i64: 2, 1, 32>}, {pipeline_mode = #tpu.pipeline_mode<synchronous>, transform_indices = @transform_2, window_bounds = array<i64: 256, 768>}, {pipeline_mode = #tpu.pipeline_mode<synchronous>, transform_indices = @transform_3, window_bounds = array<i64: 1, 768>}, {pipeline_mode = #tpu.pipeline_mode<synchronous>, transform_indices = @transform_4, window_bounds = array<i64: 256, 1024>}, {pipeline_mode = #tpu.pipeline_mode<synchronous>, transform_indices = @transform_5, window_bounds = array<i64: 1, 1024>}, {pipeline_mode = #tpu.pipeline_mode<synchronous>, transform_indices = @transform_6, window_bounds = array<i64: 1024, 256>}, {pipeline_mode = #tpu.pipeline_mode<synchronous>, transform_indices = @transform_7, window_bounds = array<i64: 1, 256>}, {pipeline_mode = #tpu.pipeline_mode<synchronous>, transform_indices = @transform_8, window_bounds = array<i64: 1, 256>}, {pipeline_mode = #tpu.pipeline_mode<synchronous>, transform_indices = @transform_9, window_bounds = array<i64: 1, 256>}, {pipeline_mode = #tpu.pipeline_mode<synchronous>, transform_indices = @transform_10, window_bounds = array<i64: 1, 256>}, {pipeline_mode = #tpu.pipeline_mode<synchronous>, transform_indices = @transform_11, window_bounds = array<i64: 1, 256>}, {transform_indices = @transform_12, window_bounds = array<i64: 2, 32, 256>}, {transform_indices = @transform_13, window_bounds = array<i64: 2, 32, 32>}]} {
    %c0 = arith.constant 0 : index
    %c0_0 = arith.constant 0 : index
    %c0_1 = arith.constant 0 : index
    %0 = vector.load %arg1[%c0, %c0_0, %c0_1] : memref<2x32x256xf32, #tpu.memory_space<vmem>>, vector<2x32x256xf32>
    %1 = vector.shape_cast %0 : vector<2x32x256xf32> to vector<64x256xf32>
    %2 = arith.truncf %1 : vector<64x256xf32> to vector<64x256xbf16>
    %3 = tpu.iota {dimensions = array<i32: 1>} : vector<1x256xi32>
    %c140_i32 = arith.constant 140 : i32
    %4 = vector.broadcast %c140_i32 : i32 to vector<1x256xi32>
    %5 = arith.cmpi slt, %3, %4 : vector<1x256xi32>
    %6 = arith.extui %5 : vector<1x256xi1> to vector<1x256xi32>
    %7 = arith.sitofp %6 : vector<1x256xi32> to vector<1x256xf32>
    %c0_2 = arith.constant 0 : index
    %c0_3 = arith.constant 0 : index
    %8 = vector.load %arg3[%c0_2, %c0_3] : memref<256x768xbf16, #tpu.memory_space<vmem>>, vector<256x768xbf16>
    %cst = arith.constant dense<0.000000e+00> : vector<64x768xf32>
    %9 = tpu.matmul %2, %8, %cst {dimension_numbers = #tpu.dot_dimension_numbers<[1], [0], [0], [1], [0, 0, 1, 1], [], []>} : vector<64x256xbf16>, vector<256x768xbf16>, vector<64x768xf32> -> vector<64x768xf32>
    %c0_4 = arith.constant 0 : index
    %c0_5 = arith.constant 0 : index
    %10 = vector.load %arg4[%c0_4, %c0_5] : memref<1x768xf32, #tpu.memory_space<vmem>>, vector<1x768xf32>
    %11 = vector.broadcast %10 : vector<1x768xf32> to vector<64x768xf32>
    %12 = arith.addf %9, %11 : vector<64x768xf32>
    %13 = vector.extract_strided_slice %12 {offsets = [0, 0], sizes = [64, 256], strides = [1, 1]} : vector<64x768xf32> to vector<64x256xf32>
    %14 = vector.shape_cast %13 : vector<64x256xf32> to vector<2x32x256xf32>
    %15 = vector.extract_strided_slice %12 {offsets = [0, 256], sizes = [64, 256], strides = [1, 1]} : vector<64x768xf32> to vector<64x256xf32>
    %16 = vector.shape_cast %15 : vector<64x256xf32> to vector<2x32x256xf32>
    %17 = vector.extract_strided_slice %12 {offsets = [0, 512], sizes = [64, 256], strides = [1, 1]} : vector<64x768xf32> to vector<64x256xf32>
    %18 = vector.shape_cast %17 : vector<64x256xf32> to vector<2x32x256xf32>
    "tpu.trace_start"() <{level = 10 : i32, message = "bqd,bkd->bqk"}> : () -> ()
    %cst_6 = arith.constant dense<0.000000e+00> : vector<2x32x32xf32>
    %19 = tpu.matmul %14, %16, %cst_6 {dimension_numbers = #tpu.dot_dimension_numbers<[2], [2], [1], [1], [0, 0, 0, 1, 1, 1], [0], [0]>} : vector<2x32x256xf32>, vector<2x32x256xf32>, vector<2x32x32xf32> -> vector<2x32x32xf32>
    "tpu.trace_stop"() : () -> ()
    %c0_7 = arith.constant 0 : index
    %c0_8 = arith.constant 0 : index
    %c0_9 = arith.constant 0 : index
    %20 = vector.load %arg2[%c0_7, %c0_8, %c0_9] : memref<2x1x32xf32, #tpu.memory_space<vmem>>, vector<2x1x32xf32>
    %cst_10 = arith.constant 5.000000e-01 : f32
    %21 = vector.broadcast %cst_10 : f32 to vector<2x1x32xf32>
    %22 = arith.cmpf ogt, %20, %21 : vector<2x1x32xf32>
    %cst_11 = arith.constant -1.000000e+30 : f32
    %23 = vector.shape_cast %22 : vector<2x1x32xi1> to vector<2x1x32xi1>
    %24 = vector.broadcast %23 : vector<2x1x32xi1> to vector<2x32x32xi1>
    %25 = vector.broadcast %cst_11 : f32 to vector<2x32x32xf32>
    %26 = arith.select %24, %25, %19 : vector<2x32x32xi1>, vector<2x32x32xf32>
    %cst_12 = arith.constant dense<0xFF800000> : vector<2x32xf32>
    %27 = vector.multi_reduction <maximumf>, %26, %cst_12 [2] : vector<2x32x32xf32> to vector<2x32xf32>
    %28 = vector.shape_cast %27 : vector<2x32xf32> to vector<2x32x1xf32>
    %29 = vector.broadcast %28 : vector<2x32x1xf32> to vector<2x32x32xf32>
    %30 = arith.subf %26, %29 : vector<2x32x32xf32>
    %31 = math.exp %30 : vector<2x32x32xf32>
    %cst_13 = arith.constant dense<0.000000e+00> : vector<2x32xf32>
    %32 = vector.multi_reduction <add>, %31, %cst_13 [2] : vector<2x32x32xf32> to vector<2x32xf32>
    %33 = vector.shape_cast %32 : vector<2x32xf32> to vector<2x32x1xf32>
    %34 = tpu.reciprocal %33 {approx = true} : vector<2x32x1xf32> -> vector<2x32x1xf32>
    %35 = vector.broadcast %34 : vector<2x32x1xf32> to vector<2x32x32xf32>
    %36 = arith.mulf %31, %35 : vector<2x32x32xf32>
    "tpu.trace_start"() <{level = 10 : i32, message = "bqk,bkd->bqd"}> : () -> ()
    %cst_14 = arith.constant dense<0.000000e+00> : vector<2x32x256xf32>
    %37 = tpu.matmul %36, %18, %cst_14 {dimension_numbers = #tpu.dot_dimension_numbers<[2], [1], [1], [2], [0, 0, 0, 1, 1, 2], [0], [0]>} : vector<2x32x32xf32>, vector<2x32x256xf32>, vector<2x32x256xf32> -> vector<2x32x256xf32>
    "tpu.trace_stop"() : () -> ()
    %38 = arith.addf %0, %37 : vector<2x32x256xf32>
    %39 = vector.shape_cast %38 : vector<2x32x256xf32> to vector<64x256xf32>
    %c0_15 = arith.constant 0 : index
    %c0_16 = arith.constant 0 : index
    %40 = vector.load %arg9[%c0_15, %c0_16] : memref<1x256xf32, #tpu.memory_space<vmem>>, vector<1x256xf32>
    %c0_17 = arith.constant 0 : index
    %c0_18 = arith.constant 0 : index
    %41 = vector.load %arg10[%c0_17, %c0_18] : memref<1x256xf32, #tpu.memory_space<vmem>>, vector<1x256xf32>
    %cst_19 = arith.constant dense<0.000000e+00> : vector<64xf32>
    %42 = vector.multi_reduction <add>, %39, %cst_19 [1] : vector<64x256xf32> to vector<64xf32>
    %43 = vector.shape_cast %42 : vector<64xf32> to vector<64x1xf32>
    %cst_20 = arith.constant 0.00714285718 : f32
    %44 = vector.broadcast %cst_20 : f32 to vector<64x1xf32>
    %45 = arith.mulf %43, %44 : vector<64x1xf32>
    %46 = vector.broadcast %45 : vector<64x1xf32> to vector<64x256xf32>
    %47 = arith.subf %39, %46 : vector<64x256xf32>
    %48 = vector.broadcast %7 : vector<1x256xf32> to vector<64x256xf32>
    %49 = arith.mulf %47, %48 : vector<64x256xf32>
    %50 = arith.mulf %49, %49 : vector<64x256xf32>
    %cst_21 = arith.constant dense<0.000000e+00> : vector<64xf32>
    %51 = vector.multi_reduction <add>, %50, %cst_21 [1] : vector<64x256xf32> to vector<64xf32>
    %52 = vector.shape_cast %51 : vector<64xf32> to vector<64x1xf32>
    %cst_22 = arith.constant 0.00714285718 : f32
    %53 = vector.broadcast %cst_22 : f32 to vector<64x1xf32>
    %54 = arith.mulf %52, %53 : vector<64x1xf32>
    %cst_23 = arith.constant 9.99999974E-6 : f32
    %55 = vector.broadcast %cst_23 : f32 to vector<64x1xf32>
    %56 = arith.addf %54, %55 : vector<64x1xf32>
    %57 = math.rsqrt %56 : vector<64x1xf32>
    %58 = vector.broadcast %57 : vector<64x1xf32> to vector<64x256xf32>
    %59 = arith.mulf %49, %58 : vector<64x256xf32>
    %60 = vector.broadcast %40 : vector<1x256xf32> to vector<64x256xf32>
    %61 = arith.mulf %59, %60 : vector<64x256xf32>
    %62 = vector.broadcast %41 : vector<1x256xf32> to vector<64x256xf32>
    %63 = arith.addf %61, %62 : vector<64x256xf32>
    %64 = arith.truncf %63 : vector<64x256xf32> to vector<64x256xbf16>
    %c0_24 = arith.constant 0 : index
    %c0_25 = arith.constant 0 : index
    %65 = vector.load %arg5[%c0_24, %c0_25] : memref<256x1024xbf16, #tpu.memory_space<vmem>>, vector<256x1024xbf16>
    %cst_26 = arith.constant dense<0.000000e+00> : vector<64x1024xf32>
    %66 = tpu.matmul %64, %65, %cst_26 {dimension_numbers = #tpu.dot_dimension_numbers<[1], [0], [0], [1], [0, 0, 1, 1], [], []>} : vector<64x256xbf16>, vector<256x1024xbf16>, vector<64x1024xf32> -> vector<64x1024xf32>
    %c0_27 = arith.constant 0 : index
    %c0_28 = arith.constant 0 : index
    %67 = vector.load %arg6[%c0_27, %c0_28] : memref<1x1024xf32, #tpu.memory_space<vmem>>, vector<1x1024xf32>
    %68 = vector.broadcast %67 : vector<1x1024xf32> to vector<64x1024xf32>
    %69 = arith.addf %66, %68 : vector<64x1024xf32>
    %cst_29 = arith.constant 0.000000e+00 : f32
    %70 = vector.broadcast %cst_29 : f32 to vector<64x1024xf32>
    %71 = arith.maximumf %69, %70 : vector<64x1024xf32>
    %72 = arith.truncf %71 : vector<64x1024xf32> to vector<64x1024xbf16>
    %c0_30 = arith.constant 0 : index
    %c0_31 = arith.constant 0 : index
    %73 = vector.load %arg7[%c0_30, %c0_31] : memref<1024x256xbf16, #tpu.memory_space<vmem>>, vector<1024x256xbf16>
    %cst_32 = arith.constant dense<0.000000e+00> : vector<64x256xf32>
    %74 = tpu.matmul %72, %73, %cst_32 {dimension_numbers = #tpu.dot_dimension_numbers<[1], [0], [0], [1], [0, 0, 1, 1], [], []>} : vector<64x1024xbf16>, vector<1024x256xbf16>, vector<64x256xf32> -> vector<64x256xf32>
    %c0_33 = arith.constant 0 : index
    %c0_34 = arith.constant 0 : index
    %75 = vector.load %arg8[%c0_33, %c0_34] : memref<1x256xf32, #tpu.memory_space<vmem>>, vector<1x256xf32>
    %76 = vector.broadcast %75 : vector<1x256xf32> to vector<64x256xf32>
    %77 = arith.addf %74, %76 : vector<64x256xf32>
    %78 = arith.addf %63, %77 : vector<64x256xf32>
    %c0_35 = arith.constant 0 : index
    %c0_36 = arith.constant 0 : index
    %79 = vector.load %arg11[%c0_35, %c0_36] : memref<1x256xf32, #tpu.memory_space<vmem>>, vector<1x256xf32>
    %c0_37 = arith.constant 0 : index
    %c0_38 = arith.constant 0 : index
    %80 = vector.load %arg12[%c0_37, %c0_38] : memref<1x256xf32, #tpu.memory_space<vmem>>, vector<1x256xf32>
    %cst_39 = arith.constant dense<0.000000e+00> : vector<64xf32>
    %81 = vector.multi_reduction <add>, %78, %cst_39 [1] : vector<64x256xf32> to vector<64xf32>
    %82 = vector.shape_cast %81 : vector<64xf32> to vector<64x1xf32>
    %cst_40 = arith.constant 0.00714285718 : f32
    %83 = vector.broadcast %cst_40 : f32 to vector<64x1xf32>
    %84 = arith.mulf %82, %83 : vector<64x1xf32>
    %85 = vector.broadcast %84 : vector<64x1xf32> to vector<64x256xf32>
    %86 = arith.subf %78, %85 : vector<64x256xf32>
    %87 = vector.broadcast %7 : vector<1x256xf32> to vector<64x256xf32>
    %88 = arith.mulf %86, %87 : vector<64x256xf32>
    %89 = arith.mulf %88, %88 : vector<64x256xf32>
    %cst_41 = arith.constant dense<0.000000e+00> : vector<64xf32>
    %90 = vector.multi_reduction <add>, %89, %cst_41 [1] : vector<64x256xf32> to vector<64xf32>
    %91 = vector.shape_cast %90 : vector<64xf32> to vector<64x1xf32>
    %cst_42 = arith.constant 0.00714285718 : f32
    %92 = vector.broadcast %cst_42 : f32 to vector<64x1xf32>
    %93 = arith.mulf %91, %92 : vector<64x1xf32>
    %cst_43 = arith.constant 9.99999974E-6 : f32
    %94 = vector.broadcast %cst_43 : f32 to vector<64x1xf32>
    %95 = arith.addf %93, %94 : vector<64x1xf32>
    %96 = math.rsqrt %95 : vector<64x1xf32>
    %97 = vector.broadcast %96 : vector<64x1xf32> to vector<64x256xf32>
    %98 = arith.mulf %88, %97 : vector<64x256xf32>
    %99 = vector.broadcast %79 : vector<1x256xf32> to vector<64x256xf32>
    %100 = arith.mulf %98, %99 : vector<64x256xf32>
    %101 = vector.broadcast %80 : vector<1x256xf32> to vector<64x256xf32>
    %102 = arith.addf %100, %101 : vector<64x256xf32>
    %103 = vector.shape_cast %102 : vector<64x256xf32> to vector<2x32x256xf32>
    %c0_44 = arith.constant 0 : index
    %c0_45 = arith.constant 0 : index
    %c0_46 = arith.constant 0 : index
    %104 = vector.load %arg13[%c0_44, %c0_45, %c0_46] : memref<2x32x256xf32, #tpu.memory_space<vmem>>, vector<2x32x256xf32>
    tpu.vector_store %arg13[%c0_44, %c0_45, %c0_46], %103 {strides = array<i32>} : memref<2x32x256xf32, #tpu.memory_space<vmem>>, vector<2x32x256xf32>,
    %c0_47 = arith.constant 0 : index
    %c0_48 = arith.constant 0 : index
    %c0_49 = arith.constant 0 : index
    %105 = vector.load %arg14[%c0_47, %c0_48, %c0_49] : memref<2x32x32xf32, #tpu.memory_space<vmem>>, vector<2x32x32xf32>
    tpu.vector_store %arg14[%c0_47, %c0_48, %c0_49], %36 {strides = array<i32>} : memref<2x32x32xf32, #tpu.memory_space<vmem>>, vector<2x32x32xf32>,
    return
  }
  func.func @transform_0(%arg0: i32) -> (i32, i32, i32) {
    %c0_i32 = arith.constant 0 : i32
    %c0_i32_0 = arith.constant 0 : i32
    %c0_i32_1 = arith.constant 0 : i32
    return %arg0, %c0_i32, %c0_i32_0 : i32, i32, i32
  }
  func.func @transform_1(%arg0: i32) -> (i32, i32, i32) {
    %c0_i32 = arith.constant 0 : i32
    %c0_i32_0 = arith.constant 0 : i32
    %c0_i32_1 = arith.constant 0 : i32
    return %arg0, %c0_i32, %c0_i32_0 : i32, i32, i32
  }
  func.func @transform_2(%arg0: i32) -> (i32, i32) {
    %c0_i32 = arith.constant 0 : i32
    %c0_i32_0 = arith.constant 0 : i32
    %c0_i32_1 = arith.constant 0 : i32
    return %c0_i32, %c0_i32_0 : i32, i32
  }
  func.func @transform_3(%arg0: i32) -> (i32, i32) {
    %c0_i32 = arith.constant 0 : i32
    %c0_i32_0 = arith.constant 0 : i32
    %c0_i32_1 = arith.constant 0 : i32
    return %c0_i32, %c0_i32_0 : i32, i32
  }
  func.func @transform_4(%arg0: i32) -> (i32, i32) {
    %c0_i32 = arith.constant 0 : i32
    %c0_i32_0 = arith.constant 0 : i32
    %c0_i32_1 = arith.constant 0 : i32
    return %c0_i32, %c0_i32_0 : i32, i32
  }
  func.func @transform_5(%arg0: i32) -> (i32, i32) {
    %c0_i32 = arith.constant 0 : i32
    %c0_i32_0 = arith.constant 0 : i32
    %c0_i32_1 = arith.constant 0 : i32
    return %c0_i32, %c0_i32_0 : i32, i32
  }
  func.func @transform_6(%arg0: i32) -> (i32, i32) {
    %c0_i32 = arith.constant 0 : i32
    %c0_i32_0 = arith.constant 0 : i32
    %c0_i32_1 = arith.constant 0 : i32
    return %c0_i32, %c0_i32_0 : i32, i32
  }
  func.func @transform_7(%arg0: i32) -> (i32, i32) {
    %c0_i32 = arith.constant 0 : i32
    %c0_i32_0 = arith.constant 0 : i32
    %c0_i32_1 = arith.constant 0 : i32
    return %c0_i32, %c0_i32_0 : i32, i32
  }
  func.func @transform_8(%arg0: i32) -> (i32, i32) {
    %c0_i32 = arith.constant 0 : i32
    %c0_i32_0 = arith.constant 0 : i32
    %c0_i32_1 = arith.constant 0 : i32
    return %c0_i32, %c0_i32_0 : i32, i32
  }
  func.func @transform_9(%arg0: i32) -> (i32, i32) {
    %c0_i32 = arith.constant 0 : i32
    %c0_i32_0 = arith.constant 0 : i32
    %c0_i32_1 = arith.constant 0 : i32
    return %c0_i32, %c0_i32_0 : i32, i32
  }
  func.func @transform_10(%arg0: i32) -> (i32, i32) {
    %c0_i32 = arith.constant 0 : i32
    %c0_i32_0 = arith.constant 0 : i32
    %c0_i32_1 = arith.constant 0 : i32
    return %c0_i32, %c0_i32_0 : i32, i32
  }
  func.func @transform_11(%arg0: i32) -> (i32, i32) {
    %c0_i32 = arith.constant 0 : i32
    %c0_i32_0 = arith.constant 0 : i32
    %c0_i32_1 = arith.constant 0 : i32
    return %c0_i32, %c0_i32_0 : i32, i32
  }
  func.func @transform_12(%arg0: i32) -> (i32, i32, i32) {
    %c0_i32 = arith.constant 0 : i32
    %c0_i32_0 = arith.constant 0 : i32
    %c0_i32_1 = arith.constant 0 : i32
    return %arg0, %c0_i32, %c0_i32_0 : i32, i32, i32
  }
  func.func @transform_13(%arg0: i32) -> (i32, i32, i32) {
    %c0_i32 = arith.constant 0 : i32
    %c0_i32_0 = arith.constant 0 : i32
    %c0_i32_1 = arith.constant 0 : i32
    return %arg0, %c0_i32, %c0_i32_0 : i32, i32, i32
  }
}

</mosaic_0001>

<bundles_post_ra>
// kernel: transformer_block.1
= control target key start
LH: loop header
LB: loop body
LE: loop exit
PB: predicated region body
PF: predicated region fallthrough
CT: control target
= control target key end

     0   :  { %19 = vsyncpa [#allocation3], 0  ;;  %s6351_s0 = inlined_call_operand.vmem [shape: f32[2,32,256], index: 0, kind: input, shape index: {}]   ;;  %s6352_s1 = inlined_call_operand.vmem [shape: f32[2,1,32], index: 1, kind: input, shape index: {}]   ;;  %s6353_s2 = inlined_call_operand.hbm [shape: bf16[256,768], index: 2, kind: input, shape index: {}]   ;;  %s6354_s3 = inlined_call_operand.vmem [shape: f32[1,768], index: 3, kind: input, shape index: {}]   ;;  %s6355_s4 = inlined_call_operand.hbm [shape: bf16[256,1024], index: 4, kind: input, shape index: {}]   ;;  %s6356_s5 = inlined_call_operand.vmem [shape: f32[1,1024], index: 5, kind: input, shape index: {}]   ;;  %s6357_s6 = inlined_call_operand.hbm [shape: bf16[1024,256], index: 6, kind: input, shape index: {}]   ;;  %s6358_s7 = inlined_call_operand.vmem [shape: f32[1,256], index: 7, kind: input, shape index: {}]   ;;  %s6359_s8 = inlined_call_operand.vmem [shape: f32[1,256], index: 8, kind: input, shape index: {}]   ;;  %s6360_s9 = inlined_call_operand.vmem [shape: f32[1,256], index: 9, kind: input, shape index: {}]   ;;  %s6361_s10 = inlined_call_operand.vmem [shape: f32[1,256], index: 10, kind: input, shape index: {}]   ;;  %s6362_s11 = inlined_call_operand.vmem [shape: f32[1,256], index: 11, kind: input, shape index: {}]   ;;  %s6363_s12 = inlined_call_operand.hbm [shape: f32[2,32,256], index: 12, kind: output, shape index: {0}]   ;;  %s6364_s13 = inlined_call_operand.hbm [shape: f32[2,32,32], index: 13, kind: output, shape index: {1}]  }
   0x1   :  { %20 = vsyncpa [#allocation6], 0 }
   0x2   :  { %21 = vsyncpa [#allocation4], 0 }
   0x3   :  { %22 = vsyncpa [#allocation10], 0  ;;  %s5205_s25 = smov [#allocation5]   ;;  %s5087_s29 = scalar_lea.hbm %s6355_s4, 16384 }
   0x4   :  { %s46_s26 = sshll.u32 %s5205_s25, 4  ;;  %p5088_p0 = scmp.ne.s32.totalorder %s6355_s4, %s5087_s29  ;;  %s47_s26 = int_to_ptr.vmem [resolvable:$true] %s46_s26 }
   0x5   :  { %p5091_p1 = scmp.lt.u32.totalorder %s5087_s29, %s6355_s4 }
   0x7   :  { %p5093_p2 = pnand %p5091_p1, %p5088_p0 }
   0x9   :  { %5096 = shalt.err (!%p5093_p2)
}
   0xa   :  { %s5097_s17 = scalar_lea.vmem %s47_s26, 16384  ;;  %p5102_p4 = scmp.lt.s32.totalorder %s47_s26, %s47_s26 }
   0xb   :  { %p5098_p3 = scmp.ne.s32.totalorder %s47_s26, %s5097_s17  ;;  %p5103_p5 = scmp.lt.s32.totalorder %s5097_s17, %s5097_s17 }
   0xd   :  { %p5104_p6 = por %p5103_p5, %p5102_p4 }
   0xf   :  { %p5105_p7 = pnand %p5104_p6, %p5098_p3 }
  0x11   :  { %5108 = shalt.err (!%p5105_p7)
}
  0x12   :  { %s5206_s18 = smov 512   ;;  %s5207_s19 = smov 32  }
  0x13   :  { %52 = dma.hbm_to_vmem [thread:$0]  %s6355_s4, 16384, %s47_s26, [#allocation6], %s5206_s18, %s5206_s18, %s5207_s19  }
  0x14   :  { %s5208_s22 = smov [#allocation2]   ;;  %s5109_s27 = scalar_lea.hbm %s6353_s2, 12288 }
  0x15   :  { %s32_s23 = sshll.u32 %s5208_s22, 4  ;;  %p5110_p8 = scmp.ne.s32.totalorder %s6353_s2, %s5109_s27  ;;  %s33_s23 = int_to_ptr.vmem [resolvable:$true] %s32_s23 }
  0x16   :  { %p5113_p9 = scmp.lt.u32.totalorder %s5109_s27, %s6353_s2 }
  0x18   :  { %p5115_p10 = pnand %p5113_p9, %p5110_p8 }
  0x1a   :  { %5118 = shalt.err (!%p5115_p10)
}
  0x1b   :  { %s5119_s15 = scalar_lea.vmem %s33_s23, 12288  ;;  %p5124_p12 = scmp.lt.s32.totalorder %s33_s23, %s33_s23 }
  0x1c   :  { %p5120_p11 = scmp.ne.s32.totalorder %s33_s23, %s5119_s15  ;;  %p5125_p13 = scmp.lt.s32.totalorder %s5119_s15, %s5119_s15 }
  0x1e   :  { %p5126_p0 = por %p5125_p13, %p5124_p12 }
  0x20   :  { %p5127_p1 = pnand %p5126_p0, %p5120_p11 }
  0x22   :  { %5130 = shalt.err (!%p5127_p1)
}
  0x23   :  { %s5209_s4 = smov 384   ;;  %s5210_s26 = smov 24  }
  0x24   :  { %38 = dma.hbm_to_vmem [thread:$0]  %s6353_s2, 12288, %s33_s23, [#allocation3], %s5209_s4, %s5209_s4, %s5210_s26  }
  0x25   :  { %s5211_s18 = smov [#allocation7]   ;;  %s5131_s22 = scalar_lea.hbm %s6357_s6, 16384 }
  0x26   :  { %s60_s19 = sshll.u32 %s5211_s18, 4  ;;  %p5132_p2 = scmp.ne.s32.totalorder %s6357_s6, %s5131_s22  ;;  %s61_s19 = int_to_ptr.vmem [resolvable:$true] %s60_s19 }
  0x27   :  { %p5135_p3 = scmp.lt.u32.totalorder %s5131_s22, %s6357_s6 }
  0x29   :  { %p5137_p4 = pnand %p5135_p3, %p5132_p2 }
  0x2b   :  { %5140 = shalt.err (!%p5137_p4)
}
  0x2c   :  { %s5141_s29 = scalar_lea.vmem %s61_s19, 16384  ;;  %p5146_p6 = scmp.lt.s32.totalorder %s61_s19, %s61_s19 }
  0x2d   :  { %p5142_p5 = scmp.ne.s32.totalorder %s61_s19, %s5141_s29  ;;  %p5147_p7 = scmp.lt.s32.totalorder %s5141_s29, %s5141_s29 }
  0x2f   :  { %p5148_p8 = por %p5147_p7, %p5146_p6 }
  0x31   :  { %p5149_p9 = pnand %p5148_p8, %p5142_p5 }
  0x33   :  { %5152 = shalt.err (!%p5149_p9)
}
  0x34   :  { %s5212_s2 = smov 128   ;;  %s5213_s23 = smov 8  }
  0x35   :  { %66 = dma.hbm_to_vmem [thread:$0]  %s6357_s6, 16384, %s61_s19, [#allocation6], %s5212_s2, %s5212_s2, %s5213_s23  }
  0x36   :  { %5197 = dma.done.wait [#allocation3], 12288  }
  0x37   :  { %5198 = vsyncadd [#allocation3], 4294955008 }
  0x38   :  { %5199 = dma.done.wait [#allocation6], 32768  }
  0x39   :  { %5200 = vsyncadd [#allocation6], 4294934528  ;;  %v4671_v0 = vld [vmem:[#allocation2 + $0x4] ss:$24 sps:$4 sm:$0xff]   ;;  %v4673_v1 = vld [vmem:[#allocation2] ss:$24 sps:$4 sm:$0xff]  }
  0x3a   :  { %727 = vmatprep.subr.bf16.mxu1 %v4671_v0  ;;  %v4674_v2 = vld [vmem:[#allocation2 + $0x34] ss:$24 sps:$4 sm:$0xff]   ;;  %v4676_v3 = vld [vmem:[#allocation2 + $0x30] ss:$24 sps:$4 sm:$0xff]   ;;  %v4677_v4 = vld [vmem:[#allocation2 + $0x64] ss:$24 sps:$4 sm:$0xff]  }
  0x3b   :  { %728 = vmatpush1.bf16.msra.mxu1 %v4673_v1  ;;  %v4679_v5 = vld [vmem:[#allocation2 + $0x60] ss:$24 sps:$4 sm:$0xff]   ;;  %v4680_v6 = vld [vmem:[#allocation2 + $0x94] ss:$24 sps:$4 sm:$0xff]   ;;  %v4682_v7 = vld [vmem:[#allocation2 + $0x90] ss:$24 sps:$4 sm:$0xff]  }
  0x3c   :  { %729 = vmatprep.subr.bf16.mxu1 %v4674_v2  ;;  %v4683_v8 = vld [vmem:[#allocation2 + $0xc4] ss:$24 sps:$4 sm:$0xff]   ;;  %v4685_v9 = vld [vmem:[#allocation2 + $0xc0] ss:$24 sps:$4 sm:$0xff]   ;;  %v4686_v10 = vld [vmem:[#allocation2 + $0xf4] ss:$24 sps:$4 sm:$0xff]  }
  0x3d   :  { %v4688_v11 = vld [vmem:[#allocation2 + $0xf0] ss:$24 sps:$4 sm:$0xff]   ;;  %v4689_v12 = vld [vmem:[#allocation2 + $0x124] ss:$24 sps:$4 sm:$0xff]   ;;  %v4691_v16 = vld [vmem:[#allocation2 + $0x120] ss:$24 sps:$4 sm:$0xff]  }
  0x3e   :  { %v87_v13 = vld [vmem:[%s6351_s0 + $0x8] sm:$0xff]  ;;  %v89_v14 = vld [vmem:[%s6351_s0 + $0x18] sm:$0xff]  ;;  %v86_v35 = vld [vmem:[%s6351_s0] sm:$0xff]  ;;  %vm1140_vm2 = vcmask 261120  }
  0x3f   :  { %730 = vmatpush1.bf16.msra.mxu1 %v4676_v3  ;;  %v5335_v15 = vpack.c.bf16 %v89_v14, %v87_v13  ;;  %v4692_v17 = vld [vmem:[#allocation2 + $0x154] ss:$24 sps:$4 sm:$0xff]   ;;  %v4694_v18 = vld [vmem:[#allocation2 + $0x150] ss:$24 sps:$4 sm:$0xff]   ;;  %v4695_v19 = vld [vmem:[#allocation2 + $0x184] ss:$24 sps:$4 sm:$0xff]  }
  0x40   :  { %731 = vmatprep.subr.bf16.mxu1 %v4677_v4  ;;  %v4697_v20 = vld [vmem:[#allocation2 + $0x180] ss:$24 sps:$4 sm:$0xff]   ;;  %v4698_v21 = vld [vmem:[#allocation2 + $0x1b4] ss:$24 sps:$4 sm:$0xff]   ;;  %v4700_v22 = vld [vmem:[#allocation2 + $0x1b0] ss:$24 sps:$4 sm:$0xff]  }
  0x41   :  { %759 = vmatprep.mubr.bf16.mxu1 %v5335_v15  ;;  %v4701_v23 = vld [vmem:[#allocation2 + $0x1e4] ss:$24 sps:$4 sm:$0xff]   ;;  %v4703_v24 = vld [vmem:[#allocation2 + $0x1e0] ss:$24 sps:$4 sm:$0xff]   ;;  %v4704_v25 = vld [vmem:[#allocation2 + $0x214] ss:$24 sps:$4 sm:$0xff]  }
  0x42   :  { %v4706_v26 = vld [vmem:[#allocation2 + $0x210] ss:$24 sps:$4 sm:$0xff]   ;;  %v4707_v27 = vld [vmem:[#allocation2 + $0x244] ss:$24 sps:$4 sm:$0xff]   ;;  %v4709_v28 = vld [vmem:[#allocation2 + $0x240] ss:$24 sps:$4 sm:$0xff]  }
  0x43   :  { %732 = vmatpush1.bf16.msra.mxu1 %v4679_v5  ;;  %v4710_v29 = vld [vmem:[#allocation2 + $0x274] ss:$24 sps:$4 sm:$0xff]   ;;  %v4712_v30 = vld [vmem:[#allocation2 + $0x270] ss:$24 sps:$4 sm:$0xff]   ;;  %v4713_v31 = vld [vmem:[#allocation2 + $0x2a4] ss:$24 sps:$4 sm:$0xff]  }
  0x44   :  { %733 = vmatprep.subr.bf16.mxu1 %v4680_v6  ;;  %v4715_v32 = vld [vmem:[#allocation2 + $0x2a0] ss:$24 sps:$4 sm:$0xff]   ;;  %v4716_v33 = vld [vmem:[#allocation2 + $0x2d4] ss:$24 sps:$4 sm:$0xff]   ;;  %v4718_v34 = vld [vmem:[#allocation2 + $0x2d0] ss:$24 sps:$4 sm:$0xff]  }
  0x45   :  { %v88_v36 = vld [vmem:[%s6351_s0 + $0x10] sm:$0xff]  ;;  %v4721_v37 = vld [vmem:[#allocation2 + $0xc] ss:$24 sps:$4 sm:$0xff]   ;;  %v93_v39 = vld [vmem:[%s6351_s0 + $0x38] sm:$0xff] }
  0x46   :  { %v91_v38 = vld [vmem:[%s6351_s0 + $0x28] sm:$0xff]  ;;  %v5350_v40 = vpack.c.bf16 %v88_v36, %v86_v35  ;;  %v4724_v43 = vld [vmem:[#allocation2 + $0x3c] ss:$24 sps:$4 sm:$0xff]   ;;  %v4722_v44 = vld [vmem:[#allocation2 + $0x38] ss:$24 sps:$4 sm:$0xff]  }
  0x47   :  { %734 = vmatpush1.bf16.msra.mxu1 %v4682_v7  ;;  %v4719_v41 = vld [vmem:[#allocation2 + $0x8] ss:$24 sps:$4 sm:$0xff]   ;;  %v5352_v42 = vpack.c.bf16 %v93_v39, %v91_v38  ;;  %v4727_v45 = vld [vmem:[#allocation2 + $0x6c] ss:$24 sps:$4 sm:$0xff]   ;;  %v92_v47 = vld [vmem:[%s6351_s0 + $0x30] sm:$0xff] }
  0x48   :  { %735 = vmatprep.subr.bf16.mxu1 %v4683_v8  ;;  %v90_v46 = vld [vmem:[%s6351_s0 + $0x20] sm:$0xff]  ;;  %v95_v48 = vld [vmem:[%s6351_s0 + $0x48] sm:$0xff]  ;;  %v97_v49 = vld [vmem:[%s6351_s0 + $0x58] sm:$0xff] }
  0x49   :  { %v4725_v50 = vld [vmem:[#allocation2 + $0x68] ss:$24 sps:$4 sm:$0xff]   ;;  %v4730_v51 = vld [vmem:[#allocation2 + $0x9c] ss:$24 sps:$4 sm:$0xff]   ;;  %v5368_v52 = vpack.c.bf16 %v92_v47, %v90_v46  ;;  %v5370_v53 = vpack.c.bf16 %v97_v49, %v95_v48  ;;  %v4728_v54 = vld [vmem:[#allocation2 + $0x98] ss:$24 sps:$4 sm:$0xff]  }
  0x4a   :  { %v94_v55 = vld [vmem:[%s6351_s0 + $0x40] sm:$0xff]  ;;  %v96_v56 = vld [vmem:[%s6351_s0 + $0x50] sm:$0xff]  ;;  %v99_v58 = vld [vmem:[%s6351_s0 + $0x68] sm:$0xff] }
  0x4b   :  { %736 = vmatpush1.bf16.msra.mxu1 %v4685_v9  ;;  %v4733_v57 = vld [vmem:[#allocation2 + $0xcc] ss:$24 sps:$4 sm:$0xff]   ;;  %v101_v59 = vld [vmem:[%s6351_s0 + $0x78] sm:$0xff]  ;;  %v4731_v60 = vld [vmem:[#allocation2 + $0xc8] ss:$24 sps:$4 sm:$0xff]   ;;  %v5386_v62 = vpack.c.bf16 %v96_v56, %v94_v55 }
  0x4c   :  { %737 = vmatprep.subr.bf16.mxu1 %v4686_v10  ;;  %v4736_v61 = vld [vmem:[#allocation2 + $0xfc] ss:$24 sps:$4 sm:$0xff]   ;;  %v5388_v63 = vpack.c.bf16 %v101_v59, %v99_v58  ;;  %v4734_v0 = vld [vmem:[#allocation2 + $0xf8] ss:$24 sps:$4 sm:$0xff]   ;;  %v98_v1 = vld [vmem:[%s6351_s0 + $0x60] sm:$0xff] }
  0x4d   :  { %v4739_v2 = vld [vmem:[#allocation2 + $0x12c] ss:$24 sps:$4 sm:$0xff]   ;;  %v100_v3 = vld [vmem:[%s6351_s0 + $0x70] sm:$0xff]  ;;  %v4737_v4 = vld [vmem:[#allocation2 + $0x128] ss:$24 sps:$4 sm:$0xff]  }
  0x4e   :  { %v4742_v5 = vld [vmem:[#allocation2 + $0x15c] ss:$24 sps:$4 sm:$0xff]   ;;  %v5398_v6 = vpack.c.bf16 %v100_v3, %v98_v1  ;;  %v4740_v7 = vld [vmem:[#allocation2 + $0x158] ss:$24 sps:$4 sm:$0xff]   ;;  %v4745_v8 = vld [vmem:[#allocation2 + $0x18c] ss:$24 sps:$4 sm:$0xff]  }
  0x4f   :  { %738 = vmatpush1.bf16.msra.mxu1 %v4688_v11  ;;  %v4743_v9 = vld [vmem:[#allocation2 + $0x188] ss:$24 sps:$4 sm:$0xff]   ;;  %v4748_v10 = vld [vmem:[#allocation2 + $0x1bc] ss:$24 sps:$4 sm:$0xff]   ;;  %v4746_v11 = vld [vmem:[#allocation2 + $0x1b8] ss:$24 sps:$4 sm:$0xff]  }
  0x50   :  { %739 = vmatprep.subr.bf16.mxu1 %v4689_v12  ;;  %v4751_v12 = vld [vmem:[#allocation2 + $0x1ec] ss:$24 sps:$4 sm:$0xff]   ;;  %v4749_v13 = vld [vmem:[#allocation2 + $0x1e8] ss:$24 sps:$4 sm:$0xff]   ;;  %v4754_v14 = vld [vmem:[#allocation2 + $0x21c] ss:$24 sps:$4 sm:$0xff]  }
  0x51   :  { %v4784_v35 = vld [vmem:[#allocation2 + $0x104] ss:$24 sps:$4 sm:$0xff]   ;;  %v4782_v36 = vld [vmem:[#allocation2 + $0x100] ss:$24 sps:$4 sm:$0xff]   ;;  %v4785_v38 = vld [vmem:[#allocation2 + $0x130] ss:$24 sps:$4 sm:$0xff]  }
  0x52   :  { %v4790_v39 = vld [vmem:[#allocation2 + $0x164] ss:$24 sps:$4 sm:$0xff]   ;;  %v4794_v46 = vld [vmem:[#allocation2 + $0x1c0] ss:$24 sps:$4 sm:$0xff]   ;;  %v4799_v47 = vld [vmem:[#allocation2 + $0x1f4] ss:$24 sps:$4 sm:$0xff]  }
  0x53   :  { %740 = vmatpush1.bf16.msra.mxu1 %v4691_v16  ;;  %v4752_v16 = vld [vmem:[#allocation2 + $0x218] ss:$24 sps:$4 sm:$0xff]   ;;  %v4802_v49 = vld [vmem:[#allocation2 + $0x224] ss:$24 sps:$4 sm:$0xff]   ;;  %v4811_v56 = vld [vmem:[#allocation2 + $0x2b4] ss:$24 sps:$4 sm:$0xff]  }
  0x54   :  { %741 = vmatprep.subr.bf16.mxu1 %v4692_v17  ;;  %v4757_v17 = vld [vmem:[#allocation2 + $0x24c] ss:$24 sps:$4 sm:$0xff]   ;;  %v4797_v48 = vld [vmem:[#allocation2 + $0x1f0] ss:$24 sps:$4 sm:$0xff]   ;;  %v4806_v55 = vld [vmem:[#allocation2 + $0x280] ss:$24 sps:$4 sm:$0xff]  }
  0x55   :  { %v4814_v58 = vld [vmem:[#allocation2 + $0x2e4] ss:$24 sps:$4 sm:$0xff]   ;;  %v4812_v59 = vld [vmem:[#allocation2 + $0x2e0] ss:$24 sps:$4 sm:$0xff]  }
  0x57   :  { %742 = vmatpush1.bf16.msra.mxu1 %v4694_v18  ;;  %v4755_v18 = vld [vmem:[#allocation2 + $0x248] ss:$24 sps:$4 sm:$0xff]  }
  0x58   :  { %743 = vmatprep.subr.bf16.mxu1 %v4695_v19  ;;  %v4760_v19 = vld [vmem:[#allocation2 + $0x27c] ss:$24 sps:$4 sm:$0xff]  }
  0x5b   :  { %744 = vmatpush1.bf16.msra.mxu1 %v4697_v20  ;;  %v4758_v20 = vld [vmem:[#allocation2 + $0x278] ss:$24 sps:$4 sm:$0xff]  }
  0x5c   :  { %745 = vmatprep.subr.bf16.mxu1 %v4698_v21  ;;  %v4763_v21 = vld [vmem:[#allocation2 + $0x2ac] ss:$24 sps:$4 sm:$0xff]  }
  0x5f   :  { %746 = vmatpush1.bf16.msra.mxu1 %v4700_v22  ;;  %v4761_v22 = vld [vmem:[#allocation2 + $0x2a8] ss:$24 sps:$4 sm:$0xff]  }
  0x60   :  { %747 = vmatprep.subr.bf16.mxu1 %v4701_v23  ;;  %v4766_v23 = vld [vmem:[#allocation2 + $0x2dc] ss:$24 sps:$4 sm:$0xff]  }
  0x63   :  { %748 = vmatpush1.bf16.msra.mxu1 %v4703_v24  ;;  %v4764_v24 = vld [vmem:[#allocation2 + $0x2d8] ss:$24 sps:$4 sm:$0xff]  }
  0x64   :  { %749 = vmatprep.subr.bf16.mxu1 %v4704_v25  ;;  %v4769_v25 = vld [vmem:[#allocation2 + $0x14] ss:$24 sps:$4 sm:$0xff]  }
  0x67   :  { %750 = vmatpush1.bf16.msra.mxu1 %v4706_v26  ;;  %v4767_v26 = vld [vmem:[#allocation2 + $0x10] ss:$24 sps:$4 sm:$0xff]  }
  0x68   :  { %751 = vmatprep.subr.bf16.mxu1 %v4707_v27  ;;  %v4772_v27 = vld [vmem:[#allocation2 + $0x44] ss:$24 sps:$4 sm:$0xff]  }
  0x6b   :  { %752 = vmatpush1.bf16.msra.mxu1 %v4709_v28  ;;  %v4770_v28 = vld [vmem:[#allocation2 + $0x40] ss:$24 sps:$4 sm:$0xff]  }
  0x6c   :  { %753 = vmatprep.subr.bf16.mxu1 %v4710_v29  ;;  %v4775_v29 = vld [vmem:[#allocation2 + $0x74] ss:$24 sps:$4 sm:$0xff]  }
  0x6f   :  { %754 = vmatpush1.bf16.msra.mxu1 %v4712_v30  ;;  %v4773_v30 = vld [vmem:[#allocation2 + $0x70] ss:$24 sps:$4 sm:$0xff]  }
  0x70   :  { %755 = vmatprep.subr.bf16.mxu1 %v4713_v31  ;;  %v4778_v31 = vld [vmem:[#allocation2 + $0xa4] ss:$24 sps:$4 sm:$0xff]  }
  0x73   :  { %756 = vmatpush1.bf16.msra.mxu1 %v4715_v32  ;;  %v4776_v32 = vld [vmem:[#allocation2 + $0xa0] ss:$24 sps:$4 sm:$0xff]  }
  0x74   :  { %757 = vmatprep.subr.bf16.mxu1 %v4716_v33  ;;  %v4781_v33 = vld [vmem:[#allocation2 + $0xd4] ss:$24 sps:$4 sm:$0xff]  }
  0x77   :  { %758 = vmatpush1.bf16.msra.mxu1 %v4718_v34  ;;  %v4779_v34 = vld [vmem:[#allocation2 + $0xd0] ss:$24 sps:$4 sm:$0xff]  }
  0x78   :  { %800 = vmatprep.subr.bf16.mxu1 %v4721_v37  ;;  %v4787_v37 = vld [vmem:[#allocation2 + $0x134] ss:$24 sps:$4 sm:$0xff]  }
  0x7a   :  { %760 = vmatmul.mubr.bf16.vlgmr.msra.gmra.mrb[0].mxu1 %v5350_v40 }
  0x7b   :  { %801 = vmatpush1.bf16.msra.mxu1 %v4719_v41  ;;  %769 = vmatprep.mubr.bf16.mxu1 %v5352_v42  ;;  %v4788_v41 = vld [vmem:[#allocation2 + $0x160] ss:$24 sps:$4 sm:$0xff]  }
  0x7c   :  { %802 = vmatprep.subr.bf16.mxu1 %v4724_v43  ;;  %v4793_v43 = vld [vmem:[#allocation2 + $0x194] ss:$24 sps:$4 sm:$0xff]  }
  0x7f   :  { %803 = vmatpush1.bf16.msra.mxu1 %v4722_v44  ;;  %v4791_v44 = vld [vmem:[#allocation2 + $0x190] ss:$24 sps:$4 sm:$0xff]  }
  0x80   :  { %804 = vmatprep.subr.bf16.mxu1 %v4727_v45  ;;  %v4796_v45 = vld [vmem:[#allocation2 + $0x1c4] ss:$24 sps:$4 sm:$0xff]  }
  0x82   :  { %770 = vmatmul.mubr.bf16.gmra.mrb[4].mxu1 %v5368_v52 }
  0x83   :  { %805 = vmatpush1.bf16.msra.mxu1 %v4725_v50  ;;  %779 = vmatprep.mubr.bf16.mxu1 %v5370_v53  ;;  %v4800_v50 = vld [vmem:[#allocation2 + $0x220] ss:$24 sps:$4 sm:$0xff]  }
  0x84   :  { %806 = vmatprep.subr.bf16.mxu1 %v4730_v51  ;;  %v4805_v51 = vld [vmem:[#allocation2 + $0x254] ss:$24 sps:$4 sm:$0xff]  }
  0x87   :  { %807 = vmatpush1.bf16.msra.mxu1 %v4728_v54  ;;  %v4808_v54 = vld [vmem:[#allocation2 + $0x284] ss:$24 sps:$4 sm:$0xff]  }
  0x88   :  { %808 = vmatprep.subr.bf16.mxu1 %v4733_v57  ;;  %v4809_v57 = vld [vmem:[#allocation2 + $0x2b0] ss:$24 sps:$4 sm:$0xff]  }
  0x8a   :  { %780 = vmatmul.mubr.bf16.gmra.mrb[8].mxu1 %v5386_v62 }
  0x8b   :  { %809 = vmatpush1.bf16.msra.mxu1 %v4731_v60  ;;  %789 = vmatprep.mubr.bf16.mxu1 %v5388_v63  ;;  %v110_v60 = vlaneseq }
  0x8c   :  { %810 = vmatprep.subr.bf16.mxu1 %v4736_v61 }
  0x8d   :  { %v5418_v61 = vshrl.u32 %v110_v60, 7 }
  0x8f   :  { %811 = vmatpush1.bf16.msra.mxu1 %v4734_v0  ;;  %v5421_v0 = vsub.s32 1, %v5418_v61 }
  0x90   :  { %812 = vmatprep.subr.bf16.mxu1 %v4739_v2 }
  0x92   :  { %790 = vmatmul.mubr.bf16.gmra.mrb[12].mxu1 %v5398_v6 }
  0x93   :  { %813 = vmatpush1.bf16.msra.mxu1 %v4737_v4  ;;  %832 = vmatprep.mubr.bf16.mxu1 %v5335_v15 }
  0x94   :  { %814 = vmatprep.subr.bf16.mxu1 %v4742_v5 }
  0x97   :  { %815 = vmatpush1.bf16.msra.mxu1 %v4740_v7 }
  0x98   :  { %816 = vmatprep.subr.bf16.mxu1 %v4745_v8 }
  0x9b   :  { %817 = vmatpush1.bf16.msra.mxu1 %v4743_v9 }
  0x9c   :  { %818 = vmatprep.subr.bf16.mxu1 %v4748_v10 }
  0x9f   :  { %819 = vmatpush1.bf16.msra.mxu1 %v4746_v11 }
  0xa0   :  { %820 = vmatprep.subr.bf16.mxu1 %v4751_v12 }
  0xa3   :  { %821 = vmatpush1.bf16.msra.mxu1 %v4749_v13 }
  0xa4   :  { %822 = vmatprep.subr.bf16.mxu1 %v4754_v14 }
  0xa7   :  { %823 = vmatpush1.bf16.msra.mxu1 %v4752_v16 }
  0xa8   :  { %824 = vmatprep.subr.bf16.mxu1 %v4757_v17 }
  0xab   :  { %825 = vmatpush1.bf16.msra.mxu1 %v4755_v18 }
  0xac   :  { %826 = vmatprep.subr.bf16.mxu1 %v4760_v19 }
  0xaf   :  { %827 = vmatpush1.bf16.msra.mxu1 %v4758_v20 }
  0xb0   :  { %828 = vmatprep.subr.bf16.mxu1 %v4763_v21 }
  0xb3   :  { %829 = vmatpush1.bf16.msra.mxu1 %v4761_v22  ;;  %v227_v22 = vsub.s32 2, %v5418_v61 }
  0xb4   :  { %830 = vmatprep.subr.bf16.mxu1 %v4766_v23  ;;  %v231_v23 = vsub.s32 3, %v5418_v61 }
  0xb7   :  { %831 = vmatpush1.bf16.msra.mxu1 %v4764_v24 }
  0xb8   :  { %873 = vmatprep.subr.bf16.mxu1 %v4769_v25 }
  0xba   :  { %833 = vmatmul.mubr.bf16.vlgmr.msra.gmra.mrb[16].mxu1 %v5350_v40 }
  0xbb   :  { %842 = vmatprep.mubr.bf16.mxu1 %v5352_v42  ;;  %874 = vmatpush1.bf16.msra.mxu1 %v4767_v26 }
  0xbc   :  { %875 = vmatprep.subr.bf16.mxu1 %v4772_v27 }
  0xbf   :  { %876 = vmatpush1.bf16.msra.mxu1 %v4770_v28 }
  0xc0   :  { %877 = vmatprep.subr.bf16.mxu1 %v4775_v29 }
  0xc2   :  { %843 = vmatmul.mubr.bf16.gmra.mrb[20].mxu1 %v5368_v52 }
  0xc3   :  { %852 = vmatprep.mubr.bf16.mxu1 %v5370_v53  ;;  %878 = vmatpush1.bf16.msra.mxu1 %v4773_v30 }
  0xc4   :  { %879 = vmatprep.subr.bf16.mxu1 %v4778_v31 }
  0xc7   :  { %880 = vmatpush1.bf16.msra.mxu1 %v4776_v32 }
  0xc8   :  { %881 = vmatprep.subr.bf16.mxu1 %v4781_v33 }
  0xca   :  { %853 = vmatmul.mubr.bf16.gmra.mrb[24].mxu1 %v5386_v62 }
  0xcb   :  { %862 = vmatprep.mubr.bf16.mxu1 %v5388_v63  ;;  %882 = vmatpush1.bf16.msra.mxu1 %v4779_v34 }
  0xcc   :  { %883 = vmatprep.subr.bf16.mxu1 %v4784_v35 }
  0xcf   :  { %884 = vmatpush1.bf16.msra.mxu1 %v4782_v36 }
  0xd0   :  { %885 = vmatprep.subr.bf16.mxu1 %v4787_v37 }
  0xd2   :  { %863 = vmatmul.mubr.bf16.gmra.mrb[28].mxu1 %v5398_v6 }
  0xd3   :  { %886 = vmatpush1.bf16.msra.mxu1 %v4785_v38  ;;  %905 = vmatprep.mubr.bf16.mxu1 %v5335_v15  ;;  %v4803_v15 = vld [vmem:[#allocation2 + $0x250] ss:$24 sps:$4 sm:$0xff]  }
  0xd4   :  { %887 = vmatprep.subr.bf16.mxu1 %v4790_v39 }
  0xd7   :  { %888 = vmatpush1.bf16.msra.mxu1 %v4788_v41 }
  0xd8   :  { %889 = vmatprep.subr.bf16.mxu1 %v4793_v43 }
  0xdb   :  { %890 = vmatpush1.bf16.msra.mxu1 %v4791_v44 }
  0xdc   :  { %891 = vmatprep.subr.bf16.mxu1 %v4796_v45 }
  0xdf   :  { %892 = vmatpush1.bf16.msra.mxu1 %v4794_v46 }
  0xe0   :  { %893 = vmatprep.subr.bf16.mxu1 %v4799_v47  ;;  %v5469_v47 = vsub.s32 0, %v5418_v61 }
  0xe3   :  { %894 = vmatpush1.bf16.msra.mxu1 %v4797_v48 }
  0xe4   :  { %895 = vmatprep.subr.bf16.mxu1 %v4802_v49 }
  0xe7   :  { %896 = vmatpush1.bf16.msra.mxu1 %v4800_v50 }
  0xe8   :  { %897 = vmatprep.subr.bf16.mxu1 %v4805_v51 }
  0xeb   :  { %898 = vmatpush1.bf16.msra.mxu1 %v4803_v15 }
  0xec   :  { %899 = vmatprep.subr.bf16.mxu1 %v4808_v54 }
  0xef   :  { %900 = vmatpush1.bf16.msra.mxu1 %v4806_v55 }
  0xf0   :  { %901 = vmatprep.subr.bf16.mxu1 %v4811_v56 }
  0xf3   :  { %902 = vmatpush1.bf16.msra.mxu1 %v4809_v57 }
  0xf4   :  { %903 = vmatprep.subr.bf16.mxu1 %v4814_v58 }
  0xf7   :  { %904 = vmatpush1.bf16.msra.mxu1 %v4812_v59 }
  0xfa   :  { %906 = vmatmul.mubr.bf16.vlgmr.msra.gmra.mrb[32].mxu1 %v5350_v40  ;;  %v5426_v40 = vld [vmem:[%s6354_s3] sm:$0x3f] }
  0xfb   :  { %915 = vmatprep.mubr.bf16.mxu1 %v5352_v42  ;;  %v224_v42 = vrot.slane %v5426_v40, %v5421_v0  ;;  %v228_v24 = vrot.slane %v5426_v40, %v227_v22  ;;  %v232_v26 = vrot.slane %v5426_v40, %v231_v23  ;;  %v220_v15 = vrot.slane %v5426_v40, %v5469_v47 }
 0x102   :  { %916 = vmatmul.mubr.bf16.gmra.mrb[36].mxu1 %v5368_v52 }
 0x103   :  { %925 = vmatprep.mubr.bf16.mxu1 %v5370_v53 }
 0x10a   :  { %926 = vmatmul.mubr.bf16.gmra.mrb[40].mxu1 %v5386_v62 }
 0x10b   :  { %935 = vmatprep.mubr.bf16.mxu1 %v5388_v63 }
 0x112   :  { %936 = vmatmul.mubr.bf16.gmra.mrb[44].mxu1 %v5398_v6 }
 0x14d   :  { %v5430_v52 = vpop.f32.mrb[0].mxu1 }
 0x14e   :  { %v763_v53 = vpop.f32.mrb[1].mxu1 }
 0x14f   :  { %v764_v62 = vadd.f32 %v763_v53, %v224_v42  ;;  %v5432_v63 = vpop.f32.mrb[2].mxu1 }
 0x150   :  { %v767_v1 = vpop.f32.mrb[3].mxu1 }
 0x151   :  { %v5434_v2 = vadd.f32 %v767_v1, %v224_v42  ;;  %1010 = vmatprep.mubr.f32.mxu1 %v764_v62 }
 0x155   :  { %v5436_v3 = vpop.f32.mrb[4].mxu1 }
 0x156   :  { %v773_v4 = vpop.f32.mrb[5].mxu1 }
 0x157   :  { %v5438_v5 = vadd.f32 %v773_v4, %v224_v42  ;;  %v5440_v6 = vpop.f32.mrb[6].mxu1 }
 0x158   :  { %v777_v7 = vpop.f32.mrb[7].mxu1 }
 0x159   :  { %v5442_v8 = vadd.f32 %v777_v7, %v224_v42  ;;  %v766_v7 = vadd.f32 %v5432_v63, %v220_v15 }
 0x15d   :  { %v5444_v9 = vpop.f32.mrb[8].mxu1 }
 0x15e   :  { %v783_v10 = vpop.f32.mrb[9].mxu1  ;;  %v782_v63 = vadd.f32 %v5444_v9, %v220_v15  ;;  %v239_v9 = vsub.s32 5, %v5418_v61 }
 0x15f   :  { %v5446_v11 = vadd.f32 %v783_v10, %v224_v42  ;;  %v5448_v12 = vpop.f32.mrb[10].mxu1 }
 0x160   :  { %v787_v13 = vpop.f32.mrb[11].mxu1 }
 0x161   :  { %v5450_v14 = vadd.f32 %v787_v13, %v224_v42 }
 0x165   :  { %v5452_v16 = vpop.f32.mrb[12].mxu1 }
 0x166   :  { %v793_v17 = vpop.f32.mrb[13].mxu1 }
 0x167   :  { %v5454_v18 = vadd.f32 %v793_v17, %v224_v42  ;;  %v5456_v19 = vpop.f32.mrb[14].mxu1 }
 0x168   :  { %v797_v20 = vpop.f32.mrb[15].mxu1 }
 0x169   :  { %v5458_v21 = vadd.f32 %v797_v20, %v224_v42  ;;  %v762_v42 = vadd.f32 %v5430_v52, %v220_v15  ;;  %v772_v52 = vadd.f32 %v5436_v3, %v220_v15  ;;  %v792_v3 = vadd.f32 %v5452_v16, %v220_v15 }
 0x18d   :  { %v834_v25 = vpop.f32.mrb[16].mxu1 }
 0x18e   :  { %v836_v27 = vpop.f32.mrb[17].mxu1  ;;  %v835_v29 = vadd.f32 %v834_v25, %v228_v24 }
 0x18f   :  { %v838_v28 = vpop.f32.mrb[18].mxu1  ;;  %v837_v32 = vadd.f32 %v836_v27, %v232_v26 }
 0x190   :  { %v839_v30 = vadd.f32 %v838_v28, %v228_v24  ;;  %v840_v31 = vpop.f32.mrb[19].mxu1 }
 0x191   :  { %v841_v33 = vadd.f32 %v840_v31, %v232_v26 }
 0x192   :  { %v4562_v34 = vpack.c.bf16 %v839_v30, %v835_v29 }
 0x193   :  { %v4560_v35 = vpack.c.bf16 %v841_v33, %v837_v32 }
 0x195   :  { %v844_v36 = vpop.f32.mrb[20].mxu1  ;;  %4561 = vmatprep.subr.bf16.mxu1 %v4560_v35 }
 0x196   :  { %v846_v37 = vpop.f32.mrb[21].mxu1  ;;  %4563 = vmatpush1.bf16.xpose.msra.mxu1 %v4562_v34  ;;  %v845_v39 = vadd.f32 %v844_v36, %v228_v24 }
 0x197   :  { %v848_v38 = vpop.f32.mrb[22].mxu1  ;;  %v847_v44 = vadd.f32 %v846_v37, %v232_v26 }
 0x198   :  { %v849_v41 = vadd.f32 %v848_v38, %v228_v24  ;;  %v850_v43 = vpop.f32.mrb[23].mxu1 }
 0x199   :  { %v851_v45 = vadd.f32 %v850_v43, %v232_v26 }
 0x19a   :  { %v4566_v46 = vpack.c.bf16 %v849_v41, %v845_v39 }
 0x19b   :  { %v4564_v48 = vpack.c.bf16 %v851_v45, %v847_v44 }
 0x19d   :  { %v854_v49 = vpop.f32.mrb[24].mxu1  ;;  %4565 = vmatprep.subr.bf16.mxu1 %v4564_v48 }
 0x19e   :  { %v855_v50 = vadd.f32 %v854_v49, %v228_v24  ;;  %v856_v51 = vpop.f32.mrb[25].mxu1  ;;  %4567 = vmatpush1.bf16.xpose.msra.mxu1 %v4566_v46 }
 0x19f   :  { %v857_v54 = vadd.f32 %v856_v51, %v232_v26  ;;  %v858_v55 = vpop.f32.mrb[26].mxu1 }
 0x1a0   :  { %v859_v56 = vadd.f32 %v858_v55, %v228_v24  ;;  %v860_v57 = vpop.f32.mrb[27].mxu1 }
 0x1a1   :  { %v861_v58 = vadd.f32 %v860_v57, %v232_v26 }
 0x1a2   :  { %v4570_v59 = vpack.c.bf16 %v859_v56, %v855_v50 }
 0x1a3   :  { %v4568_v53 = vpack.c.bf16 %v861_v58, %v857_v54 }
 0x1a5   :  { %v864_v62 = vpop.f32.mrb[28].mxu1  ;;  %1011 = vmatmul.mubr.f32.vlgmr.msra.gmra.mrb[48].mxu1 %v762_v42  ;;  %4569 = vmatprep.subr.bf16.mxu1 %v4568_v53 }
 0x1a6   :  { %v865_v1 = vadd.f32 %v864_v62, %v228_v24  ;;  %v866_v4 = vpop.f32.mrb[29].mxu1  ;;  %1015 = vmatprep.mubr.f32.mxu1 %v5434_v2  ;;  %4571 = vmatpush1.bf16.xpose.msra.mxu1 %v4570_v59  ;;  %v776_v2 = vadd.f32 %v5440_v6, %v220_v15  ;;  %v796_v6 = vadd.f32 %v5456_v19, %v220_v15 }
 0x1a7   :  { %v867_v10 = vadd.f32 %v866_v4, %v232_v26  ;;  %v868_v13 = vpop.f32.mrb[30].mxu1 }
 0x1a8   :  { %v869_v17 = vadd.f32 %v868_v13, %v228_v24  ;;  %v870_v20 = vpop.f32.mrb[31].mxu1 }
 0x1a9   :  { %v871_v25 = vadd.f32 %v870_v20, %v232_v26  ;;  %1016 = vmatmul.mubr.f32.gmra.mrb[50].mxu1 %v766_v7  ;;  %v1116_v7 = vld [vmem:[%s6352_s1] sm:$0x1] }
 0x1aa   :  { %v4574_v27 = vpack.c.bf16 %v869_v17, %v865_v1  ;;  %1020 = vmatprep.mubr.f32.mxu1 %v5438_v5  ;;  %v786_v5 = vadd.f32 %v5448_v12, %v220_v15  ;;  %v240_v12 = vrot.slane %v5426_v40, %v239_v9  ;;  %vm1118_vm0 = vcmp.gt.f32.partialorder %v1116_v7, 0.5 }
 0x1ab   :  { %v4572_v28 = vpack.c.bf16 %v871_v25, %v867_v10  ;;  %v5214_v10 = vmov 0  }
 0x1ac   :  { %v1120_v13 = vsel %vm1118_vm0, 1, %v5214_v10 }
 0x1ad   :  { %1021 = vmatmul.mubr.f32.gmra.mrb[52].mxu1 %v772_v52  ;;  %4573 = vmatprep.subr.bf16.mxu1 %v4572_v28  ;;  %v1125_v17 = vrot.slane %v1120_v13, %v5469_v47  ;;  %v1117_v28 = vld [vmem:[%s6352_s1 + $0x1] sm:$0x1] }
 0x1ae   :  { %1025 = vmatprep.mubr.f32.mxu1 %v5442_v8  ;;  %4575 = vmatpush1.bf16.xpose.msra.mxu1 %v4574_v27  ;;  %v235_v8 = vsub.s32 4, %v5418_v61  ;;  %vm1119_vm3 = vcmp.gt.f32.partialorder %v1117_v28, 0.5 }
 0x1af   :  { %vm5500_vm1 = vcmp.eq.s32.totalorder %v1125_v17, 1 }
 0x1b1   :  { %1026 = vmatmul.mubr.f32.gmra.mrb[54].mxu1 %v776_v2 }
 0x1b2   :  { %1095 = vmatprep.mubr.f32.mxu1 %v5446_v11  ;;  %v236_v11 = vrot.slane %v5426_v40, %v235_v8 }
 0x1b5   :  { %1096 = vmatmul.mubr.f32.vlgmr.msra.gmra.mrb[56].mxu1 %v782_v63 }
 0x1b6   :  { %1100 = vmatprep.mubr.f32.mxu1 %v5450_v14 }
 0x1b9   :  { %1101 = vmatmul.mubr.f32.gmra.mrb[58].mxu1 %v786_v5 }
 0x1ba   :  { %1105 = vmatprep.mubr.f32.mxu1 %v5454_v18 }
 0x1bd   :  { %1106 = vmatmul.mubr.f32.gmra.mrb[60].mxu1 %v792_v3 }
 0x1be   :  { %1110 = vmatprep.mubr.f32.mxu1 %v5458_v21 }
 0x1c1   :  { %1111 = vmatmul.mubr.f32.gmra.mrb[62].mxu1 %v796_v6 }
 0x1cd   :  { %v907_v14 = vpop.f32.mrb[32].mxu1 }
 0x1ce   :  { %v908_v16 = vadd.f32 %v907_v14, %v236_v11  ;;  %v909_v18 = vpop.f32.mrb[33].mxu1 }
 0x1cf   :  { %v910_v24 = vadd.f32 %v909_v18, %v240_v12  ;;  %v911_v21 = vpop.f32.mrb[34].mxu1 }
 0x1d0   :  { %v912_v26 = vadd.f32 %v911_v21, %v236_v11  ;;  %v913_v19 = vpop.f32.mrb[35].mxu1 }
 0x1d1   :  { %v914_v29 = vadd.f32 %v913_v19, %v240_v12 }
 0x1d2   :  { %v4578_v30 = vpack.c.bf16 %v912_v26, %v908_v16 }
 0x1d3   :  { %v4576_v31 = vpack.c.bf16 %v914_v29, %v910_v24 }
 0x1d5   :  { %v917_v32 = vpop.f32.mrb[36].mxu1  ;;  %4577 = vmatprep.subr.bf16.mxu0 %v4576_v31 }
 0x1d6   :  { %v918_v33 = vadd.f32 %v917_v32, %v236_v11  ;;  %v919_v34 = vpop.f32.mrb[37].mxu1  ;;  %4579 = vmatpush1.bf16.msra.mxu0 %v4578_v30  ;;  %v5215_v30 = vmov 0.0  }
 0x1d7   :  { %v920_v35 = vadd.f32 %v919_v34, %v240_v12  ;;  %v921_v36 = vpop.f32.mrb[38].mxu1  ;;  %1305 = vmatprep.mubr.f32.mxu0 %v5215_v30  ;;  %1406 = vmatprep.mubr.f32.mxu1 %v5215_v30 }
 0x1d8   :  { %v922_v37 = vadd.f32 %v921_v36, %v236_v11  ;;  %v923_v38 = vpop.f32.mrb[39].mxu1 }
 0x1d9   :  { %v924_v40 = vadd.f32 %v923_v38, %v240_v12 }
 0x1da   :  { %v4582_v39 = vpack.c.bf16 %v922_v37, %v918_v33 }
 0x1db   :  { %v4580_v41 = vpack.c.bf16 %v924_v40, %v920_v35 }
 0x1dd   :  { %v927_v43 = vpop.f32.mrb[40].mxu1  ;;  %4581 = vmatprep.subr.bf16.mxu0 %v4580_v41 }
 0x1de   :  { %v928_v44 = vadd.f32 %v927_v43, %v236_v11  ;;  %v929_v45 = vpop.f32.mrb[41].mxu1  ;;  %4583 = vmatpush1.bf16.msra.mxu0 %v4582_v39 }
 0x1df   :  { %v930_v46 = vadd.f32 %v929_v45, %v240_v12  ;;  %v931_v48 = vpop.f32.mrb[42].mxu1 }
 0x1e0   :  { %v932_v49 = vadd.f32 %v931_v48, %v236_v11  ;;  %v933_v50 = vpop.f32.mrb[43].mxu1 }
 0x1e1   :  { %v934_v51 = vadd.f32 %v933_v50, %v240_v12 }
 0x1e2   :  { %v4586_v15 = vpack.c.bf16 %v932_v49, %v928_v44 }
 0x1e3   :  { %v4584_v54 = vpack.c.bf16 %v934_v51, %v930_v46 }
 0x1e5   :  { %v937_v55 = vpop.f32.mrb[44].mxu1  ;;  %4585 = vmatprep.subr.bf16.mxu1 %v4584_v54 }
 0x1e6   :  { %v938_v56 = vadd.f32 %v937_v55, %v236_v11  ;;  %v939_v57 = vpop.f32.mrb[45].mxu1  ;;  %4587 = vmatpush1.bf16.msra.mxu1 %v4586_v15 }
 0x1e7   :  { %v940_v58 = vadd.f32 %v939_v57, %v240_v12  ;;  %v941_v59 = vpop.f32.mrb[46].mxu1 }
 0x1e8   :  { %v942_v42 = vadd.f32 %v941_v59, %v236_v11  ;;  %v943_v53 = vpop.f32.mrb[47].mxu1  ;;  %v1121_v11 = vsel %vm1119_vm3, 1, %v5214_v10 }
 0x1e9   :  { %v944_v62 = vadd.f32 %v943_v53, %v240_v12  ;;  %v1129_v24 = vrot.slane %v1121_v11, %v5469_v47 }
 0x1ea   :  { %v4590_v1 = vpack.c.bf16 %v942_v42, %v938_v56 }
 0x1eb   :  { %v4588_v4 = vpack.c.bf16 %v944_v62, %v940_v58  ;;  %vm5520_vm4 = vcmp.eq.s32.totalorder %v1129_v24, 1 }
 0x1ed   :  { %4589 = vmatprep.subr.bf16.mxu1 %v4588_v4 }
 0x1ee   :  { %4591 = vmatpush1.bf16.msra.mxu1 %v4590_v1 }
 0x278   :  { %v1012_v25 = vpop.f32.mrb[48].mxu1 }
 0x279   :  { %v1132_v27 = vsel %vm5500_vm1, -1e+30, %v1012_v25  ;;  %v1014_v52 = vpop.f32.mrb[49].mxu1 }
 0x27a   :  { %v1141_v2 = vsel %vm1140_vm2, %v1132_v27, -inf }
 0x27b   :  { %1142 = vmax.xlane.f32.xlu0 %v1141_v2 }
 0x27c   :  { %v1017_v63 = vpop.f32.mrb[50].mxu1 }
 0x27d   :  { %v1133_v5 = vsel %vm5500_vm1, -1e+30, %v1017_v63  ;;  %v1019_v3 = vpop.f32.mrb[51].mxu1 }
 0x27e   :  { %v1144_v6 = vsel %vm1140_vm2, %v1133_v5, -inf }
 0x27f   :  { %1145 = vmax.xlane.f32.xlu0 %v1144_v6 }
 0x280   :  { %v1022_v12 = vpop.f32.mrb[52].mxu1 }
 0x281   :  { %v1134_v14 = vsel %vm5500_vm1, -1e+30, %v1022_v12  ;;  %v1024_v16 = vpop.f32.mrb[53].mxu1 }
 0x282   :  { %v1147_v18 = vsel %vm1140_vm2, %v1134_v14, -inf }
 0x283   :  { %1148 = vmax.xlane.f32.xlu1 %v1147_v18 }
 0x284   :  { %v1027_v21 = vpop.f32.mrb[54].mxu1 }
 0x285   :  { %v1135_v26 = vsel %vm5500_vm1, -1e+30, %v1027_v21  ;;  %v1029_v19 = vpop.f32.mrb[55].mxu1 }
 0x286   :  { %v1150_v29 = vsel %vm1140_vm2, %v1135_v26, -inf }
 0x287   :  { %1151 = vmax.xlane.f32.xlu1 %v1150_v29 }
 0x288   :  { %v1097_v31 = vpop.f32.mrb[56].mxu1 }
 0x289   :  { %v1136_v32 = vsel %vm5520_vm4, -1e+30, %v1097_v31  ;;  %v1099_v33 = vpop.f32.mrb[57].mxu1 }
 0x28a   :  { %v1153_v34 = vsel %vm1140_vm2, %v1136_v32, -inf }
 0x28b   :  { %1154 = vmax.xlane.f32.xlu0 %v1153_v34 }
 0x28c   :  { %v1102_v35 = vpop.f32.mrb[58].mxu1 }
 0x28d   :  { %v1137_v36 = vsel %vm5520_vm4, -1e+30, %v1102_v35  ;;  %v1104_v37 = vpop.f32.mrb[59].mxu1 }
 0x28e   :  { %v1156_v38 = vsel %vm1140_vm2, %v1137_v36, -inf }
 0x28f   :  { %1157 = vmax.xlane.f32.xlu1 %v1156_v38 }
 0x290   :  { %v1107_v40 = vpop.f32.mrb[60].mxu1 }
 0x291   :  { %v1138_v39 = vsel %vm5520_vm4, -1e+30, %v1107_v40  ;;  %v1109_v41 = vpop.f32.mrb[61].mxu1 }
 0x292   :  { %v1159_v43 = vsel %vm1140_vm2, %v1138_v39, -inf }
 0x293   :  { %1160 = vmax.xlane.f32.xlu0 %v1159_v43 }
 0x294   :  { %v1112_v44 = vpop.f32.mrb[62].mxu1 }
 0x295   :  { %v1139_v45 = vsel %vm5520_vm4, -1e+30, %v1112_v44  ;;  %v1114_v46 = vpop.f32.mrb[63].mxu1 }
 0x296   :  { %v1162_v48 = vsel %vm1140_vm2, %v1139_v45, -inf }
 0x297   :  { %1163 = vmax.xlane.f32.xlu1 %v1162_v48 }
 0x308   :  { %v1143_v49 = vpop.xlane.xlu0 %1142 }
 0x309   :  { %v1165_v50 = vsub.f32 %v1132_v27, %v1143_v49 }
 0x30b   :  { %v1173_v51 = vmul.f32 1.442695, %v1165_v50 }
 0x30c   :  { %v1146_v15 = vpop.xlane.xlu0 %1145 }
 0x30d   :  { %5007 = vpow2.f32 %v1173_v51  ;;  %v1166_v54 = vsub.f32 %v1133_v5, %v1146_v15 }
 0x30f   :  { %v1175_v55 = vmul.f32 1.442695, %v1166_v54 }
 0x310   :  { %v1149_v56 = vpop.xlane.xlu1 %1148 }
 0x311   :  { %5009 = vpow2.f32 %v1175_v55  ;;  %v1167_v57 = vsub.f32 %v1134_v14, %v1149_v56 }
 0x313   :  { %v1177_v58 = vmul.f32 1.442695, %v1167_v57 }
 0x314   :  { %v1152_v59 = vpop.xlane.xlu1 %1151 }
 0x315   :  { %5011 = vpow2.f32 %v1177_v58  ;;  %v1168_v42 = vsub.f32 %v1135_v26, %v1152_v59 }
 0x317   :  { %v5008_v53 = vpop.eup %5007  ;;  %v1179_v62 = vmul.f32 1.442695, %v1168_v42  ;;  %v5071_v42 = vld [vmem:[%s6351_s0] sm:$0xff] }
 0x318   :  { %v1155_v1 = vpop.xlane.xlu0 %1154  ;;  %v1189_v4 = vsel %vm1140_vm2, %v5008_v53, 0.0 }
 0x319   :  { %5013 = vpow2.f32 %v1179_v62  ;;  %v1169_v7 = vsub.f32 %v1136_v32, %v1155_v1  ;;  %1190 = vadd.xlane.f32.xlu0 %v1189_v4  ;;  %v5072_v1 = vld [vmem:[%s6351_s0 + $0x8] sm:$0xff] }
 0x31b   :  { %v5010_v10 = vpop.eup %5009  ;;  %v1181_v13 = vmul.f32 1.442695, %v1169_v7 }
 0x31c   :  { %v1158_v17 = vpop.xlane.xlu1 %1157  ;;  %v1192_v20 = vsel %vm1140_vm2, %v5010_v10, 0.0 }
 0x31d   :  { %5015 = vpow2.f32 %v1181_v13  ;;  %v1170_v25 = vsub.f32 %v1137_v36, %v1158_v17  ;;  %1193 = vadd.xlane.f32.xlu1 %v1192_v20  ;;  %v5073_v13 = vld [vmem:[%s6351_s0 + $0x10] sm:$0xff] }
 0x31f   :  { %v5012_v27 = vpop.eup %5011  ;;  %v1183_v52 = vmul.f32 1.442695, %v1170_v25  ;;  %v5074_v25 = vld [vmem:[%s6351_s0 + $0x18] sm:$0xff] }
 0x320   :  { %v1161_v28 = vpop.xlane.xlu0 %1160  ;;  %v1195_v2 = vsel %vm1140_vm2, %v5012_v27, 0.0 }
 0x321   :  { %5017 = vpow2.f32 %v1183_v52  ;;  %v1171_v63 = vsub.f32 %v1138_v39, %v1161_v28  ;;  %1196 = vadd.xlane.f32.xlu0 %v1195_v2  ;;  %v5075_v2 = vld [vmem:[%s6351_s0 + $0x20] sm:$0xff] }
 0x323   :  { %v5014_v5 = vpop.eup %5013  ;;  %v1185_v3 = vmul.f32 1.442695, %v1171_v63 }
 0x324   :  { %v1164_v6 = vpop.xlane.xlu1 %1163  ;;  %v1198_v11 = vsel %vm1140_vm2, %v5014_v5, 0.0 }
 0x325   :  { %5019 = vpow2.f32 %v1185_v3  ;;  %v1172_v12 = vsub.f32 %v1139_v45, %v1164_v6  ;;  %1199 = vadd.xlane.f32.xlu1 %v1198_v11  ;;  %v5076_v3 = vld [vmem:[%s6351_s0 + $0x28] sm:$0xff] }
 0x327   :  { %v5016_v14 = vpop.eup %5015  ;;  %v1187_v16 = vmul.f32 1.442695, %v1172_v12 }
 0x328   :  { %v1201_v18 = vsel %vm1140_vm2, %v5016_v14, 0.0 }
 0x329   :  { %5021 = vpow2.f32 %v1187_v16  ;;  %1202 = vadd.xlane.f32.xlu0 %v1201_v18 }
 0x32b   :  { %v5018_v24 = vpop.eup %5017 }
 0x32c   :  { %v1204_v21 = vsel %vm1140_vm2, %v5018_v24, 0.0 }
 0x32d   :  { %1205 = vadd.xlane.f32.xlu1 %v1204_v21 }
 0x32f   :  { %v5020_v26 = vpop.eup %5019 }
 0x330   :  { %v1207_v19 = vsel %vm1140_vm2, %v5020_v26, 0.0 }
 0x331   :  { %1208 = vadd.xlane.f32.xlu0 %v1207_v19 }
 0x333   :  { %v5022_v29 = vpop.eup %5021 }
 0x334   :  { %v1210_v31 = vsel %vm1140_vm2, %v5022_v29, 0.0 }
 0x335   :  { %1211 = vadd.xlane.f32.xlu1 %v1210_v31 }
 0x3a6   :  { %v1191_v32 = vpop.xlane.xlu0 %1190 }
 0x3a7   :  { %5023 = vrcp.f32 %v1191_v32 }
 0x3aa   :  { %v1194_v33 = vpop.xlane.xlu1 %1193 }
 0x3ab   :  { %5025 = vrcp.f32 %v1194_v33  ;;  %v5080_v33 = vld [vmem:[%s6351_s0 + $0x48] sm:$0xff] }
 0x3ae   :  { %v1197_v34 = vpop.xlane.xlu0 %1196 }
 0x3af   :  { %5027 = vrcp.f32 %v1197_v34 }
 0x3b1   :  { %v5024_v35 = vpop.eup %5023 }
 0x3b2   :  { %v1200_v36 = vpop.xlane.xlu1 %1199  ;;  %v1221_v37 = vmul.f32 %v5024_v35, %v5008_v53 }
 0x3b3   :  { %5029 = vrcp.f32 %v1200_v36 }
 0x3b4   :  { %4296 = vmatmul.mubr.msk.f32.vlgmr.msra.gmra.mrb[0].mxu0 %vm1140_vm2, %v1221_v37  ;;  %4157 = vst.msk [vmem:[#allocation9] sm:$0xff] %vm1140_vm2, %v1221_v37  ;;  %v5081_v37 = vld [vmem:[%s6351_s0 + $0x50] sm:$0xff] }
 0x3b5   :  { %v5026_v38 = vpop.eup %5025  ;;  %1311 = vmatprep.mubr.f32.mxu0 %v5215_v30 }
 0x3b6   :  { %v1203_v40 = vpop.xlane.xlu0 %1202  ;;  %v1222_v39 = vmul.f32 %v5026_v38, %v5010_v10 }
 0x3b7   :  { %5031 = vrcp.f32 %v1203_v40 }
 0x3b8   :  { %4297 = vmatmul.mubr.msk.f32.gmra.mrb[2].mxu0 %vm1140_vm2, %v1222_v39  ;;  %4158 = vst.msk [vmem:[#allocation9 + $0x8] sm:$0xff] %vm1140_vm2, %v1222_v39  ;;  %v5082_v39 = vld [vmem:[%s6351_s0 + $0x58] sm:$0xff] }
 0x3b9   :  { %v5028_v41 = vpop.eup %5027  ;;  %1317 = vmatprep.mubr.f32.mxu0 %v5215_v30 }
 0x3ba   :  { %v1206_v43 = vpop.xlane.xlu1 %1205  ;;  %v1223_v44 = vmul.f32 %v5028_v41, %v5012_v27 }
 0x3bb   :  { %5033 = vrcp.f32 %v1206_v43 }
 0x3bc   :  { %4298 = vmatmul.mubr.msk.f32.gmra.mrb[4].mxu0 %vm1140_vm2, %v1223_v44  ;;  %4159 = vst.msk [vmem:[#allocation9 + $0x10] sm:$0xff] %vm1140_vm2, %v1223_v44 }
 0x3bd   :  { %v5030_v45 = vpop.eup %5029  ;;  %1323 = vmatprep.mubr.f32.mxu0 %v5215_v30 }
 0x3be   :  { %v1209_v46 = vpop.xlane.xlu0 %1208  ;;  %v1224_v48 = vmul.f32 %v5030_v45, %v5014_v5  ;;  %v5083_v45 = vld [vmem:[%s6351_s0 + $0x60] sm:$0xff] }
 0x3bf   :  { %5035 = vrcp.f32 %v1209_v46 }
 0x3c0   :  { %4299 = vmatmul.mubr.msk.f32.gmra.mrb[6].mxu0 %vm1140_vm2, %v1224_v48  ;;  %4160 = vst.msk [vmem:[#allocation9 + $0x18] sm:$0xff] %vm1140_vm2, %v1224_v48 }
 0x3c1   :  { %v5032_v49 = vpop.eup %5031 }
 0x3c2   :  { %v1225_v50 = vmul.f32 %v5032_v49, %v5016_v14  ;;  %v1212_v51 = vpop.xlane.xlu1 %1211  ;;  %v5077_v14 = vld [vmem:[%s6351_s0 + $0x30] sm:$0xff]  ;;  %v5084_v49 = vld [vmem:[%s6351_s0 + $0x68] sm:$0xff] }
 0x3c3   :  { %5037 = vrcp.f32 %v1212_v51 }
 0x3c4   :  { %4161 = vst.msk [vmem:[#allocation9 + $0x20] sm:$0xff] %vm1140_vm2, %v1225_v50  ;;  %4300 = vmatmul.mubr.msk.f32.vlgmr.msra.gmra.mrb[64].mxu1 %vm1140_vm2, %v1225_v50 }
 0x3c5   :  { %v5034_v15 = vpop.eup %5033  ;;  %1412 = vmatprep.mubr.f32.mxu1 %v5215_v30 }
 0x3c6   :  { %v1226_v54 = vmul.f32 %v5034_v15, %v5018_v24  ;;  %v5078_v24 = vld [vmem:[%s6351_s0 + $0x38] sm:$0xff] }
 0x3c8   :  { %4301 = vmatmul.mubr.msk.f32.gmra.mrb[66].mxu1 %vm1140_vm2, %v1226_v54  ;;  %4162 = vst.msk [vmem:[#allocation9 + $0x28] sm:$0xff] %vm1140_vm2, %v1226_v54  ;;  %v5085_v54 = vld [vmem:[%s6351_s0 + $0x70] sm:$0xff] }
 0x3c9   :  { %v5036_v55 = vpop.eup %5035  ;;  %1418 = vmatprep.mubr.f32.mxu1 %v5215_v30 }
 0x3ca   :  { %v1227_v56 = vmul.f32 %v5036_v55, %v5020_v26 }
 0x3cc   :  { %4302 = vmatmul.mubr.msk.f32.gmra.mrb[68].mxu1 %vm1140_vm2, %v1227_v56  ;;  %4163 = vst.msk [vmem:[#allocation9 + $0x30] sm:$0xff] %vm1140_vm2, %v1227_v56 }
 0x3cd   :  { %v5038_v57 = vpop.eup %5037  ;;  %1424 = vmatprep.mubr.f32.mxu1 %v5215_v30 }
 0x3ce   :  { %v1228_v58 = vmul.f32 %v5038_v57, %v5022_v29  ;;  %v5079_v29 = vld [vmem:[%s6351_s0 + $0x40] sm:$0xff]  ;;  %v5086_v57 = vld [vmem:[%s6351_s0 + $0x78] sm:$0xff] }
 0x3d0   :  { %4303 = vmatmul.mubr.msk.f32.gmra.mrb[70].mxu1 %vm1140_vm2, %v1228_v58  ;;  %4164 = vst.msk [vmem:[#allocation9 + $0x38] sm:$0xff] %vm1140_vm2, %v1228_v58 }
 0x487   :  { %v1307_v59 = vpop.f32.mrb[0].mxu0 }
 0x488   :  { %v5571_v53 = vadd.f32 %v5071_v42, %v1307_v59  ;;  %v1309_v62 = vpop.f32.mrb[1].mxu0  ;;  %v1655_v42 = vld [vmem:[#allocation5] sm:$0xff] }
 0x489   :  { %v5576_v4 = vadd.f32 %v5072_v1, %v1309_v62  ;;  %v1659_v62 = vld [vmem:[#allocation5 + $0x20] sm:$0xff]  ;;  %v1656_v1 = vld [vmem:[#allocation5 + $0x8] sm:$0xff] }
 0x48b   :  { %v1313_v7 = vpop.f32.mrb[2].mxu0  ;;  %v1449_v10 = vadd.f32 %v5576_v4, %v5571_v53 }
 0x48c   :  { %v5583_v17 = vadd.f32 %v5073_v13, %v1313_v7  ;;  %v1315_v20 = vpop.f32.mrb[3].mxu0  ;;  %v4304_v7 = vcombine.low %v1655_v42, %v1659_v62  ;;  %v1660_v13 = vld [vmem:[#allocation5 + $0x28] sm:$0xff] }
 0x48d   :  { %v5588_v27 = vadd.f32 %v5074_v25, %v1315_v20  ;;  %1450 = vadd.xlane.f32.xlu0 %v1449_v10  ;;  %v4305_v10 = vcombine.high %v1655_v42, %v1659_v62  ;;  %v1663_v20 = vld [vmem:[#allocation5 + $0x40] sm:$0xff]  ;;  %v1696_v62 = vld [vmem:[#allocation5 + $0x148] sm:$0xff] }
 0x48e   :  { %v1667_v25 = vld [vmem:[#allocation5 + $0x60] sm:$0xff] }
 0x48f   :  { %v1319_v52 = vpop.f32.mrb[4].mxu0  ;;  %v1452_v28 = vadd.f32 %v5588_v27, %v5583_v17  ;;  %2465 = vmatprep.subr.bf16.mxu0 %v4305_v10  ;;  %v1699_v42 = vld [vmem:[#allocation5 + $0x160] sm:$0xff] }
 0x490   :  { %v5595_v63 = vadd.f32 %v5075_v2, %v1319_v52  ;;  %v1321_v5 = vpop.f32.mrb[5].mxu0  ;;  %v4306_v52 = vcombine.low %v1656_v1, %v1660_v13  ;;  %v4313_v2 = vcombine.high %v1663_v20, %v1667_v25  ;;  %2466 = vmatpush1.bf16.msra.mxu0 %v4304_v7 }
 0x491   :  { %v5600_v6 = vadd.f32 %v5076_v3, %v1321_v5  ;;  %1453 = vadd.xlane.f32.xlu1 %v1452_v28  ;;  %v4307_v28 = vcombine.high %v1656_v1, %v1660_v13  ;;  %v1664_v5 = vld [vmem:[#allocation5 + $0x48] sm:$0xff] }
 0x492   :  { %v1668_v3 = vld [vmem:[#allocation5 + $0x68] sm:$0xff]  ;;  %2467 = vmatprep.subr.bf16.mxu0 %v4313_v2 }
 0x493   :  { %v1325_v11 = vpop.f32.mrb[6].mxu0  ;;  %v1455_v12 = vadd.f32 %v5600_v6, %v5595_v63  ;;  %2538 = vmatprep.subr.bf16.mxu1 %v4307_v28  ;;  %v1700_v1 = vld [vmem:[#allocation5 + $0x168] sm:$0xff] }
 0x494   :  { %v5607_v16 = vadd.f32 %v5077_v14, %v1325_v11  ;;  %v1327_v18 = vpop.f32.mrb[7].mxu0  ;;  %v1671_v11 = vld [vmem:[#allocation5 + $0x80] sm:$0xff]  ;;  %2539 = vmatpush1.bf16.msra.mxu1 %v4306_v52  ;;  %v1704_v28 = vld [vmem:[#allocation5 + $0x188] sm:$0xff] }
 0x495   :  { %v5612_v21 = vadd.f32 %v5078_v24, %v1327_v18  ;;  %1456 = vadd.xlane.f32.xlu0 %v1455_v12  ;;  %v4315_v12 = vcombine.high %v1664_v5, %v1668_v3  ;;  %v1675_v14 = vld [vmem:[#allocation5 + $0xa0] sm:$0xff]  ;;  %v1672_v18 = vld [vmem:[#allocation5 + $0x88] sm:$0xff] }
 0x496   :  { %v1676_v24 = vld [vmem:[#allocation5 + $0xa8] sm:$0xff]  ;;  %v1707_v52 = vld [vmem:[#allocation5 + $0x1a0] sm:$0xff] }
 0x497   :  { %v1408_v26 = vpop.f32.mrb[64].mxu1  ;;  %v1458_v19 = vadd.f32 %v5612_v21, %v5607_v16  ;;  %2540 = vmatprep.subr.bf16.mxu1 %v4315_v12  ;;  %v1708_v2 = vld [vmem:[#allocation5 + $0x1a8] sm:$0xff] }
 0x498   :  { %v5619_v31 = vadd.f32 %v5079_v29, %v1408_v26  ;;  %v1410_v32 = vpop.f32.mrb[65].mxu1  ;;  %v4312_v26 = vcombine.low %v1663_v20, %v1667_v25  ;;  %v4321_v29 = vcombine.high %v1671_v11, %v1675_v14  ;;  %v4347_v20 = vcombine.high %v1696_v62, %v1700_v1  ;;  %v1703_v25 = vld [vmem:[#allocation5 + $0x180] sm:$0xff] }
 0x499   :  { %v5624_v34 = vadd.f32 %v5080_v33, %v1410_v32  ;;  %1459 = vadd.xlane.f32.xlu1 %v1458_v19  ;;  %v4314_v19 = vcombine.low %v1664_v5, %v1668_v3  ;;  %v4323_v32 = vcombine.high %v1672_v18, %v1676_v24  ;;  %v1679_v33 = vld [vmem:[#allocation5 + $0xc0] sm:$0xff]  ;;  %v4346_v3 = vcombine.low %v1696_v62, %v1700_v1 }
 0x49a   :  { %2468 = vmatpush1.bf16.msra.mxu0 %v4312_v26  ;;  %v4355_v12 = vcombine.high %v1704_v28, %v1708_v2  ;;  %v1716_v26 = vld [vmem:[#allocation5 + $0x1e8] sm:$0xff]  ;;  %v111_v1 = vand.u32 127, %v110_v60 }
 0x49b   :  { %v1414_v35 = vpop.f32.mrb[66].mxu1  ;;  %v1461_v36 = vadd.f32 %v5624_v34, %v5619_v31  ;;  %2541 = vmatpush1.bf16.msra.mxu1 %v4314_v19  ;;  %2469 = vmatprep.subr.bf16.mxu0 %v4321_v29  ;;  %v4352_v19 = vcombine.low %v1703_v25, %v1707_v52  ;;  %v4354_v29 = vcombine.low %v1704_v28, %v1708_v2 }
 0x49c   :  { %v5631_v38 = vadd.f32 %v5081_v37, %v1414_v35  ;;  %v1416_v40 = vpop.f32.mrb[67].mxu1  ;;  %v1683_v35 = vld [vmem:[#allocation5 + $0xe0] sm:$0xff]  ;;  %v1684_v37 = vld [vmem:[#allocation5 + $0xe8] sm:$0xff]  ;;  %2542 = vmatprep.subr.bf16.mxu1 %v4323_v32 }
 0x49d   :  { %v5636_v41 = vadd.f32 %v5082_v39, %v1416_v40  ;;  %1462 = vadd.xlane.f32.xlu0 %v1461_v36  ;;  %v1680_v36 = vld [vmem:[#allocation5 + $0xc8] sm:$0xff]  ;;  %v4320_v40 = vcombine.low %v1671_v11, %v1675_v14  ;;  %v4322_v39 = vcombine.low %v1672_v18, %v1676_v24  ;;  %v4353_v11 = vcombine.high %v1703_v25, %v1707_v52  ;;  %v1711_v14 = vld [vmem:[#allocation5 + $0x1c0] sm:$0xff] }
 0x49e   :  { %v1715_v18 = vld [vmem:[#allocation5 + $0x1e0] sm:$0xff]  ;;  %v1712_v24 = vld [vmem:[#allocation5 + $0x1c8] sm:$0xff] }
 0x49f   :  { %v1420_v43 = vpop.f32.mrb[68].mxu1  ;;  %v1464_v44 = vadd.f32 %v5636_v41, %v5631_v38  ;;  %2470 = vmatpush1.bf16.msra.mxu0 %v4320_v40  ;;  %2543 = vmatpush1.bf16.msra.mxu1 %v4322_v39  ;;  %v4361_v32 = vcombine.high %v1711_v14, %v1715_v18  ;;  %v1724_v40 = vld [vmem:[#allocation5 + $0x228] sm:$0xff]  ;;  %v4360_v39 = vcombine.low %v1711_v14, %v1715_v18 }
 0x4a0   :  { %v5643_v46 = vadd.f32 %v5083_v45, %v1420_v43  ;;  %v1422_v48 = vpop.f32.mrb[69].mxu1  ;;  %v4329_v43 = vcombine.high %v1679_v33, %v1683_v35  ;;  %v1687_v45 = vld [vmem:[#allocation5 + $0x100] sm:$0xff] }
 0x4a1   :  { %v5648_v50 = vadd.f32 %v5084_v49, %v1422_v48  ;;  %1465 = vadd.xlane.f32.xlu1 %v1464_v44  ;;  %v4331_v44 = vcombine.high %v1680_v36, %v1684_v37  ;;  %v1691_v48 = vld [vmem:[#allocation5 + $0x120] sm:$0xff]  ;;  %v1688_v49 = vld [vmem:[#allocation5 + $0x108] sm:$0xff] }
 0x4a2   :  { %2471 = vmatprep.subr.bf16.mxu0 %v4329_v43  ;;  %v4336_v7 = vcombine.low %v1687_v45, %v1691_v48  ;;  %v4362_v43 = vcombine.low %v1712_v24, %v1716_v26 }
 0x4a3   :  { %v1426_v51 = vpop.f32.mrb[70].mxu1  ;;  %v1467_v15 = vadd.f32 %v5648_v50, %v5643_v46  ;;  %2544 = vmatprep.subr.bf16.mxu1 %v4331_v44 }
 0x4a4   :  { %v5655_v55 = vadd.f32 %v5085_v54, %v1426_v51  ;;  %v1428_v56 = vpop.f32.mrb[71].mxu1  ;;  %v1692_v51 = vld [vmem:[#allocation5 + $0x128] sm:$0xff]  ;;  %v4330_v54 = vcombine.low %v1680_v36, %v1684_v37  ;;  %v1723_v36 = vld [vmem:[#allocation5 + $0x220] sm:$0xff] }
 0x4a5   :  { %v5660_v58 = vadd.f32 %v5086_v57, %v1428_v56  ;;  %1468 = vadd.xlane.f32.xlu0 %v1467_v15  ;;  %v4328_v15 = vcombine.low %v1679_v33, %v1683_v35  ;;  %v4337_v56 = vcombine.high %v1687_v45, %v1691_v48  ;;  %v4339_v57 = vcombine.high %v1688_v49, %v1692_v51  ;;  %v1719_v35 = vld [vmem:[#allocation5 + $0x200] sm:$0xff]  ;;  %v1720_v37 = vld [vmem:[#allocation5 + $0x208] sm:$0xff] }
 0x4a6   :  { %2545 = vmatpush1.bf16.msra.mxu1 %v4330_v54  ;;  %v4338_v10 = vcombine.low %v1688_v49, %v1692_v51  ;;  %v4363_v33 = vcombine.high %v1712_v24, %v1716_v26  ;;  %v4369_v44 = vcombine.high %v1719_v35, %v1723_v36  ;;  %v4371_v45 = vcombine.high %v1720_v37, %v1724_v40  ;;  %v1727_v48 = vld [vmem:[#allocation5 + $0x240] sm:$0xff]  ;;  %v1728_v51 = vld [vmem:[#allocation5 + $0x248] sm:$0xff] }
 0x4a7   :  { %v1470_v59 = vadd.f32 %v5660_v58, %v5655_v55  ;;  %2472 = vmatpush1.bf16.msra.mxu0 %v4328_v15  ;;  %2546 = vmatprep.subr.bf16.mxu1 %v4339_v57  ;;  %v1731_v49 = vld [vmem:[#allocation5 + $0x260] sm:$0xff]  ;;  %v1732_v15 = vld [vmem:[#allocation5 + $0x268] sm:$0xff]  ;;  %v4368_v54 = vcombine.low %v1719_v35, %v1723_v36 }
 0x4a8   :  { %2473 = vmatprep.subr.bf16.mxu0 %v4337_v56  ;;  %v4370_v56 = vcombine.low %v1720_v37, %v1724_v40  ;;  %v4377_v57 = vcombine.high %v1727_v48, %v1731_v49  ;;  %v4378_v62 = vcombine.low %v1728_v51, %v1732_v15 }
 0x4a9   :  { %1471 = vadd.xlane.f32.xlu1 %v1470_v59  ;;  %v1695_v59 = vld [vmem:[#allocation5 + $0x140] sm:$0xff] }
 0x4aa   :  { %v4345_v13 = vcombine.high %v1695_v59, %v1699_v42  ;;  %v4344_v5 = vcombine.low %v1695_v59, %v1699_v42  ;;  %2547 = vmatpush1.bf16.msra.mxu1 %v4338_v10  ;;  %v4379_v59 = vcombine.high %v1728_v51, %v1732_v15  ;;  %v4376_v42 = vcombine.low %v1727_v48, %v1731_v49 }
 0x4ab   :  { %2474 = vmatpush1.bf16.msra.mxu0 %v4336_v7  ;;  %2548 = vmatprep.subr.bf16.mxu1 %v4347_v20  ;;  %v112_v7 = vadd.s32 128, %v111_v1  ;;  %v1739_v1 = vld [vmem:[#allocation5 + $0x2a0] sm:$0xff] }
 0x4ac   :  { %2475 = vmatprep.subr.bf16.mxu0 %v4345_v13 }
 0x4ad   :  { %vm114_vm5 = vcmp.lt.s32.totalorder %v112_v7, 140  ;;  %v1736_v7 = vld [vmem:[#allocation5 + $0x288] sm:$0xff] }
 0x4ae   :  { %2549 = vmatpush1.bf16.msra.mxu1 %v4346_v3  ;;  %v5666_v20 = vsel %vm114_vm5, 1.0, %v5215_v30 }
 0x4af   :  { %2476 = vmatpush1.bf16.msra.mxu0 %v4344_v5  ;;  %2550 = vmatprep.subr.bf16.mxu1 %v4355_v12 }
 0x4b0   :  { %2477 = vmatprep.subr.bf16.mxu0 %v4353_v11 }
 0x4b2   :  { %2551 = vmatpush1.bf16.msra.mxu1 %v4354_v29 }
 0x4b3   :  { %2478 = vmatpush1.bf16.msra.mxu0 %v4352_v19  ;;  %2552 = vmatprep.subr.bf16.mxu1 %v4363_v33 }
 0x4b4   :  { %2479 = vmatprep.subr.bf16.mxu0 %v4361_v32 }
 0x4b6   :  { %2553 = vmatpush1.bf16.msra.mxu1 %v4362_v43 }
 0x4b7   :  { %2480 = vmatpush1.bf16.msra.mxu0 %v4360_v39  ;;  %2554 = vmatprep.subr.bf16.mxu1 %v4371_v45 }
 0x4b8   :  { %2481 = vmatprep.subr.bf16.mxu0 %v4369_v44 }
 0x4ba   :  { %2555 = vmatpush1.bf16.msra.mxu1 %v4370_v56 }
 0x4bb   :  { %2482 = vmatpush1.bf16.msra.mxu0 %v4368_v54  ;;  %2556 = vmatprep.subr.bf16.mxu1 %v4379_v59 }
 0x4bc   :  { %2483 = vmatprep.subr.bf16.mxu0 %v4377_v57 }
 0x4be   :  { %2557 = vmatpush1.bf16.msra.mxu1 %v4378_v62  ;;  %v1735_v62 = vld [vmem:[#allocation5 + $0x280] sm:$0xff] }
 0x4bf   :  { %2484 = vmatpush1.bf16.msra.mxu0 %v4376_v42 }
 0x51a   :  { %v1451_v10 = vpop.xlane.xlu0 %1450 }
 0x51b   :  { %v1473_v13 = vmul.f32 0.007142857, %v1451_v10  ;;  %v1740_v10 = vld [vmem:[#allocation5 + $0x2a8] sm:$0xff] }
 0x51d   :  { %v5669_v25 = vsub.f32 %v5571_v53, %v1473_v13  ;;  %v1482_v52 = vsub.f32 %v5576_v4, %v1473_v13 }
 0x51e   :  { %v1454_v28 = vpop.xlane.xlu1 %1453 }
 0x51f   :  { %v5673_v2 = vmul.f32 %v5666_v20, %v1482_v52  ;;  %v1474_v5 = vmul.f32 0.007142857, %v1454_v28  ;;  %v1513_v11 = vmul.f32 %v5669_v25, %v5669_v25 }
 0x521   :  { %v5676_v3 = vsub.f32 %v5583_v17, %v1474_v5  ;;  %v1484_v60 = vsub.f32 %v5588_v27, %v1474_v5  ;;  %v1514_v30 = vmul.f32 %v5673_v2, %v5673_v2  ;;  %v4384_v5 = vcombine.low %v1735_v62, %v1739_v1 }
 0x522   :  { %v1457_v53 = vpop.xlane.xlu0 %1456 }
 0x523   :  { %v5684_v12 = vmul.f32 %v5666_v20, %v1484_v60  ;;  %v1475_v4 = vmul.f32 0.007142857, %v1457_v53  ;;  %v1529_v14 = vadd.f32 %v1514_v30, %v1513_v11  ;;  %v1515_v27 = vmul.f32 %v5676_v3, %v5676_v3 }
 0x524   :  { %v4386_v11 = vcombine.low %v1736_v7, %v1740_v10  ;;  %v4387_v30 = vcombine.high %v1736_v7, %v1740_v10  ;;  %v1767_v10 = vld [vmem:[#allocation5 + $0x380] sm:$0xff] }
 0x525   :  { %v5687_v18 = vsub.f32 %v5595_v63, %v1475_v4  ;;  %v1486_v17 = vsub.f32 %v5600_v6, %v1475_v4  ;;  %1530 = vadd.xlane.f32.xlu0 %v1529_v14  ;;  %v1516_v24 = vmul.f32 %v5684_v12, %v5684_v12 }
 0x526   :  { %v1460_v26 = vpop.xlane.xlu1 %1459  ;;  %2558 = vmatprep.subr.bf16.mxu1 %v4387_v30 }
 0x527   :  { %v5695_v19 = vmul.f32 %v5666_v20, %v1486_v17  ;;  %v1476_v29 = vmul.f32 0.007142857, %v1460_v26  ;;  %v1532_v32 = vadd.f32 %v1516_v24, %v1515_v27  ;;  %v1517_v6 = vmul.f32 %v5687_v18, %v5687_v18  ;;  %v1743_v17 = vld [vmem:[#allocation5 + $0x2c0] sm:$0xff]  ;;  %v1744_v27 = vld [vmem:[#allocation5 + $0x2c8] sm:$0xff]  ;;  %2559 = vmatpush1.bf16.msra.mxu1 %v4386_v11 }
 0x528   :  { %v1748_v26 = vld [vmem:[#allocation5 + $0x2e8] sm:$0xff] }
 0x529   :  { %v5698_v33 = vsub.f32 %v5607_v16, %v1476_v29  ;;  %v1488_v63 = vsub.f32 %v5612_v21, %v1476_v29  ;;  %1533 = vadd.xlane.f32.xlu1 %v1532_v32  ;;  %v1518_v35 = vmul.f32 %v5695_v19, %v5695_v19 }
 0x52a   :  { %v1463_v36 = vpop.xlane.xlu0 %1462 }
 0x52b   :  { %v5706_v37 = vmul.f32 %v5666_v20, %v1488_v63  ;;  %v1477_v40 = vmul.f32 0.007142857, %v1463_v36  ;;  %v1535_v39 = vadd.f32 %v1518_v35, %v1517_v6  ;;  %v1519_v21 = vmul.f32 %v5698_v33, %v5698_v33 }
 0x52c   :  { %v4394_v35 = vcombine.low %v1744_v27, %v1748_v26  ;;  %v4395_v36 = vcombine.high %v1744_v27, %v1748_v26 }
 0x52d   :  { %v5709_v43 = vsub.f32 %v5619_v31, %v1477_v40  ;;  %v1490_v16 = vsub.f32 %v5624_v34, %v1477_v40  ;;  %1536 = vadd.xlane.f32.xlu0 %v1535_v39  ;;  %v1520_v44 = vmul.f32 %v5706_v37, %v5706_v37 }
 0x52e   :  { %v1466_v45 = vpop.xlane.xlu1 %1465  ;;  %2560 = vmatprep.subr.bf16.mxu1 %v4395_v36 }
 0x52f   :  { %v5717_v48 = vmul.f32 %v5666_v20, %v1490_v16  ;;  %v1478_v49 = vmul.f32 0.007142857, %v1466_v45  ;;  %v1538_v51 = vadd.f32 %v1520_v44, %v1519_v21  ;;  %v1521_v34 = vmul.f32 %v5709_v43, %v5709_v43  ;;  %v1751_v16 = vld [vmem:[#allocation5 + $0x300] sm:$0xff]  ;;  %v1752_v44 = vld [vmem:[#allocation5 + $0x308] sm:$0xff]  ;;  %2561 = vmatpush1.bf16.msra.mxu1 %v4394_v35  ;;  %v5760_v35 = vld [vmem:[#allocation5 + $0x18] sm:$0xff] }
 0x530   :  { %v1755_v21 = vld [vmem:[#allocation5 + $0x320] sm:$0xff]  ;;  %v1756_v45 = vld [vmem:[#allocation5 + $0x328] sm:$0xff] }
 0x531   :  { %v5720_v15 = vsub.f32 %v5631_v38, %v1478_v49  ;;  %v1492_v31 = vsub.f32 %v5636_v41, %v1478_v49  ;;  %1539 = vadd.xlane.f32.xlu1 %v1538_v51  ;;  %v1522_v54 = vmul.f32 %v5717_v48, %v5717_v48  ;;  %v4385_v41 = vcombine.high %v1735_v62, %v1739_v1  ;;  %v1764_v1 = vld [vmem:[#allocation5 + $0x368] sm:$0xff] }
 0x532   :  { %v1469_v56 = vpop.xlane.xlu0 %1468  ;;  %v4400_v51 = vcombine.low %v1751_v16, %v1755_v21 }
 0x533   :  { %v5728_v57 = vmul.f32 %v5666_v20, %v1492_v31  ;;  %v1479_v59 = vmul.f32 0.007142857, %v1469_v56  ;;  %v1541_v42 = vadd.f32 %v1522_v54, %v1521_v34  ;;  %v1523_v38 = vmul.f32 %v5720_v15, %v5720_v15  ;;  %2485 = vmatprep.subr.bf16.mxu0 %v4385_v41  ;;  %v1759_v56 = vld [vmem:[#allocation5 + $0x340] sm:$0xff] }
 0x534   :  { %2486 = vmatpush1.bf16.msra.mxu0 %v4384_v5  ;;  %v4402_v31 = vcombine.low %v1752_v44, %v1756_v45  ;;  %v4403_v34 = vcombine.high %v1752_v44, %v1756_v45 }
 0x535   :  { %v5733_v13 = vsub.f32 %v5643_v46, %v1479_v59  ;;  %v1494_v52 = vsub.f32 %v5648_v50, %v1479_v59  ;;  %1542 = vadd.xlane.f32.xlu0 %v1541_v42  ;;  %v1524_v28 = vmul.f32 %v5728_v57, %v5728_v57  ;;  %v1747_v46 = vld [vmem:[#allocation5 + $0x2e0] sm:$0xff]  ;;  %v1760_v42 = vld [vmem:[#allocation5 + $0x348] sm:$0xff] }
 0x536   :  { %v1472_v60 = vpop.xlane.xlu1 %1471  ;;  %v4393_v24 = vcombine.high %v1743_v17, %v1747_v46  ;;  %v4392_v6 = vcombine.low %v1743_v17, %v1747_v46  ;;  %v1763_v59 = vld [vmem:[#allocation5 + $0x360] sm:$0xff]  ;;  %2562 = vmatprep.subr.bf16.mxu1 %v4403_v34  ;;  %v4411_v41 = vcombine.high %v1760_v42, %v1764_v1  ;;  %v1776_v46 = vld [vmem:[#allocation5 + $0x3c8] sm:$0xff] }
 0x537   :  { %v5739_v53 = vmul.f32 %v5666_v20, %v1494_v52  ;;  %v1480_v4 = vmul.f32 0.007142857, %v1472_v60  ;;  %v1544_v14 = vadd.f32 %v1524_v28, %v1523_v38  ;;  %v1525_v50 = vmul.f32 %v5733_v13, %v5733_v13  ;;  %2563 = vmatpush1.bf16.msra.mxu1 %v4402_v31  ;;  %v1771_v52 = vld [vmem:[#allocation5 + $0x3a0] sm:$0xff]  ;;  %v1768_v28 = vld [vmem:[#allocation5 + $0x388] sm:$0xff] }
 0x538   :  { %2487 = vmatprep.subr.bf16.mxu0 %v4393_v24  ;;  %v4409_v62 = vcombine.high %v1759_v56, %v1763_v59  ;;  %v4408_v7 = vcombine.low %v1759_v56, %v1763_v59  ;;  %v4410_v38 = vcombine.low %v1760_v42, %v1764_v1  ;;  %2564 = vmatprep.subr.bf16.mxu1 %v4411_v41  ;;  %v1772_v60 = vld [vmem:[#allocation5 + $0x3a8] sm:$0xff]  ;;  %v1779_v17 = vld [vmem:[#allocation5 + $0x3e0] sm:$0xff] }
 0x539   :  { %v5744_v29 = vsub.f32 %v5655_v55, %v1480_v4  ;;  %v1496_v32 = vsub.f32 %v5660_v58, %v1480_v4  ;;  %1545 = vadd.xlane.f32.xlu1 %v1544_v14  ;;  %v1526_v63 = vmul.f32 %v5739_v53, %v5739_v53  ;;  %2488 = vmatpush1.bf16.msra.mxu0 %v4392_v6  ;;  %v1775_v14 = vld [vmem:[#allocation5 + $0x3c0] sm:$0xff]  ;;  %v5758_v6 = vld [vmem:[#allocation5 + $0x30] sm:$0xff] }
 0x53a   :  { %v4401_v58 = vcombine.high %v1751_v16, %v1755_v21  ;;  %v4417_v5 = vcombine.high %v1767_v10, %v1771_v52  ;;  %v4416_v11 = vcombine.low %v1767_v10, %v1771_v52  ;;  %v4418_v30 = vcombine.low %v1768_v28, %v1772_v60  ;;  %v1447_v59 = vld [vmem:[%s6359_s8] sm:$0x3] }
 0x53b   :  { %v5750_v40 = vmul.f32 %v5666_v20, %v1496_v32  ;;  %v1547_v39 = vadd.f32 %v1526_v63, %v1525_v50  ;;  %v1527_v55 = vmul.f32 %v5744_v29, %v5744_v29  ;;  %2565 = vmatpush1.bf16.msra.mxu1 %v4410_v38  ;;  %v4419_v4 = vcombine.high %v1768_v28, %v1772_v60  ;;  %v1780_v50 = vld [vmem:[#allocation5 + $0x3e8] sm:$0xff]  ;;  %v5756_v63 = vld [vmem:[#allocation5 + $0x10] sm:$0xff]  ;;  %v1448_v41 = vld [vmem:[%s6360_s9] sm:$0x3] }
 0x53c   :  { %2489 = vmatprep.subr.bf16.mxu0 %v4401_v58  ;;  %v4425_v27 = vcombine.high %v1775_v14, %v1779_v17  ;;  %v4424_v24 = vcombine.low %v1775_v14, %v1779_v17  ;;  %v4426_v26 = vcombine.low %v1776_v46, %v1780_v50  ;;  %v4427_v32 = vcombine.high %v1776_v46, %v1780_v50 }
 0x53d   :  { %1548 = vadd.xlane.f32.xlu0 %v1547_v39  ;;  %v1528_v49 = vmul.f32 %v5750_v40, %v5750_v40  ;;  %2490 = vmatpush1.bf16.msra.mxu0 %v4400_v51  ;;  %v4309_v36 = vcombine.high %v5756_v63, %v5758_v6  ;;  %v5764_v39 = vld [vmem:[#allocation5 + $0x38] sm:$0xff]  ;;  %v4308_v16 = vcombine.low %v5756_v63, %v5758_v6  ;;  %v1681_v6 = vld [vmem:[#allocation5 + $0xd0] sm:$0xff] }
 0x53e   :  { %2491 = vmatprep.subr.bf16.mxu0 %v4409_v62  ;;  %2566 = vmatprep.subr.bf16.mxu1 %v4419_v4  ;;  %v4310_v21 = vcombine.low %v5760_v35, %v5764_v39  ;;  %v4311_v44 = vcombine.high %v5760_v35, %v5764_v39  ;;  %v5782_v10 = vrot.slane %v1447_v59, %v5421_v0 }
 0x53f   :  { %v1550_v54 = vadd.f32 %v1528_v49, %v1527_v55  ;;  %2567 = vmatpush1.bf16.msra.mxu1 %v4418_v30  ;;  %v5792_v46 = vrot.slane %v1448_v41, %v5421_v0 }
 0x540   :  { %2568 = vmatprep.subr.bf16.mxu1 %v4427_v32 }
 0x541   :  { %1551 = vadd.xlane.f32.xlu1 %v1550_v54  ;;  %2492 = vmatpush1.bf16.msra.mxu0 %v4408_v7  ;;  %v5776_v7 = vrot.slane %v1447_v59, %v5469_v47 }
 0x542   :  { %2493 = vmatprep.subr.bf16.mxu0 %v4417_v5 }
 0x543   :  { %2569 = vmatpush1.bf16.msra.mxu1 %v4426_v26 }
 0x544   :  { %2684 = vmatprep.subr.bf16.mxu1 %v4311_v44 }
 0x545   :  { %2494 = vmatpush1.bf16.msra.mxu0 %v4416_v11  ;;  %v5787_v11 = vrot.slane %v1448_v41, %v5469_v47  ;;  %v1673_v41 = vld [vmem:[#allocation5 + $0x90] sm:$0xff] }
 0x546   :  { %2495 = vmatprep.subr.bf16.mxu0 %v4425_v27 }
 0x549   :  { %2496 = vmatpush1.bf16.msra.mxu0 %v4424_v24 }
 0x54a   :  { %2611 = vmatprep.subr.bf16.mxu0 %v4309_v36 }
 0x5b2   :  { %v1531_v55 = vpop.xlane.xlu0 %1530 }
 0x5b3   :  { %v1553_v58 = vmul.f32 0.007142857, %v1531_v55 }
 0x5b5   :  { %v1561_v45 = vadd.f32 1e-05, %v1553_v58  ;;  %v1665_v58 = vld [vmem:[#allocation5 + $0x50] sm:$0xff] }
 0x5b6   :  { %v1534_v49 = vpop.xlane.xlu1 %1533 }
 0x5b7   :  { %5039 = vrsqrt.f32 %v1561_v45  ;;  %v1554_v51 = vmul.f32 0.007142857, %v1534_v49  ;;  %v1669_v45 = vld [vmem:[#allocation5 + $0x70] sm:$0xff] }
 0x5b9   :  { %v1562_v31 = vadd.f32 1e-05, %v1554_v51 }
 0x5ba   :  { %v1537_v34 = vpop.xlane.xlu0 %1536 }
 0x5bb   :  { %5041 = vrsqrt.f32 %v1562_v31  ;;  %v1555_v54 = vmul.f32 0.007142857, %v1537_v34  ;;  %v1666_v34 = vld [vmem:[#allocation5 + $0x58] sm:$0xff] }
 0x5bd   :  { %v1563_v56 = vadd.f32 1e-05, %v1555_v54  ;;  %v1670_v54 = vld [vmem:[#allocation5 + $0x78] sm:$0xff] }
 0x5be   :  { %v1540_v42 = vpop.xlane.xlu1 %1539 }
 0x5bf   :  { %5043 = vrsqrt.f32 %v1563_v56  ;;  %v1556_v62 = vmul.f32 0.007142857, %v1540_v42 }
 0x5c1   :  { %v5040_v1 = vpop.eup %5039  ;;  %v1564_v38 = vadd.f32 1e-05, %v1556_v62 }
 0x5c2   :  { %v1577_v52 = vmul.f32 %v5040_v1, %v5669_v25  ;;  %v1578_v28 = vmul.f32 %v5040_v1, %v5673_v2  ;;  %v1543_v5 = vpop.xlane.xlu0 %1542  ;;  %v4319_v1 = vcombine.high %v1666_v34, %v1670_v54 }
 0x5c3   :  { %5045 = vrsqrt.f32 %v1564_v38  ;;  %v1557_v60 = vmul.f32 0.007142857, %v1543_v5 }
 0x5c4   :  { %v1604_v4 = vmul.f32 %v5776_v7, %v1577_v52  ;;  %v1605_v17 = vmul.f32 %v5782_v10, %v1578_v28  ;;  %v1677_v52 = vld [vmem:[#allocation5 + $0xb0] sm:$0xff] }
 0x5c5   :  { %v5042_v30 = vpop.eup %5041  ;;  %v1565_v14 = vadd.f32 1e-05, %v1557_v60 }
 0x5c6   :  { %v1579_v27 = vmul.f32 %v5042_v30, %v5676_v3  ;;  %v1580_v25 = vmul.f32 %v5042_v30, %v5684_v12  ;;  %v1546_v2 = vpop.xlane.xlu1 %1545  ;;  %v5799_v44 = vadd.f32 %v5792_v46, %v1605_v17  ;;  %v5802_v55 = vadd.f32 %v5787_v11, %v1604_v4  ;;  %v1674_v4 = vld [vmem:[#allocation5 + $0x98] sm:$0xff] }
 0x5c7   :  { %5047 = vrsqrt.f32 %v1565_v14  ;;  %v1558_v50 = vmul.f32 0.007142857, %v1546_v2  ;;  %v1678_v14 = vld [vmem:[#allocation5 + $0xb8] sm:$0xff] }
 0x5c8   :  { %v1606_v24 = vmul.f32 %v5776_v7, %v1579_v27  ;;  %v1607_v26 = vmul.f32 %v5782_v10, %v1580_v25  ;;  %v4316_v27 = vcombine.low %v1665_v58, %v1669_v45  ;;  %v4318_v25 = vcombine.low %v1666_v34, %v1670_v54 }
 0x5c9   :  { %v5044_v32 = vpop.eup %5043  ;;  %v1566_v36 = vadd.f32 1e-05, %v1558_v50 }
 0x5ca   :  { %v1581_v3 = vmul.f32 %v5044_v32, %v5687_v18  ;;  %v1582_v12 = vmul.f32 %v5044_v32, %v5695_v19  ;;  %v1549_v49 = vpop.xlane.xlu0 %1548  ;;  %v5807_v51 = vadd.f32 %v5792_v46, %v1607_v26  ;;  %v5810_v31 = vadd.f32 %v5787_v11, %v1606_v24 }
 0x5cb   :  { %5049 = vrsqrt.f32 %v1566_v36  ;;  %v1559_v56 = vmul.f32 0.007142857, %v1549_v49  ;;  %v4317_v19 = vcombine.high %v1665_v58, %v1669_v45  ;;  %v4327_v32 = vcombine.high %v1674_v4, %v1678_v14  ;;  %v1682_v58 = vld [vmem:[#allocation5 + $0xd8] sm:$0xff] }
 0x5cc   :  { %v5814_v59 = vpack.c.bf16 %v5807_v51, %v5799_v44  ;;  %v5818_v18 = vpack.c.bf16 %v5810_v31, %v5802_v55  ;;  %v1609_v38 = vmul.f32 %v5782_v10, %v1582_v12  ;;  %v1608_v28 = vmul.f32 %v5776_v7, %v1581_v3  ;;  %v1686_v45 = vld [vmem:[#allocation5 + $0xf8] sm:$0xff] }
 0x5cd   :  { %v5046_v42 = vpop.eup %5045  ;;  %v1567_v62 = vadd.f32 1e-05, %v1559_v56  ;;  %v4324_v3 = vcombine.low %v1673_v41, %v1677_v52  ;;  %v4326_v12 = vcombine.low %v1674_v4, %v1678_v14  ;;  %v4335_v54 = vcombine.high %v1682_v58, %v1686_v45 }
 0x5ce   :  { %v1583_v5 = vmul.f32 %v5046_v42, %v5698_v33  ;;  %v1584_v60 = vmul.f32 %v5046_v42, %v5706_v37  ;;  %2497 = vmatprep.mubr.bf16.mxu0 %v5814_v59  ;;  %2570 = vmatprep.mubr.bf16.mxu1 %v5814_v59  ;;  %v1552_v30 = vpop.xlane.xlu1 %1551  ;;  %v4325_v37 = vcombine.high %v1673_v41, %v1677_v52  ;;  %v1693_v42 = vld [vmem:[#allocation5 + $0x130] sm:$0xff]  ;;  %v1690_v41 = vld [vmem:[#allocation5 + $0x118] sm:$0xff] }
 0x5cf   :  { %5051 = vrsqrt.f32 %v1567_v62  ;;  %v1560_v17 = vmul.f32 0.007142857, %v1552_v30  ;;  %2498 = vmatmul.mubr.bf16.vlgmr.msra.gmra.mrb[8].mxu0 %v5818_v18  ;;  %2571 = vmatmul.mubr.bf16.vlgmr.msra.gmra.mrb[72].mxu1 %v5818_v18  ;;  %v5837_v26 = vadd.f32 %v5792_v46, %v1609_v38  ;;  %v5840_v63 = vadd.f32 %v5787_v11, %v1608_v28  ;;  %v1694_v52 = vld [vmem:[#allocation5 + $0x138] sm:$0xff] }
 0x5d0   :  { %2612 = vmatpush1.bf16.msra.mxu0 %v4308_v16  ;;  %2685 = vmatpush1.bf16.msra.mxu1 %v4310_v21  ;;  %v1611_v33 = vmul.f32 %v5782_v10, %v1584_v60  ;;  %v1610_v2 = vmul.f32 %v5776_v7, %v1583_v5  ;;  %v1685_v16 = vld [vmem:[#allocation5 + $0xf0] sm:$0xff]  ;;  %v4334_v5 = vcombine.low %v1682_v58, %v1686_v45 }
 0x5d1   :  { %v5048_v50 = vpop.eup %5047  ;;  %v1568_v24 = vadd.f32 1e-05, %v1560_v17  ;;  %2613 = vmatprep.subr.bf16.mxu0 %v4317_v19  ;;  %2686 = vmatprep.subr.bf16.mxu1 %v4319_v1  ;;  %v1689_v19 = vld [vmem:[#allocation5 + $0x110] sm:$0xff]  ;;  %v4332_v28 = vcombine.low %v1681_v6, %v1685_v16  ;;  %v4343_v14 = vcombine.high %v1690_v41, %v1694_v52 }
 0x5d2   :  { %v1585_v35 = vmul.f32 %v5048_v50, %v5709_v43  ;;  %v1586_v39 = vmul.f32 %v5048_v50, %v5717_v48  ;;  %v5845_v21 = vadd.f32 %v5792_v46, %v1611_v33  ;;  %v5848_v36 = vadd.f32 %v5787_v11, %v1610_v2  ;;  %v1701_v50 = vld [vmem:[#allocation5 + $0x170] sm:$0xff] }
 0x5d3   :  { %5053 = vrsqrt.f32 %v1568_v24  ;;  %v4333_v48 = vcombine.high %v1681_v6, %v1685_v16  ;;  %v4341_v30 = vcombine.high %v1689_v19, %v1693_v42  ;;  %v1698_v24 = vld [vmem:[#allocation5 + $0x158] sm:$0xff]  ;;  %v4340_v6 = vcombine.low %v1689_v19, %v1693_v42 }
 0x5d4   :  { %2614 = vmatpush1.bf16.msra.mxu0 %v4316_v27  ;;  %2687 = vmatpush1.bf16.msra.mxu1 %v4318_v25  ;;  %v5852_v49 = vpack.c.bf16 %v5845_v21, %v5837_v26  ;;  %v5856_v43 = vpack.c.bf16 %v5848_v36, %v5840_v63  ;;  %v1613_v56 = vmul.f32 %v5782_v10, %v1586_v39  ;;  %v1697_v27 = vld [vmem:[#allocation5 + $0x150] sm:$0xff] }
 0x5d5   :  { %v5050_v34 = vpop.eup %5049  ;;  %2615 = vmatprep.subr.bf16.mxu0 %v4325_v37  ;;  %2688 = vmatprep.subr.bf16.mxu1 %v4327_v32  ;;  %v1612_v62 = vmul.f32 %v5776_v7, %v1585_v35  ;;  %v1702_v32 = vld [vmem:[#allocation5 + $0x178] sm:$0xff]  ;;  %v4342_v35 = vcombine.low %v1690_v41, %v1694_v52  ;;  %v4349_v39 = vcombine.high %v1697_v27, %v1701_v50 }
 0x5d6   :  { %v1587_v1 = vmul.f32 %v5050_v34, %v5720_v15  ;;  %v1588_v38 = vmul.f32 %v5050_v34, %v5728_v57  ;;  %2507 = vmatprep.mubr.bf16.mxu0 %v5852_v49  ;;  %2580 = vmatprep.mubr.bf16.mxu1 %v5852_v49  ;;  %v5869_v4 = vadd.f32 %v5792_v46, %v1613_v56  ;;  %v1709_v34 = vld [vmem:[#allocation5 + $0x1b0] sm:$0xff]  ;;  %v1710_v56 = vld [vmem:[#allocation5 + $0x1b8] sm:$0xff] }
 0x5d7   :  { %2508 = vmatmul.mubr.bf16.gmra.mrb[12].mxu0 %v5856_v43  ;;  %2581 = vmatmul.mubr.bf16.gmra.mrb[76].mxu1 %v5856_v43  ;;  %v5872_v17 = vadd.f32 %v5787_v11, %v1612_v62  ;;  %v4351_v58 = vcombine.high %v1698_v24, %v1702_v32  ;;  %v4348_v42 = vcombine.low %v1697_v27, %v1701_v50  ;;  %v1722_v50 = vld [vmem:[#allocation5 + $0x218] sm:$0xff] }
 0x5d8   :  { %2616 = vmatpush1.bf16.msra.mxu0 %v4324_v3  ;;  %2689 = vmatpush1.bf16.msra.mxu1 %v4326_v12  ;;  %v1615_v60 = vmul.f32 %v5782_v10, %v1588_v38  ;;  %v1614_v15 = vmul.f32 %v5776_v7, %v1587_v1  ;;  %v1705_v3 = vld [vmem:[#allocation5 + $0x190] sm:$0xff]  ;;  %v4350_v62 = vcombine.low %v1698_v24, %v1702_v32  ;;  %v1726_v24 = vld [vmem:[#allocation5 + $0x238] sm:$0xff] }
 0x5d9   :  { %v5052_v57 = vpop.eup %5051  ;;  %2617 = vmatprep.subr.bf16.mxu0 %v4333_v48  ;;  %2690 = vmatprep.subr.bf16.mxu1 %v4335_v54  ;;  %v1706_v54 = vld [vmem:[#allocation5 + $0x198] sm:$0xff]  ;;  %v4357_v1 = vcombine.high %v1705_v3, %v1709_v34 }
 0x5da   :  { %v1589_v25 = vmul.f32 %v5052_v57, %v5733_v13  ;;  %v1590_v33 = vmul.f32 %v5052_v57, %v5739_v53  ;;  %v5877_v37 = vadd.f32 %v5792_v46, %v1615_v60  ;;  %v5880_v2 = vadd.f32 %v5787_v11, %v1614_v15  ;;  %v1713_v60 = vld [vmem:[#allocation5 + $0x1d0] sm:$0xff]  ;;  %v1718_v15 = vld [vmem:[#allocation5 + $0x1f8] sm:$0xff] }
 0x5db   :  { %v4359_v38 = vcombine.high %v1706_v54, %v1710_v56 }
 0x5dc   :  { %2618 = vmatpush1.bf16.msra.mxu0 %v4332_v28  ;;  %2691 = vmatpush1.bf16.msra.mxu1 %v4334_v5  ;;  %v5884_v16 = vpack.c.bf16 %v5877_v37, %v5869_v4  ;;  %v5888_v13 = vpack.c.bf16 %v5880_v2, %v5872_v17  ;;  %v1617_v45 = vmul.f32 %v5782_v10, %v1590_v33  ;;  %v1725_v33 = vld [vmem:[#allocation5 + $0x230] sm:$0xff] }
 0x5dd   :  { %v5054_v53 = vpop.eup %5053  ;;  %2619 = vmatprep.subr.bf16.mxu0 %v4341_v30  ;;  %2692 = vmatprep.subr.bf16.mxu1 %v4343_v14  ;;  %v1616_v19 = vmul.f32 %v5776_v7, %v1589_v25  ;;  %v1717_v30 = vld [vmem:[#allocation5 + $0x1f0] sm:$0xff]  ;;  %v4358_v14 = vcombine.low %v1706_v54, %v1710_v56 }
 0x5de   :  { %v1591_v12 = vmul.f32 %v5054_v53, %v5744_v29  ;;  %v1592_v48 = vmul.f32 %v5054_v53, %v5750_v40  ;;  %2517 = vmatprep.mubr.bf16.mxu0 %v5884_v16  ;;  %2590 = vmatprep.mubr.bf16.mxu1 %v5884_v16  ;;  %v5901_v41 = vadd.f32 %v5792_v46, %v1617_v45  ;;  %v1730_v45 = vld [vmem:[#allocation5 + $0x258] sm:$0xff]  ;;  %v1737_v56 = vld [vmem:[#allocation5 + $0x290] sm:$0xff] }
 0x5df   :  { %2518 = vmatmul.mubr.bf16.gmra.mrb[16].mxu0 %v5888_v13  ;;  %2591 = vmatmul.mubr.bf16.gmra.mrb[80].mxu1 %v5888_v13  ;;  %v5907_v28 = vadd.f32 %v5787_v11, %v1616_v19  ;;  %v4365_v27 = vcombine.high %v1713_v60, %v1717_v30  ;;  %v4364_v32 = vcombine.low %v1713_v60, %v1717_v30  ;;  %v1741_v19 = vld [vmem:[#allocation5 + $0x2b0] sm:$0xff]  ;;  %v1750_v30 = vld [vmem:[#allocation5 + $0x2f8] sm:$0xff] }
 0x5e0   :  { %2620 = vmatpush1.bf16.msra.mxu0 %v4340_v6  ;;  %2693 = vmatpush1.bf16.msra.mxu1 %v4342_v35  ;;  %v1619_v29 = vmul.f32 %v5782_v10, %v1592_v48  ;;  %v1618_v40 = vmul.f32 %v5776_v7, %v1591_v12  ;;  %v4356_v10 = vcombine.low %v1705_v3, %v1709_v34  ;;  %v1714_v7 = vld [vmem:[#allocation5 + $0x1d8] sm:$0xff]  ;;  %v1749_v60 = vld [vmem:[#allocation5 + $0x2f0] sm:$0xff] }
 0x5e1   :  { %2621 = vmatprep.subr.bf16.mxu0 %v4349_v39  ;;  %2694 = vmatprep.subr.bf16.mxu1 %v4351_v58  ;;  %v4367_v25 = vcombine.high %v1714_v7, %v1718_v15  ;;  %v4366_v6 = vcombine.low %v1714_v7, %v1718_v15  ;;  %v4375_v53 = vcombine.high %v1722_v50, %v1726_v24  ;;  %v1729_v39 = vld [vmem:[#allocation5 + $0x250] sm:$0xff]  ;;  %v1734_v3 = vld [vmem:[#allocation5 + $0x278] sm:$0xff] }
 0x5e2   :  { %v5904_v52 = vadd.f32 %v5792_v46, %v1619_v29  ;;  %v5910_v5 = vadd.f32 %v5787_v11, %v1618_v40  ;;  %v1721_v11 = vld [vmem:[#allocation5 + $0x210] sm:$0xff]  ;;  %v4374_v48 = vcombine.low %v1722_v50, %v1726_v24  ;;  %v4383_v54 = vcombine.high %v1730_v45, %v1734_v3  ;;  %v1758_v50 = vld [vmem:[#allocation5 + $0x338] sm:$0xff] }
 0x5e3   :  { %v4373_v35 = vcombine.high %v1721_v11, %v1725_v33  ;;  %v1733_v58 = vld [vmem:[#allocation5 + $0x270] sm:$0xff]  ;;  %v4372_v12 = vcombine.low %v1721_v11, %v1725_v33  ;;  %v4382_v29 = vcombine.low %v1730_v45, %v1734_v3  ;;  %v4389_v40 = vcombine.high %v1737_v56, %v1741_v19  ;;  %v1754_v33 = vld [vmem:[#allocation5 + $0x318] sm:$0xff] }
 0x5e4   :  { %2622 = vmatpush1.bf16.msra.mxu0 %v4348_v42  ;;  %2695 = vmatpush1.bf16.msra.mxu1 %v4350_v62  ;;  %v5914_v57 = vpack.c.bf16 %v5904_v52, %v5901_v41  ;;  %v5918_v46 = vpack.c.bf16 %v5910_v5, %v5907_v28  ;;  %v4381_v34 = vcombine.high %v1729_v39, %v1733_v58  ;;  %v1738_v42 = vld [vmem:[#allocation5 + $0x298] sm:$0xff] }
 0x5e5   :  { %2623 = vmatprep.subr.bf16.mxu0 %v4357_v1  ;;  %2696 = vmatprep.subr.bf16.mxu1 %v4359_v38  ;;  %v4380_v62 = vcombine.low %v1729_v39, %v1733_v58  ;;  %v1745_v38 = vld [vmem:[#allocation5 + $0x2d0] sm:$0xff]  ;;  %v4388_v7 = vcombine.low %v1737_v56, %v1741_v19  ;;  %v1762_v58 = vld [vmem:[#allocation5 + $0x358] sm:$0xff] }
 0x5e6   :  { %2527 = vmatprep.mubr.bf16.mxu0 %v5914_v57  ;;  %2600 = vmatprep.mubr.bf16.mxu1 %v5914_v57  ;;  %v4396_v24 = vcombine.low %v1745_v38, %v1749_v60  ;;  %v1765_v39 = vld [vmem:[#allocation5 + $0x370] sm:$0xff]  ;;  %v1766_v45 = vld [vmem:[#allocation5 + $0x378] sm:$0xff] }
 0x5e7   :  { %2528 = vmatmul.mubr.bf16.gmra.mrb[20].mxu0 %v5918_v46  ;;  %2601 = vmatmul.mubr.bf16.gmra.mrb[84].mxu1 %v5918_v46  ;;  %v1773_v56 = vld [vmem:[#allocation5 + $0x3b0] sm:$0xff]  ;;  %v1770_v19 = vld [vmem:[#allocation5 + $0x398] sm:$0xff] }
 0x5e8   :  { %2624 = vmatpush1.bf16.msra.mxu0 %v4356_v10  ;;  %2697 = vmatpush1.bf16.msra.mxu1 %v4358_v14  ;;  %v1746_v10 = vld [vmem:[#allocation5 + $0x2d8] sm:$0xff]  ;;  %v4397_v14 = vcombine.high %v1745_v38, %v1749_v60  ;;  %v1781_v38 = vld [vmem:[#allocation5 + $0x3f0] sm:$0xff] }
 0x5e9   :  { %2643 = vmatprep.mubr.bf16.mxu0 %v5814_v59  ;;  %2716 = vmatprep.mubr.bf16.mxu1 %v5814_v59  ;;  %v1742_v59 = vld [vmem:[#allocation5 + $0x2b8] sm:$0xff]  ;;  %v4399_v11 = vcombine.high %v1746_v10, %v1750_v30 }
 0x5ea   :  { %2625 = vmatprep.subr.bf16.mxu0 %v4365_v27  ;;  %2698 = vmatprep.subr.bf16.mxu1 %v4367_v25  ;;  %v4391_v1 = vcombine.high %v1738_v42, %v1742_v59  ;;  %v4390_v15 = vcombine.low %v1738_v42, %v1742_v59  ;;  %v1753_v27 = vld [vmem:[#allocation5 + $0x310] sm:$0xff]  ;;  %v1774_v42 = vld [vmem:[#allocation5 + $0x3b8] sm:$0xff] }
 0x5eb   :  { %v1757_v25 = vld [vmem:[#allocation5 + $0x330] sm:$0xff]  ;;  %v1778_v60 = vld [vmem:[#allocation5 + $0x3d8] sm:$0xff] }
 0x5ec   :  { %2626 = vmatpush1.bf16.msra.mxu0 %v4364_v32  ;;  %2699 = vmatpush1.bf16.msra.mxu1 %v4366_v6  ;;  %v4398_v32 = vcombine.low %v1746_v10, %v1750_v30  ;;  %v4405_v6 = vcombine.high %v1753_v27, %v1757_v25  ;;  %v4404_v3 = vcombine.low %v1753_v27, %v1757_v25  ;;  %v1782_v10 = vld [vmem:[#allocation5 + $0x3f8] sm:$0xff]  ;;  %v4817_v25 = vld [vmem:[#allocation7 + $0x4] ss:$8 sps:$4 sm:$0xff]  }
 0x5ed   :  { %2627 = vmatprep.subr.bf16.mxu0 %v4373_v35  ;;  %2700 = vmatprep.subr.bf16.mxu1 %v4375_v53  ;;  %v4407_v35 = vcombine.high %v1754_v33, %v1758_v50  ;;  %v1761_v53 = vld [vmem:[#allocation5 + $0x350] sm:$0xff]  ;;  %v4430_v27 = vcombine.low %v1778_v60, %v1782_v10 }
 0x5ee   :  { %v4412_v59 = vcombine.low %v1761_v53, %v1765_v39 }
 0x5f0   :  { %2628 = vmatpush1.bf16.msra.mxu0 %v4372_v12  ;;  %2701 = vmatpush1.bf16.msra.mxu1 %v4374_v48  ;;  %v4406_v12 = vcombine.low %v1754_v33, %v1758_v50  ;;  %v4413_v48 = vcombine.high %v1761_v53, %v1765_v39  ;;  %v4815_v33 = vld [vmem:[#allocation7] ss:$8 sps:$4 sm:$0xff]   ;;  %v4820_v50 = vld [vmem:[#allocation7 + $0x14] ss:$8 sps:$4 sm:$0xff]  }
 0x5f1   :  { %2629 = vmatprep.subr.bf16.mxu0 %v4381_v34  ;;  %2702 = vmatprep.subr.bf16.mxu1 %v4383_v54  ;;  %v4415_v34 = vcombine.high %v1762_v58, %v1766_v45  ;;  %v1769_v54 = vld [vmem:[#allocation5 + $0x390] sm:$0xff]  ;;  %v4827_v53 = vld [vmem:[#allocation7 + $0x40] ss:$8 sps:$4 sm:$0xff]  }
 0x5f2   :  { %v4420_v30 = vcombine.low %v1769_v54, %v1773_v56  ;;  %v4832_v39 = vld [vmem:[#allocation7 + $0x54] ss:$8 sps:$4 sm:$0xff]  }
 0x5f4   :  { %2630 = vmatpush1.bf16.msra.mxu0 %v4380_v62  ;;  %2703 = vmatpush1.bf16.msra.mxu1 %v4382_v29  ;;  %v4414_v62 = vcombine.low %v1762_v58, %v1766_v45  ;;  %v4421_v29 = vcombine.high %v1769_v54, %v1773_v56  ;;  %v4833_v58 = vld [vmem:[#allocation7 + $0x60] ss:$8 sps:$4 sm:$0xff]   ;;  %v4838_v45 = vld [vmem:[#allocation7 + $0x74] ss:$8 sps:$4 sm:$0xff]  }
 0x5f5   :  { %2631 = vmatprep.subr.bf16.mxu0 %v4389_v40  ;;  %2704 = vmatprep.subr.bf16.mxu1 %v4391_v1  ;;  %v4423_v40 = vcombine.high %v1770_v19, %v1774_v42  ;;  %v1777_v1 = vld [vmem:[#allocation5 + $0x3d0] sm:$0xff]  ;;  %v4845_v54 = vld [vmem:[#allocation7 + $0xa0] ss:$8 sps:$4 sm:$0xff]  }
 0x5f6   :  { %v4850_v56 = vld [vmem:[#allocation7 + $0xb4] ss:$8 sps:$4 sm:$0xff]  }
 0x5f8   :  { %2632 = vmatpush1.bf16.msra.mxu0 %v4388_v7  ;;  %2705 = vmatpush1.bf16.msra.mxu1 %v4390_v15  ;;  %v4422_v7 = vcombine.low %v1770_v19, %v1774_v42  ;;  %v4429_v15 = vcombine.high %v1777_v1, %v1781_v38  ;;  %v4848_v19 = vld [vmem:[#allocation7 + $0xb0] ss:$8 sps:$4 sm:$0xff]   ;;  %v4851_v42 = vld [vmem:[#allocation7 + $0xc0] ss:$8 sps:$4 sm:$0xff]  }
 0x5f9   :  { %2633 = vmatprep.subr.bf16.mxu0 %v4397_v14  ;;  %2706 = vmatprep.subr.bf16.mxu1 %v4399_v11  ;;  %v4431_v14 = vcombine.high %v1778_v60, %v1782_v10  ;;  %v4428_v11 = vcombine.low %v1777_v1, %v1781_v38  ;;  %v4862_v1 = vld [vmem:[#allocation7 + $0xf4] ss:$8 sps:$4 sm:$0xff]   ;;  %v4860_v38 = vld [vmem:[#allocation7 + $0xf0] ss:$8 sps:$4 sm:$0xff]   ;;  %v4865_v60 = vld [vmem:[#allocation7 + $0x104] ss:$8 sps:$4 sm:$0xff]  }
 0x5fa   :  { %v5943_v10 = vld [vmem:[%s6356_s5] sm:$0xff] }
 0x5fc   :  { %2634 = vmatpush1.bf16.msra.mxu0 %v4396_v24  ;;  %2707 = vmatpush1.bf16.msra.mxu1 %v4398_v32  ;;  %v4818_v24 = vld [vmem:[#allocation7 + $0x10] ss:$8 sps:$4 sm:$0xff]   ;;  %v4823_v32 = vld [vmem:[#allocation7 + $0x24] ss:$8 sps:$4 sm:$0xff]  }
 0x5fd   :  { %2635 = vmatprep.subr.bf16.mxu0 %v4405_v6  ;;  %2708 = vmatprep.subr.bf16.mxu1 %v4407_v35  ;;  %v4821_v6 = vld [vmem:[#allocation7 + $0x20] ss:$8 sps:$4 sm:$0xff]   ;;  %v4826_v35 = vld [vmem:[#allocation7 + $0x34] ss:$8 sps:$4 sm:$0xff]  }
 0x600   :  { %2636 = vmatpush1.bf16.msra.mxu0 %v4404_v3  ;;  %2709 = vmatpush1.bf16.msra.mxu1 %v4406_v12  ;;  %v4836_v3 = vld [vmem:[#allocation7 + $0x70] ss:$8 sps:$4 sm:$0xff]   ;;  %v4839_v12 = vld [vmem:[#allocation7 + $0x80] ss:$8 sps:$4 sm:$0xff]  }
 0x601   :  { %2637 = vmatprep.subr.bf16.mxu0 %v4413_v48  ;;  %2710 = vmatprep.subr.bf16.mxu1 %v4415_v34  ;;  %v4842_v48 = vld [vmem:[#allocation7 + $0x90] ss:$8 sps:$4 sm:$0xff]   ;;  %v4847_v34 = vld [vmem:[#allocation7 + $0xa4] ss:$8 sps:$4 sm:$0xff]  }
 0x604   :  { %2638 = vmatpush1.bf16.msra.mxu0 %v4412_v59  ;;  %2711 = vmatpush1.bf16.msra.mxu1 %v4414_v62  ;;  %v4856_v59 = vld [vmem:[#allocation7 + $0xd4] ss:$8 sps:$4 sm:$0xff]   ;;  %v4854_v62 = vld [vmem:[#allocation7 + $0xd0] ss:$8 sps:$4 sm:$0xff]  }
 0x605   :  { %2639 = vmatprep.subr.bf16.mxu0 %v4421_v29  ;;  %2712 = vmatprep.subr.bf16.mxu1 %v4423_v40  ;;  %v4859_v29 = vld [vmem:[#allocation7 + $0xe4] ss:$8 sps:$4 sm:$0xff]   ;;  %v4857_v40 = vld [vmem:[#allocation7 + $0xe0] ss:$8 sps:$4 sm:$0xff]  }
 0x608   :  { %2640 = vmatpush1.bf16.msra.mxu0 %v4420_v30  ;;  %2713 = vmatpush1.bf16.msra.mxu1 %v4422_v7  ;;  %v5947_v30 = vrot.slane %v5943_v10, %v5469_v47  ;;  %v5952_v7 = vrot.slane %v5943_v10, %v227_v22 }
 0x609   :  { %2641 = vmatprep.subr.bf16.mxu0 %v4429_v15  ;;  %2714 = vmatprep.subr.bf16.mxu1 %v4431_v14  ;;  %v5956_v15 = vrot.slane %v5943_v10, %v5421_v0  ;;  %v5961_v14 = vrot.slane %v5943_v10, %v231_v23 }
 0x60c   :  { %2642 = vmatpush1.bf16.msra.mxu0 %v4428_v11  ;;  %2715 = vmatpush1.bf16.msra.mxu1 %v4430_v27 }
 0x60d   :  { %3633 = vmatprep.subr.bf16.mxu0 %v4817_v25 }
 0x60f   :  { %2644 = vmatmul.mubr.bf16.vlgmr.msra.gmra.mrb[24].mxu0 %v5818_v18  ;;  %2717 = vmatmul.mubr.bf16.vlgmr.msra.gmra.mrb[88].mxu1 %v5818_v18  ;;  %v4824_v18 = vld [vmem:[#allocation7 + $0x30] ss:$8 sps:$4 sm:$0xff]  }
 0x610   :  { %2653 = vmatprep.mubr.bf16.mxu0 %v5852_v49  ;;  %2726 = vmatprep.mubr.bf16.mxu1 %v5852_v49  ;;  %v4829_v49 = vld [vmem:[#allocation7 + $0x44] ss:$8 sps:$4 sm:$0xff]  }
 0x611   :  { %3634 = vmatpush1.bf16.msra.mxu0 %v4815_v33 }
 0x612   :  { %3635 = vmatprep.subr.bf16.mxu0 %v4820_v50 }
 0x615   :  { %3636 = vmatpush1.bf16.msra.mxu0 %v4818_v24 }
 0x616   :  { %3637 = vmatprep.subr.bf16.mxu0 %v4823_v32 }
 0x617   :  { %2654 = vmatmul.mubr.bf16.gmra.mrb[28].mxu0 %v5856_v43  ;;  %2727 = vmatmul.mubr.bf16.gmra.mrb[92].mxu1 %v5856_v43  ;;  %v4830_v43 = vld [vmem:[#allocation7 + $0x50] ss:$8 sps:$4 sm:$0xff]  }
 0x618   :  { %2663 = vmatprep.mubr.bf16.mxu0 %v5884_v16  ;;  %2736 = vmatprep.mubr.bf16.mxu1 %v5884_v16  ;;  %v4835_v16 = vld [vmem:[#allocation7 + $0x64] ss:$8 sps:$4 sm:$0xff]  }
 0x619   :  { %3638 = vmatpush1.bf16.msra.mxu0 %v4821_v6 }
 0x61a   :  { %3639 = vmatprep.subr.bf16.mxu0 %v4826_v35 }
 0x61d   :  { %3640 = vmatpush1.bf16.msra.mxu0 %v4824_v18 }
 0x61e   :  { %3641 = vmatprep.subr.bf16.mxu0 %v4829_v49 }
 0x61f   :  { %2664 = vmatmul.mubr.bf16.gmra.mrb[32].mxu0 %v5888_v13  ;;  %2737 = vmatmul.mubr.bf16.gmra.mrb[96].mxu1 %v5888_v13  ;;  %v4841_v13 = vld [vmem:[#allocation7 + $0x84] ss:$8 sps:$4 sm:$0xff]  }
 0x620   :  { %2673 = vmatprep.mubr.bf16.mxu0 %v5914_v57  ;;  %2746 = vmatprep.mubr.bf16.mxu1 %v5914_v57  ;;  %v4844_v57 = vld [vmem:[#allocation7 + $0x94] ss:$8 sps:$4 sm:$0xff]  }
 0x621   :  { %3642 = vmatpush1.bf16.msra.mxu0 %v4827_v53 }
 0x622   :  { %3643 = vmatprep.subr.bf16.mxu0 %v4832_v39 }
 0x625   :  { %3644 = vmatpush1.bf16.msra.mxu0 %v4830_v43 }
 0x626   :  { %3645 = vmatprep.subr.bf16.mxu0 %v4835_v16 }
 0x627   :  { %2674 = vmatmul.mubr.bf16.gmra.mrb[36].mxu0 %v5918_v46  ;;  %2747 = vmatmul.mubr.bf16.gmra.mrb[100].mxu1 %v5918_v46  ;;  %v4853_v46 = vld [vmem:[#allocation7 + $0xc4] ss:$8 sps:$4 sm:$0xff]  }
 0x629   :  { %3646 = vmatpush1.bf16.msra.mxu0 %v4833_v58 }
 0x62a   :  { %3647 = vmatprep.subr.bf16.mxu0 %v4838_v45 }
 0x62d   :  { %3648 = vmatpush1.bf16.msra.mxu0 %v4836_v3 }
 0x62e   :  { %3649 = vmatprep.subr.bf16.mxu0 %v4841_v13 }
 0x631   :  { %3650 = vmatpush1.bf16.msra.mxu0 %v4839_v12 }
 0x632   :  { %3651 = vmatprep.subr.bf16.mxu0 %v4844_v57 }
 0x635   :  { %3652 = vmatpush1.bf16.msra.mxu0 %v4842_v48 }
 0x636   :  { %3653 = vmatprep.subr.bf16.mxu0 %v4847_v34 }
 0x639   :  { %3654 = vmatpush1.bf16.msra.mxu0 %v4845_v54 }
 0x63a   :  { %3655 = vmatprep.subr.bf16.mxu0 %v4850_v56 }
 0x63d   :  { %3656 = vmatpush1.bf16.msra.mxu0 %v4848_v19 }
 0x63e   :  { %3657 = vmatprep.subr.bf16.mxu0 %v4853_v46 }
 0x641   :  { %3658 = vmatpush1.bf16.msra.mxu0 %v4851_v42 }
 0x642   :  { %3659 = vmatprep.subr.bf16.mxu0 %v4856_v59  ;;  %v4863_v59 = vld [vmem:[#allocation7 + $0x100] ss:$8 sps:$4 sm:$0xff]  }
 0x645   :  { %3660 = vmatpush1.bf16.msra.mxu0 %v4854_v62 }
 0x646   :  { %3661 = vmatprep.subr.bf16.mxu0 %v4859_v29 }
 0x649   :  { %3662 = vmatpush1.bf16.msra.mxu0 %v4857_v40 }
 0x64a   :  { %3663 = vmatprep.subr.bf16.mxu0 %v4862_v1 }
 0x64d   :  { %3664 = vmatpush1.bf16.msra.mxu0 %v4860_v38  ;;  %v4868_v38 = vld [vmem:[#allocation7 + $0x114] ss:$8 sps:$4 sm:$0xff]  }
 0x64e   :  { %3706 = vmatprep.subr.bf16.mxu0 %v4865_v60 }
 0x6a2   :  { %v2499_v11 = vpop.f32.mrb[8].mxu0  ;;  %v2572_v27 = vpop.f32.mrb[72].mxu1 }
 0x6a3   :  { %v2500_v25 = vadd.f32 %v2499_v11, %v5947_v30  ;;  %v2573_v33 = vadd.f32 %v2572_v27, %v5952_v7  ;;  %v2501_v50 = vpop.f32.mrb[9].mxu0  ;;  %v2574_v24 = vpop.f32.mrb[73].mxu1 }
 0x6a4   :  { %v2502_v22 = vadd.f32 %v2501_v50, %v5956_v15  ;;  %v2575_v32 = vadd.f32 %v2574_v24, %v5961_v14  ;;  %v2503_v6 = vpop.f32.mrb[10].mxu0  ;;  %v2576_v35 = vpop.f32.mrb[74].mxu1 }
 0x6a5   :  { %v2504_v18 = vadd.f32 %v2503_v6, %v5947_v30  ;;  %v2577_v49 = vadd.f32 %v2576_v35, %v5952_v7  ;;  %v2505_v23 = vpop.f32.mrb[11].mxu0  ;;  %v2578_v53 = vpop.f32.mrb[75].mxu1  ;;  %v2757_v16 = vmax.f32 %v2500_v25, 0.0  ;;  %v2759_v58 = vmax.f32 %v2573_v33, 0.0  ;;  %v4866_v35 = vld [vmem:[#allocation7 + $0x110] ss:$8 sps:$4 sm:$0xff]  }
 0x6a6   :  { %v2506_v39 = vadd.f32 %v2505_v23, %v5956_v15  ;;  %v2579_v43 = vadd.f32 %v2578_v53, %v5961_v14  ;;  %v2758_v13 = vmax.f32 %v2502_v22, 0.0  ;;  %v2760_v12 = vmax.f32 %v2575_v32, 0.0 }
 0x6a7   :  { %v2765_v45 = vmax.f32 %v2504_v18, 0.0  ;;  %v2767_v3 = vmax.f32 %v2577_v49, 0.0 }
 0x6a8   :  { %v2766_v57 = vmax.f32 %v2506_v39, 0.0  ;;  %v2768_v48 = vmax.f32 %v2579_v43, 0.0  ;;  %v4871_v39 = vld [vmem:[#allocation7 + $0x124] ss:$8 sps:$4 sm:$0xff]  }
 0x6a9   :  { %v2821_v34 = vpack.c.bf16 %v2765_v45, %v2757_v16  ;;  %v5971_v54 = vpack.c.bf16 %v2767_v3, %v2759_v58 }
 0x6aa   :  { %v2822_v56 = vpack.c.bf16 %v2766_v57, %v2758_v13  ;;  %v5973_v19 = vpack.c.bf16 %v2768_v48, %v2760_v12  ;;  %v2509_v46 = vpop.f32.mrb[12].mxu0  ;;  %v2582_v42 = vpop.f32.mrb[76].mxu1 }
 0x6ab   :  { %v2510_v62 = vadd.f32 %v2509_v46, %v5947_v30  ;;  %v2583_v29 = vadd.f32 %v2582_v42, %v5952_v7  ;;  %v2511_v40 = vpop.f32.mrb[13].mxu0  ;;  %v2584_v1 = vpop.f32.mrb[77].mxu1 }
 0x6ac   :  { %v2512_v60 = vadd.f32 %v2511_v40, %v5956_v15  ;;  %v2585_v11 = vadd.f32 %v2584_v1, %v5961_v14  ;;  %v2513_v27 = vpop.f32.mrb[14].mxu0  ;;  %v2586_v25 = vpop.f32.mrb[78].mxu1  ;;  %3665 = vmatprep.mubr.bf16.mxu0 %v2822_v56  ;;  %v4869_v56 = vld [vmem:[#allocation7 + $0x120] ss:$8 sps:$4 sm:$0xff]  }
 0x6ad   :  { %v2514_v33 = vadd.f32 %v2513_v27, %v5947_v30  ;;  %v2587_v50 = vadd.f32 %v2586_v25, %v5952_v7  ;;  %v2515_v24 = vpop.f32.mrb[15].mxu0  ;;  %v2588_v22 = vpop.f32.mrb[79].mxu1  ;;  %3666 = vmatmul.mubr.bf16.vlgmr.msra.gmra.mrb[40].mxu0 %v2821_v34  ;;  %v2773_v18 = vmax.f32 %v2510_v62, 0.0  ;;  %v2775_v49 = vmax.f32 %v2583_v29, 0.0  ;;  %v4874_v29 = vld [vmem:[#allocation7 + $0x134] ss:$8 sps:$4 sm:$0xff]  }
 0x6ae   :  { %v2516_v32 = vadd.f32 %v2515_v24, %v5956_v15  ;;  %v2589_v6 = vadd.f32 %v2588_v22, %v5961_v14  ;;  %3707 = vmatpush1.bf16.msra.mxu0 %v4863_v59  ;;  %v2774_v43 = vmax.f32 %v2512_v60, 0.0  ;;  %v2776_v16 = vmax.f32 %v2585_v11, 0.0  ;;  %v4872_v22 = vld [vmem:[#allocation7 + $0x130] ss:$8 sps:$4 sm:$0xff]  }
 0x6af   :  { %v2781_v23 = vmax.f32 %v2514_v33, 0.0  ;;  %v2783_v53 = vmax.f32 %v2587_v50, 0.0  ;;  %3708 = vmatprep.subr.bf16.mxu0 %v4868_v38 }
 0x6b0   :  { %v2782_v58 = vmax.f32 %v2516_v32, 0.0  ;;  %v2784_v45 = vmax.f32 %v2589_v6, 0.0 }
 0x6b1   :  { %v2829_v3 = vpack.c.bf16 %v2781_v23, %v2773_v18  ;;  %v5983_v13 = vpack.c.bf16 %v2783_v53, %v2775_v49  ;;  %v4877_v49 = vld [vmem:[#allocation7 + $0x144] ss:$8 sps:$4 sm:$0xff]  }
 0x6b2   :  { %v2830_v12 = vpack.c.bf16 %v2782_v58, %v2774_v43  ;;  %v5985_v57 = vpack.c.bf16 %v2784_v45, %v2776_v16  ;;  %3709 = vmatpush1.bf16.msra.mxu0 %v4866_v35  ;;  %v2519_v48 = vpop.f32.mrb[16].mxu0  ;;  %v2592_v34 = vpop.f32.mrb[80].mxu1 }
 0x6b3   :  { %v2520_v46 = vadd.f32 %v2519_v48, %v5947_v30  ;;  %v2593_v42 = vadd.f32 %v2592_v34, %v5952_v7  ;;  %v2521_v59 = vpop.f32.mrb[17].mxu0  ;;  %v2594_v62 = vpop.f32.mrb[81].mxu1  ;;  %3710 = vmatprep.subr.bf16.mxu0 %v4871_v39  ;;  %v4875_v34 = vld [vmem:[#allocation7 + $0x140] ss:$8 sps:$4 sm:$0xff]  }
 0x6b4   :  { %v2522_v40 = vadd.f32 %v2521_v59, %v5956_v15  ;;  %v2595_v1 = vadd.f32 %v2594_v62, %v5961_v14  ;;  %v2523_v38 = vpop.f32.mrb[18].mxu0  ;;  %v2596_v60 = vpop.f32.mrb[82].mxu1  ;;  %3675 = vmatprep.mubr.bf16.mxu0 %v2830_v12  ;;  %v4880_v62 = vld [vmem:[#allocation7 + $0x154] ss:$8 sps:$4 sm:$0xff]  }
 0x6b5   :  { %v2524_v11 = vadd.f32 %v2523_v38, %v5947_v30  ;;  %v2597_v27 = vadd.f32 %v2596_v60, %v5952_v7  ;;  %v2525_v25 = vpop.f32.mrb[19].mxu0  ;;  %v2598_v33 = vpop.f32.mrb[83].mxu1  ;;  %3676 = vmatmul.mubr.bf16.gmra.mrb[44].mxu0 %v2829_v3  ;;  %v2789_v32 = vmax.f32 %v2520_v46, 0.0  ;;  %v2791_v6 = vmax.f32 %v2593_v42, 0.0 }
 0x6b6   :  { %v2526_v50 = vadd.f32 %v2525_v25, %v5956_v15  ;;  %v2599_v24 = vadd.f32 %v2598_v33, %v5961_v14  ;;  %3711 = vmatpush1.bf16.msra.mxu0 %v4869_v56  ;;  %v2790_v23 = vmax.f32 %v2522_v40, 0.0  ;;  %v2792_v53 = vmax.f32 %v2595_v1, 0.0 }
 0x6b7   :  { %v2797_v35 = vmax.f32 %v2524_v11, 0.0  ;;  %v2799_v18 = vmax.f32 %v2597_v27, 0.0  ;;  %3712 = vmatprep.subr.bf16.mxu0 %v4874_v29 }
 0x6b8   :  { %v2798_v39 = vmax.f32 %v2526_v50, 0.0  ;;  %v2800_v43 = vmax.f32 %v2599_v24, 0.0  ;;  %v4878_v24 = vld [vmem:[#allocation7 + $0x150] ss:$8 sps:$4 sm:$0xff]  }
 0x6b9   :  { %v2837_v16 = vpack.c.bf16 %v2797_v35, %v2789_v32  ;;  %v5995_v58 = vpack.c.bf16 %v2799_v18, %v2791_v6  ;;  %v4883_v18 = vld [vmem:[#allocation7 + $0x164] ss:$8 sps:$4 sm:$0xff]  }
 0x6ba   :  { %v2838_v45 = vpack.c.bf16 %v2798_v39, %v2790_v23  ;;  %v5997_v3 = vpack.c.bf16 %v2800_v43, %v2792_v53  ;;  %3713 = vmatpush1.bf16.msra.mxu0 %v4872_v22  ;;  %v2529_v12 = vpop.f32.mrb[20].mxu0  ;;  %v2602_v48 = vpop.f32.mrb[84].mxu1 }
 0x6bb   :  { %v2530_v56 = vadd.f32 %v2529_v12, %v5947_v30  ;;  %v2603_v46 = vadd.f32 %v2602_v48, %v5952_v7  ;;  %v2531_v42 = vpop.f32.mrb[21].mxu0  ;;  %v2604_v59 = vpop.f32.mrb[85].mxu1  ;;  %3714 = vmatprep.subr.bf16.mxu0 %v4877_v49  ;;  %v4889_v12 = vld [vmem:[#allocation7 + $0x184] ss:$8 sps:$4 sm:$0xff]   ;;  %v4887_v48 = vld [vmem:[#allocation7 + $0x180] ss:$8 sps:$4 sm:$0xff]  }
 0x6bc   :  { %v2532_v29 = vadd.f32 %v2531_v42, %v5956_v15  ;;  %v2605_v40 = vadd.f32 %v2604_v59, %v5961_v14  ;;  %v2533_v1 = vpop.f32.mrb[22].mxu0  ;;  %v2606_v38 = vpop.f32.mrb[86].mxu1  ;;  %3685 = vmatprep.mubr.bf16.mxu0 %v2838_v45  ;;  %v4884_v45 = vld [vmem:[#allocation7 + $0x170] ss:$8 sps:$4 sm:$0xff]   ;;  %v4893_v42 = vld [vmem:[#allocation7 + $0x1a0] ss:$8 sps:$4 sm:$0xff]  }
 0x6bd   :  { %v2534_v60 = vadd.f32 %v2533_v1, %v5947_v30  ;;  %v2607_v11 = vadd.f32 %v2606_v38, %v5952_v7  ;;  %v2535_v27 = vpop.f32.mrb[23].mxu0  ;;  %v2608_v25 = vpop.f32.mrb[87].mxu1  ;;  %3686 = vmatmul.mubr.bf16.gmra.mrb[48].mxu0 %v2837_v16  ;;  %v2805_v22 = vmax.f32 %v2530_v56, 0.0  ;;  %v2807_v32 = vmax.f32 %v2603_v46, 0.0  ;;  %v4890_v56 = vld [vmem:[#allocation7 + $0x190] ss:$8 sps:$4 sm:$0xff]  }
 0x6be   :  { %v2536_v33 = vadd.f32 %v2535_v27, %v5956_v15  ;;  %v2609_v50 = vadd.f32 %v2608_v25, %v5961_v14  ;;  %3715 = vmatpush1.bf16.msra.mxu0 %v4875_v34  ;;  %v2806_v49 = vmax.f32 %v2532_v29, 0.0  ;;  %v2808_v23 = vmax.f32 %v2605_v40, 0.0  ;;  %v4881_v15 = vld [vmem:[#allocation7 + $0x160] ss:$8 sps:$4 sm:$0xff]   ;;  %v4886_v14 = vld [vmem:[#allocation7 + $0x174] ss:$8 sps:$4 sm:$0xff]  }
 0x6bf   :  { %v2813_v6 = vmax.f32 %v2534_v60, 0.0  ;;  %v2815_v35 = vmax.f32 %v2607_v11, 0.0  ;;  %3716 = vmatprep.subr.bf16.mxu0 %v4880_v62  ;;  %v4892_v34 = vld [vmem:[#allocation7 + $0x194] ss:$8 sps:$4 sm:$0xff]   ;;  %v4895_v46 = vld [vmem:[#allocation7 + $0x1a4] ss:$8 sps:$4 sm:$0xff]   ;;  %v6017_v11 = vrot.slane %v5943_v10, %v235_v8 }
 0x6c0   :  { %v2814_v30 = vmax.f32 %v2536_v33, 0.0  ;;  %v2816_v53 = vmax.f32 %v2609_v50, 0.0  ;;  %v4898_v59 = vld [vmem:[#allocation7 + $0x1b4] ss:$8 sps:$4 sm:$0xff]   ;;  %v4896_v62 = vld [vmem:[#allocation7 + $0x1b0] ss:$8 sps:$4 sm:$0xff]   ;;  %v6025_v33 = vrot.slane %v5943_v10, %v239_v9 }
 0x6c1   :  { %v2845_v7 = vpack.c.bf16 %v2813_v6, %v2805_v22  ;;  %v6007_v39 = vpack.c.bf16 %v2815_v35, %v2807_v32  ;;  %v4901_v29 = vld [vmem:[#allocation7 + $0x1c4] ss:$8 sps:$4 sm:$0xff]   ;;  %v4904_v40 = vld [vmem:[#allocation7 + $0x1d4] ss:$8 sps:$4 sm:$0xff]   ;;  %v1811_v1 = vsub.s32 6, %v5418_v61  ;;  %v1815_v38 = vsub.s32 7, %v5418_v61 }
 0x6c2   :  { %v2846_v43 = vpack.c.bf16 %v2814_v30, %v2806_v49  ;;  %v6009_v16 = vpack.c.bf16 %v2816_v53, %v2808_v23  ;;  %3717 = vmatpush1.bf16.msra.mxu0 %v4878_v24  ;;  %v4902_v60 = vld [vmem:[#allocation7 + $0x1d0] ss:$8 sps:$4 sm:$0xff]   ;;  %v4907_v25 = vld [vmem:[#allocation7 + $0x1e4] ss:$8 sps:$4 sm:$0xff]   ;;  %v4905_v32 = vld [vmem:[#allocation7 + $0x1e0] ss:$8 sps:$4 sm:$0xff]  }
 0x6c3   :  { %3718 = vmatprep.subr.bf16.mxu0 %v4883_v18  ;;  %v6020_v27 = vrot.slane %v5943_v10, %v1811_v1  ;;  %v6028_v50 = vrot.slane %v5943_v10, %v1815_v38  ;;  %v4910_v49 = vld [vmem:[#allocation7 + $0x1f4] ss:$8 sps:$4 sm:$0xff]  }
 0x6c4   :  { %3695 = vmatprep.mubr.bf16.mxu0 %v2846_v43 }
 0x6c5   :  { %3696 = vmatmul.mubr.bf16.gmra.mrb[52].mxu0 %v2845_v7 }
 0x6c6   :  { %3719 = vmatpush1.bf16.msra.mxu0 %v4881_v15  ;;  %3738 = vmatprep.mubr.bf16.mxu0 %v5973_v19  ;;  %v4899_v19 = vld [vmem:[#allocation7 + $0x1c0] ss:$8 sps:$4 sm:$0xff]  }
 0x6c7   :  { %3720 = vmatprep.subr.bf16.mxu0 %v4886_v14 }
 0x6ca   :  { %3721 = vmatpush1.bf16.msra.mxu0 %v4884_v45  ;;  %v4908_v45 = vld [vmem:[#allocation7 + $0x1f0] ss:$8 sps:$4 sm:$0xff]  }
 0x6cb   :  { %3722 = vmatprep.subr.bf16.mxu0 %v4889_v12 }
 0x6ce   :  { %3723 = vmatpush1.bf16.msra.mxu0 %v4887_v48 }
 0x6cf   :  { %3724 = vmatprep.subr.bf16.mxu0 %v4892_v34 }
 0x6d2   :  { %3725 = vmatpush1.bf16.msra.mxu0 %v4890_v56 }
 0x6d3   :  { %3726 = vmatprep.subr.bf16.mxu0 %v4895_v46  ;;  %v4913_v46 = vld [vmem:[#allocation7 + $0x204] ss:$8 sps:$4 sm:$0xff]  }
 0x6d6   :  { %3727 = vmatpush1.bf16.msra.mxu0 %v4893_v42 }
 0x6d7   :  { %3728 = vmatprep.subr.bf16.mxu0 %v4898_v59 }
 0x6da   :  { %3729 = vmatpush1.bf16.msra.mxu0 %v4896_v62 }
 0x6db   :  { %3730 = vmatprep.subr.bf16.mxu0 %v4901_v29 }
 0x6de   :  { %3731 = vmatpush1.bf16.msra.mxu0 %v4899_v19 }
 0x6df   :  { %3732 = vmatprep.subr.bf16.mxu0 %v4904_v40 }
 0x6e2   :  { %v2645_v24 = vpop.f32.mrb[24].mxu0  ;;  %v2718_v22 = vpop.f32.mrb[88].mxu1  ;;  %3733 = vmatpush1.bf16.msra.mxu0 %v4902_v60 }
 0x6e3   :  { %v2646_v6 = vadd.f32 %v2645_v24, %v6017_v11  ;;  %v2719_v8 = vadd.f32 %v2718_v22, %v6020_v27  ;;  %v2647_v35 = vpop.f32.mrb[25].mxu0  ;;  %v2720_v18 = vpop.f32.mrb[89].mxu1  ;;  %3734 = vmatprep.subr.bf16.mxu0 %v4907_v25  ;;  %v4911_v24 = vld [vmem:[#allocation7 + $0x200] ss:$8 sps:$4 sm:$0xff]  }
 0x6e4   :  { %v2648_v61 = vadd.f32 %v2647_v35, %v6025_v33  ;;  %v2721_v9 = vadd.f32 %v2720_v18, %v6028_v50  ;;  %v2649_v23 = vpop.f32.mrb[26].mxu0  ;;  %v2722_v30 = vpop.f32.mrb[90].mxu1  ;;  %v4916_v35 = vld [vmem:[#allocation7 + $0x214] ss:$8 sps:$4 sm:$0xff]  }
 0x6e5   :  { %v2650_v10 = vadd.f32 %v2649_v23, %v6017_v11  ;;  %v2723_v53 = vadd.f32 %v2722_v30, %v6020_v27  ;;  %v2651_v7 = vpop.f32.mrb[27].mxu0  ;;  %v2724_v43 = vpop.f32.mrb[91].mxu1  ;;  %v2761_v12 = vmax.f32 %v2646_v6, 0.0  ;;  %v2763_v48 = vmax.f32 %v2719_v8, 0.0 }
 0x6e6   :  { %v2652_v15 = vadd.f32 %v2651_v7, %v6025_v33  ;;  %v2725_v14 = vadd.f32 %v2724_v43, %v6028_v50  ;;  %3735 = vmatpush1.bf16.msra.mxu0 %v4905_v32  ;;  %v2762_v42 = vmax.f32 %v2648_v61, 0.0  ;;  %v2764_v59 = vmax.f32 %v2721_v9, 0.0 }
 0x6e7   :  { %v2769_v34 = vmax.f32 %v2650_v10, 0.0  ;;  %v2771_v56 = vmax.f32 %v2723_v53, 0.0  ;;  %3736 = vmatprep.subr.bf16.mxu0 %v4910_v49 }
 0x6e8   :  { %v2770_v62 = vmax.f32 %v2652_v15, 0.0  ;;  %v2772_v29 = vmax.f32 %v2725_v14, 0.0  ;;  %v4914_v15 = vld [vmem:[#allocation7 + $0x210] ss:$8 sps:$4 sm:$0xff]  }
 0x6e9   :  { %v6038_v19 = vpack.c.bf16 %v2769_v34, %v2761_v12  ;;  %v6040_v40 = vpack.c.bf16 %v2771_v56, %v2763_v48  ;;  %v4919_v34 = vld [vmem:[#allocation7 + $0x224] ss:$8 sps:$4 sm:$0xff]  }
 0x6ea   :  { %v6042_v1 = vpack.c.bf16 %v2770_v62, %v2762_v42  ;;  %v6044_v38 = vpack.c.bf16 %v2772_v29, %v2764_v59  ;;  %v2655_v60 = vpop.f32.mrb[28].mxu0  ;;  %v2728_v25 = vpop.f32.mrb[92].mxu1  ;;  %3737 = vmatpush1.bf16.msra.mxu0 %v4908_v45 }
 0x6eb   :  { %v2656_v22 = vadd.f32 %v2655_v60, %v6017_v11  ;;  %v2729_v32 = vadd.f32 %v2728_v25, %v6020_v27  ;;  %v2657_v6 = vpop.f32.mrb[29].mxu0  ;;  %v2730_v8 = vpop.f32.mrb[93].mxu1  ;;  %3779 = vmatprep.subr.bf16.mxu0 %v4913_v46 }
 0x6ec   :  { %v2658_v18 = vadd.f32 %v2657_v6, %v6025_v33  ;;  %v2731_v49 = vadd.f32 %v2730_v8, %v6028_v50  ;;  %v2659_v61 = vpop.f32.mrb[30].mxu0  ;;  %v2732_v9 = vpop.f32.mrb[94].mxu1 }
 0x6ed   :  { %v2660_v23 = vadd.f32 %v2659_v61, %v6017_v11  ;;  %v2733_v30 = vadd.f32 %v2732_v9, %v6020_v27  ;;  %v2661_v10 = vpop.f32.mrb[31].mxu0  ;;  %v2734_v53 = vpop.f32.mrb[95].mxu1  ;;  %3739 = vmatmul.mubr.bf16.vlgmr.msra.gmra.mrb[40].mxu0 %v5971_v54  ;;  %v2777_v14 = vmax.f32 %v2656_v22, 0.0  ;;  %v2779_v45 = vmax.f32 %v2729_v32, 0.0 }
 0x6ee   :  { %v2662_v7 = vadd.f32 %v2661_v10, %v6025_v33  ;;  %v2735_v43 = vadd.f32 %v2734_v53, %v6028_v50  ;;  %3748 = vmatprep.mubr.bf16.mxu0 %v5985_v57  ;;  %3780 = vmatpush1.bf16.msra.mxu0 %v4911_v24  ;;  %v2778_v56 = vmax.f32 %v2658_v18, 0.0  ;;  %v2780_v46 = vmax.f32 %v2731_v49, 0.0  ;;  %v4917_v24 = vld [vmem:[#allocation7 + $0x220] ss:$8 sps:$4 sm:$0xff]  }
 0x6ef   :  { %v2785_v12 = vmax.f32 %v2660_v23, 0.0  ;;  %v2787_v48 = vmax.f32 %v2733_v30, 0.0  ;;  %3781 = vmatprep.subr.bf16.mxu0 %v4916_v35  ;;  %v4922_v35 = vld [vmem:[#allocation7 + $0x234] ss:$8 sps:$4 sm:$0xff]  }
 0x6f0   :  { %v2786_v42 = vmax.f32 %v2662_v7, 0.0  ;;  %v2788_v59 = vmax.f32 %v2735_v43, 0.0 }
 0x6f1   :  { %v6056_v62 = vpack.c.bf16 %v2785_v12, %v2777_v14  ;;  %v6058_v54 = vpack.c.bf16 %v2787_v48, %v2779_v45 }
 0x6f2   :  { %v6060_v29 = vpack.c.bf16 %v2786_v42, %v2778_v56  ;;  %v6062_v60 = vpack.c.bf16 %v2788_v59, %v2780_v46  ;;  %v2665_v57 = vpop.f32.mrb[32].mxu0  ;;  %v2738_v25 = vpop.f32.mrb[96].mxu1  ;;  %3782 = vmatpush1.bf16.msra.mxu0 %v4914_v15  ;;  %v4920_v15 = vld [vmem:[#allocation7 + $0x230] ss:$8 sps:$4 sm:$0xff]  }
 0x6f3   :  { %v2666_v22 = vadd.f32 %v2665_v57, %v6017_v11  ;;  %v2739_v32 = vadd.f32 %v2738_v25, %v6020_v27  ;;  %v2667_v6 = vpop.f32.mrb[33].mxu0  ;;  %v2740_v8 = vpop.f32.mrb[97].mxu1  ;;  %3783 = vmatprep.subr.bf16.mxu0 %v4919_v34  ;;  %v4925_v34 = vld [vmem:[#allocation7 + $0x244] ss:$8 sps:$4 sm:$0xff]  }
 0x6f4   :  { %v2668_v18 = vadd.f32 %v2667_v6, %v6025_v33  ;;  %v2741_v49 = vadd.f32 %v2740_v8, %v6028_v50  ;;  %v2669_v61 = vpop.f32.mrb[34].mxu0  ;;  %v2742_v9 = vpop.f32.mrb[98].mxu1 }
 0x6f5   :  { %v2670_v23 = vadd.f32 %v2669_v61, %v6017_v11  ;;  %v2743_v30 = vadd.f32 %v2742_v9, %v6020_v27  ;;  %v2671_v10 = vpop.f32.mrb[35].mxu0  ;;  %v2744_v53 = vpop.f32.mrb[99].mxu1  ;;  %3749 = vmatmul.mubr.bf16.gmra.mrb[44].mxu0 %v5983_v13  ;;  %v2793_v14 = vmax.f32 %v2666_v22, 0.0  ;;  %v2795_v45 = vmax.f32 %v2739_v32, 0.0  ;;  %v4923_v22 = vld [vmem:[#allocation7 + $0x240] ss:$8 sps:$4 sm:$0xff]  }
 0x6f6   :  { %v2672_v7 = vadd.f32 %v2671_v10, %v6025_v33  ;;  %v2745_v43 = vadd.f32 %v2744_v53, %v6028_v50  ;;  %3758 = vmatprep.mubr.bf16.mxu0 %v5997_v3  ;;  %3784 = vmatpush1.bf16.msra.mxu0 %v4917_v24  ;;  %v2794_v56 = vmax.f32 %v2668_v18, 0.0  ;;  %v2796_v46 = vmax.f32 %v2741_v49, 0.0  ;;  %v4928_v49 = vld [vmem:[#allocation7 + $0x254] ss:$8 sps:$4 sm:$0xff]  }
 0x6f7   :  { %v2801_v12 = vmax.f32 %v2670_v23, 0.0  ;;  %v2803_v48 = vmax.f32 %v2743_v30, 0.0  ;;  %3785 = vmatprep.subr.bf16.mxu0 %v4922_v35 }
 0x6f8   :  { %v2802_v42 = vmax.f32 %v2672_v7, 0.0  ;;  %v2804_v59 = vmax.f32 %v2745_v43, 0.0 }
 0x6f9   :  { %v6074_v57 = vpack.c.bf16 %v2801_v12, %v2793_v14  ;;  %v6076_v13 = vpack.c.bf16 %v2803_v48, %v2795_v45  ;;  %v4926_v45 = vld [vmem:[#allocation7 + $0x250] ss:$8 sps:$4 sm:$0xff]  }
 0x6fa   :  { %v6078_v25 = vpack.c.bf16 %v2802_v42, %v2794_v56  ;;  %v6080_v6 = vpack.c.bf16 %v2804_v59, %v2796_v46  ;;  %v2675_v3 = vpop.f32.mrb[36].mxu0  ;;  %v2748_v24 = vpop.f32.mrb[100].mxu1  ;;  %3786 = vmatpush1.bf16.msra.mxu0 %v4920_v15 }
 0x6fb   :  { %v2676_v32 = vadd.f32 %v2675_v3, %v6017_v11  ;;  %v2749_v8 = vadd.f32 %v2748_v24, %v6020_v27  ;;  %v2677_v35 = vpop.f32.mrb[37].mxu0  ;;  %v2750_v18 = vpop.f32.mrb[101].mxu1  ;;  %3787 = vmatprep.subr.bf16.mxu0 %v4925_v34  ;;  %v4934_v24 = vld [vmem:[#allocation7 + $0x274] ss:$8 sps:$4 sm:$0xff]  }
 0x6fc   :  { %v2678_v61 = vadd.f32 %v2677_v35, %v6025_v33  ;;  %v2751_v9 = vadd.f32 %v2750_v18, %v6028_v50  ;;  %v2679_v23 = vpop.f32.mrb[38].mxu0  ;;  %v2752_v30 = vpop.f32.mrb[102].mxu1  ;;  %v4940_v35 = vld [vmem:[#allocation7 + $0x294] ss:$8 sps:$4 sm:$0xff]   ;;  %v4938_v18 = vld [vmem:[#allocation7 + $0x290] ss:$8 sps:$4 sm:$0xff]  }
 0x6fd   :  { %v2680_v10 = vadd.f32 %v2679_v23, %v6017_v11  ;;  %v2753_v53 = vadd.f32 %v2752_v30, %v6020_v27  ;;  %v2681_v7 = vpop.f32.mrb[39].mxu0  ;;  %v2754_v43 = vpop.f32.mrb[103].mxu1  ;;  %3759 = vmatmul.mubr.bf16.gmra.mrb[48].mxu0 %v5995_v58  ;;  %v2809_v12 = vmax.f32 %v2676_v32, 0.0  ;;  %v2811_v48 = vmax.f32 %v2749_v8, 0.0  ;;  %v4931_v11 = vld [vmem:[#allocation7 + $0x264] ss:$8 sps:$4 sm:$0xff]  }
 0x6fe   :  { %v2682_v15 = vadd.f32 %v2681_v7, %v6025_v33  ;;  %v2755_v14 = vadd.f32 %v2754_v43, %v6028_v50  ;;  %3768 = vmatprep.mubr.bf16.mxu0 %v6009_v16  ;;  %3788 = vmatpush1.bf16.msra.mxu0 %v4923_v22  ;;  %v2810_v46 = vmax.f32 %v2678_v61, 0.0  ;;  %v2812_v27 = vmax.f32 %v2751_v9, 0.0  ;;  %v4929_v16 = vld [vmem:[#allocation7 + $0x260] ss:$8 sps:$4 sm:$0xff]   ;;  %v4932_v22 = vld [vmem:[#allocation7 + $0x270] ss:$8 sps:$4 sm:$0xff]  }
 0x6ff   :  { %v2817_v34 = vmax.f32 %v2680_v10, 0.0  ;;  %v2819_v56 = vmax.f32 %v2753_v53, 0.0  ;;  %3789 = vmatprep.subr.bf16.mxu0 %v4928_v49  ;;  %v4937_v32 = vld [vmem:[#allocation7 + $0x284] ss:$8 sps:$4 sm:$0xff]   ;;  %v4935_v8 = vld [vmem:[#allocation7 + $0x280] ss:$8 sps:$4 sm:$0xff]  }
 0x700   :  { %v2818_v42 = vmax.f32 %v2682_v15, 0.0  ;;  %v2820_v59 = vmax.f32 %v2755_v14, 0.0  ;;  %v4943_v49 = vld [vmem:[#allocation7 + $0x2a4] ss:$8 sps:$4 sm:$0xff]   ;;  %v4941_v61 = vld [vmem:[#allocation7 + $0x2a0] ss:$8 sps:$4 sm:$0xff]  }
 0x701   :  { %v6092_v3 = vpack.c.bf16 %v2817_v34, %v2809_v12  ;;  %v6094_v58 = vpack.c.bf16 %v2819_v56, %v2811_v48  ;;  %v4946_v9 = vld [vmem:[#allocation7 + $0x2b4] ss:$8 sps:$4 sm:$0xff]   ;;  %v4949_v23 = vld [vmem:[#allocation7 + $0x2c4] ss:$8 sps:$4 sm:$0xff]   ;;  %v4950_v10 = vld [vmem:[#allocation7 + $0x2d0] ss:$8 sps:$4 sm:$0xff]  }
 0x702   :  { %v6096_v33 = vpack.c.bf16 %v2818_v42, %v2810_v46  ;;  %v6098_v50 = vpack.c.bf16 %v2820_v59, %v2812_v27  ;;  %3790 = vmatpush1.bf16.msra.mxu0 %v4926_v45  ;;  %v4952_v30 = vld [vmem:[#allocation7 + $0x2d4] ss:$8 sps:$4 sm:$0xff]   ;;  %v4955_v53 = vld [vmem:[#allocation7 + $0x2e4] ss:$8 sps:$4 sm:$0xff]   ;;  %v4953_v7 = vld [vmem:[#allocation7 + $0x2e0] ss:$8 sps:$4 sm:$0xff]  }
 0x703   :  { %3791 = vmatprep.subr.bf16.mxu0 %v4931_v11  ;;  %v4958_v43 = vld [vmem:[#allocation7 + $0x2f4] ss:$8 sps:$4 sm:$0xff]   ;;  %v4956_v15 = vld [vmem:[#allocation7 + $0x2f0] ss:$8 sps:$4 sm:$0xff]   ;;  %v4961_v14 = vld [vmem:[#allocation7 + $0x304] ss:$8 sps:$4 sm:$0xff]  }
 0x704   :  { %v4959_v45 = vld [vmem:[#allocation7 + $0x300] ss:$8 sps:$4 sm:$0xff]   ;;  %v4964_v12 = vld [vmem:[#allocation7 + $0x314] ss:$8 sps:$4 sm:$0xff]   ;;  %v4962_v48 = vld [vmem:[#allocation7 + $0x310] ss:$8 sps:$4 sm:$0xff]  }
 0x705   :  { %3769 = vmatmul.mubr.bf16.gmra.mrb[52].mxu0 %v6007_v39  ;;  %v4944_v39 = vld [vmem:[#allocation7 + $0x2b0] ss:$8 sps:$4 sm:$0xff]   ;;  %v4967_v34 = vld [vmem:[#allocation7 + $0x324] ss:$8 sps:$4 sm:$0xff]   ;;  %v4965_v56 = vld [vmem:[#allocation7 + $0x320] ss:$8 sps:$4 sm:$0xff]  }
 0x706   :  { %3792 = vmatpush1.bf16.msra.mxu0 %v4929_v16  ;;  %3811 = vmatprep.mubr.bf16.mxu0 %v6042_v1  ;;  %v4947_v1 = vld [vmem:[#allocation7 + $0x2c0] ss:$8 sps:$4 sm:$0xff]   ;;  %v4970_v11 = vld [vmem:[#allocation7 + $0x334] ss:$8 sps:$4 sm:$0xff]   ;;  %v4968_v46 = vld [vmem:[#allocation7 + $0x330] ss:$8 sps:$4 sm:$0xff]  }
 0x707   :  { %3793 = vmatprep.subr.bf16.mxu0 %v4934_v24  ;;  %v4973_v27 = vld [vmem:[#allocation7 + $0x344] ss:$8 sps:$4 sm:$0xff]   ;;  %v4974_v42 = vld [vmem:[#allocation7 + $0x350] ss:$8 sps:$4 sm:$0xff]  }
 0x708   :  { %v4979_v59 = vld [vmem:[#allocation7 + $0x364] ss:$8 sps:$4 sm:$0xff]   ;;  %v4980_v16 = vld [vmem:[#allocation7 + $0x370] ss:$8 sps:$4 sm:$0xff]  }
 0x709   :  { %v4985_v24 = vld [vmem:[#allocation7 + $0x384] ss:$8 sps:$4 sm:$0xff]  }
 0x70a   :  { %3794 = vmatpush1.bf16.msra.mxu0 %v4932_v22  ;;  %v4986_v22 = vld [vmem:[#allocation7 + $0x390] ss:$8 sps:$4 sm:$0xff]  }
 0x70b   :  { %3795 = vmatprep.subr.bf16.mxu0 %v4937_v32  ;;  %v4991_v32 = vld [vmem:[#allocation7 + $0x3a4] ss:$8 sps:$4 sm:$0xff]  }
 0x70e   :  { %3796 = vmatpush1.bf16.msra.mxu0 %v4935_v8  ;;  %v4989_v8 = vld [vmem:[#allocation7 + $0x3a0] ss:$8 sps:$4 sm:$0xff]  }
 0x70f   :  { %3797 = vmatprep.subr.bf16.mxu0 %v4940_v35  ;;  %v4994_v35 = vld [vmem:[#allocation7 + $0x3b4] ss:$8 sps:$4 sm:$0xff]  }
 0x712   :  { %3798 = vmatpush1.bf16.msra.mxu0 %v4938_v18  ;;  %v4997_v18 = vld [vmem:[#allocation7 + $0x3c4] ss:$8 sps:$4 sm:$0xff]  }
 0x713   :  { %3799 = vmatprep.subr.bf16.mxu0 %v4943_v49  ;;  %v5000_v49 = vld [vmem:[#allocation7 + $0x3d4] ss:$8 sps:$4 sm:$0xff]  }
 0x716   :  { %3800 = vmatpush1.bf16.msra.mxu0 %v4941_v61  ;;  %v4998_v61 = vld [vmem:[#allocation7 + $0x3d0] ss:$8 sps:$4 sm:$0xff]  }
 0x717   :  { %3801 = vmatprep.subr.bf16.mxu0 %v4946_v9  ;;  %v5003_v9 = vld [vmem:[#allocation7 + $0x3e4] ss:$8 sps:$4 sm:$0xff]  }
 0x71a   :  { %3802 = vmatpush1.bf16.msra.mxu0 %v4944_v39  ;;  %v5001_v39 = vld [vmem:[#allocation7 + $0x3e0] ss:$8 sps:$4 sm:$0xff]  }
 0x71b   :  { %3803 = vmatprep.subr.bf16.mxu0 %v4949_v23  ;;  %v5006_v23 = vld [vmem:[#allocation7 + $0x3f4] ss:$8 sps:$4 sm:$0xff]  }
 0x71e   :  { %3804 = vmatpush1.bf16.msra.mxu0 %v4947_v1  ;;  %v5004_v1 = vld [vmem:[#allocation7 + $0x3f0] ss:$8 sps:$4 sm:$0xff]  }
 0x71f   :  { %3805 = vmatprep.subr.bf16.mxu0 %v4952_v30  ;;  %v2981_v30 = vld [vmem:[%s6358_s7] sm:$0x3]  ;;  %s5216_s7 = smov [#allocation9]  }
 0x720   :  { %s4182_s3 = sshll.u32 %s5216_s7, 4  ;;  %s4183_s3 = int_to_ptr.vmem [resolvable:$true] %s4182_s3 }
 0x721   :  { %s5153_s30 = scalar_lea.vmem %s4183_s3, 1024  ;;  %p5158_p11 = scmp.lt.s32.totalorder %s4183_s3, %s4183_s3 }
 0x722   :  { %3806 = vmatpush1.bf16.msra.mxu0 %v4950_v10  ;;  %v2986_v10 = vrot.slane %v2981_v30, %v5469_v47  ;;  %p5154_p10 = scmp.ne.s32.totalorder %s4183_s3, %s5153_s30  ;;  %p5159_p12 = scmp.lt.s32.totalorder %s5153_s30, %s5153_s30 }
 0x723   :  { %3807 = vmatprep.subr.bf16.mxu0 %v4955_v53 }
 0x724   :  { %p5160_p13 = por %p5159_p12, %p5158_p11 }
 0x726   :  { %3808 = vmatpush1.bf16.msra.mxu0 %v4953_v7  ;;  %p5161_p0 = pnand %p5160_p13, %p5154_p10 }
 0x727   :  { %3809 = vmatprep.subr.bf16.mxu0 %v4958_v43 }
 0x72a   :  { %3810 = vmatpush1.bf16.msra.mxu0 %v4956_v15 }
 0x72b   :  { %3852 = vmatprep.subr.bf16.mxu0 %v4961_v14 }
 0x72d   :  { %3812 = vmatmul.mubr.bf16.vlgmr.msra.gmra.mrb[40].mxu0 %v6038_v19  ;;  %v4971_v19 = vld [vmem:[#allocation7 + $0x340] ss:$8 sps:$4 sm:$0xff]  }
 0x72e   :  { %3821 = vmatprep.mubr.bf16.mxu0 %v6060_v29  ;;  %3853 = vmatpush1.bf16.msra.mxu0 %v4959_v45  ;;  %v4976_v29 = vld [vmem:[#allocation7 + $0x354] ss:$8 sps:$4 sm:$0xff]  }
 0x72f   :  { %3854 = vmatprep.subr.bf16.mxu0 %v4964_v12 }
 0x732   :  { %3855 = vmatpush1.bf16.msra.mxu0 %v4962_v48 }
 0x733   :  { %3856 = vmatprep.subr.bf16.mxu0 %v4967_v34 }
 0x735   :  { %3822 = vmatmul.mubr.bf16.gmra.mrb[44].mxu0 %v6056_v62  ;;  %v4977_v62 = vld [vmem:[#allocation7 + $0x360] ss:$8 sps:$4 sm:$0xff]  }
 0x736   :  { %3831 = vmatprep.mubr.bf16.mxu0 %v6078_v25  ;;  %3857 = vmatpush1.bf16.msra.mxu0 %v4965_v56  ;;  %v4982_v25 = vld [vmem:[#allocation7 + $0x374] ss:$8 sps:$4 sm:$0xff]  }
 0x737   :  { %3858 = vmatprep.subr.bf16.mxu0 %v4970_v11 }
 0x73a   :  { %3859 = vmatpush1.bf16.msra.mxu0 %v4968_v46 }
 0x73b   :  { %3860 = vmatprep.subr.bf16.mxu0 %v4973_v27 }
 0x73d   :  { %3832 = vmatmul.mubr.bf16.gmra.mrb[48].mxu0 %v6074_v57  ;;  %v4983_v57 = vld [vmem:[#allocation7 + $0x380] ss:$8 sps:$4 sm:$0xff]  }
 0x73e   :  { %3841 = vmatprep.mubr.bf16.mxu0 %v6096_v33  ;;  %3861 = vmatpush1.bf16.msra.mxu0 %v4971_v19  ;;  %v4988_v33 = vld [vmem:[#allocation7 + $0x394] ss:$8 sps:$4 sm:$0xff]  }
 0x73f   :  { %3862 = vmatprep.subr.bf16.mxu0 %v4976_v29 }
 0x742   :  { %3863 = vmatpush1.bf16.msra.mxu0 %v4974_v42 }
 0x743   :  { %3864 = vmatprep.subr.bf16.mxu0 %v4979_v59 }
 0x745   :  { %3842 = vmatmul.mubr.bf16.gmra.mrb[52].mxu0 %v6092_v3  ;;  %v4992_v3 = vld [vmem:[#allocation7 + $0x3b0] ss:$8 sps:$4 sm:$0xff]  }
 0x746   :  { %3865 = vmatpush1.bf16.msra.mxu0 %v4977_v62  ;;  %3884 = vmatprep.mubr.bf16.mxu0 %v6044_v38  ;;  %v4995_v38 = vld [vmem:[#allocation7 + $0x3c0] ss:$8 sps:$4 sm:$0xff]  }
 0x747   :  { %3866 = vmatprep.subr.bf16.mxu0 %v4982_v25 }
 0x74a   :  { %3867 = vmatpush1.bf16.msra.mxu0 %v4980_v16 }
 0x74b   :  { %3868 = vmatprep.subr.bf16.mxu0 %v4985_v24 }
 0x74e   :  { %3869 = vmatpush1.bf16.msra.mxu0 %v4983_v57 }
 0x74f   :  { %3870 = vmatprep.subr.bf16.mxu0 %v4988_v33 }
 0x752   :  { %3871 = vmatpush1.bf16.msra.mxu0 %v4986_v22 }
 0x753   :  { %3872 = vmatprep.subr.bf16.mxu0 %v4991_v32 }
 0x756   :  { %3873 = vmatpush1.bf16.msra.mxu0 %v4989_v8 }
 0x757   :  { %3874 = vmatprep.subr.bf16.mxu0 %v4994_v35 }
 0x75a   :  { %3875 = vmatpush1.bf16.msra.mxu0 %v4992_v3 }
 0x75b   :  { %3876 = vmatprep.subr.bf16.mxu0 %v4997_v18 }
 0x75e   :  { %3877 = vmatpush1.bf16.msra.mxu0 %v4995_v38 }
 0x75f   :  { %3878 = vmatprep.subr.bf16.mxu0 %v5000_v49 }
 0x762   :  { %3879 = vmatpush1.bf16.msra.mxu0 %v4998_v61 }
 0x763   :  { %3880 = vmatprep.subr.bf16.mxu0 %v5003_v9 }
 0x766   :  { %3881 = vmatpush1.bf16.msra.mxu0 %v5001_v39 }
 0x767   :  { %3882 = vmatprep.subr.bf16.mxu0 %v5006_v23 }
 0x76a   :  { %3883 = vmatpush1.bf16.msra.mxu0 %v5004_v1 }
 0x76d   :  { %3885 = vmatmul.mubr.bf16.vlgmr.msra.gmra.mrb[40].mxu0 %v6040_v40  ;;  %v2990_v40 = vrot.slane %v2981_v30, %v5421_v0 }
 0x76e   :  { %3894 = vmatprep.mubr.bf16.mxu0 %v6062_v60 }
 0x775   :  { %3895 = vmatmul.mubr.bf16.gmra.mrb[44].mxu0 %v6058_v54 }
 0x776   :  { %3904 = vmatprep.mubr.bf16.mxu0 %v6080_v6 }
 0x77d   :  { %3905 = vmatmul.mubr.bf16.gmra.mrb[48].mxu0 %v6076_v13 }
 0x77e   :  { %3914 = vmatprep.mubr.bf16.mxu0 %v6098_v50 }
 0x785   :  { %3915 = vmatmul.mubr.bf16.gmra.mrb[52].mxu0 %v6094_v58 }
 0x840   :  { %v3886_v53 = vpop.f32.mrb[40].mxu0 }
 0x841   :  { %v4592_v60 = vadd.f32 %v3886_v53, %v2986_v10  ;;  %v3888_v7 = vpop.f32.mrb[41].mxu0 }
 0x842   :  { %v4593_v54 = vadd.f32 %v3888_v7, %v2990_v40  ;;  %v3890_v43 = vpop.f32.mrb[42].mxu0 }
 0x843   :  { %v3925_v6 = vadd.f32 %v4592_v60, %v5802_v55  ;;  %v4594_v13 = vadd.f32 %v3890_v43, %v2986_v10  ;;  %v3892_v15 = vpop.f32.mrb[43].mxu0 }
 0x844   :  { %v6124_v50 = vadd.f32 %v4593_v54, %v5799_v44  ;;  %v4595_v58 = vadd.f32 %v3892_v15, %v2990_v40 }
 0x845   :  { %v3927_v14 = vadd.f32 %v4594_v13, %v5810_v31 }
 0x846   :  { %v6128_v45 = vadd.f32 %v4595_v58, %v5807_v51  ;;  %v3943_v12 = vadd.f32 %v6124_v50, %v3925_v6 }
 0x848   :  { %v3896_v48 = vpop.f32.mrb[44].mxu0  ;;  %3944 = vadd.xlane.f32.xlu0 %v3943_v12  ;;  %v3946_v34 = vadd.f32 %v6128_v45, %v3927_v14 }
 0x849   :  { %v4596_v56 = vadd.f32 %v3896_v48, %v2986_v10  ;;  %v3898_v11 = vpop.f32.mrb[45].mxu0 }
 0x84a   :  { %v4597_v55 = vadd.f32 %v3898_v11, %v2990_v40  ;;  %v3900_v46 = vpop.f32.mrb[46].mxu0  ;;  %3947 = vadd.xlane.f32.xlu1 %v3946_v34 }
 0x84b   :  { %v3929_v44 = vadd.f32 %v4596_v56, %v5840_v63  ;;  %v4598_v27 = vadd.f32 %v3900_v46, %v2986_v10  ;;  %v3902_v19 = vpop.f32.mrb[47].mxu0 }
 0x84c   :  { %v6134_v31 = vadd.f32 %v4597_v55, %v5837_v26  ;;  %v4599_v51 = vadd.f32 %v3902_v19, %v2990_v40 }
 0x84d   :  { %v3931_v29 = vadd.f32 %v4598_v27, %v5848_v36 }
 0x84e   :  { %v6138_v42 = vadd.f32 %v4599_v51, %v5845_v21  ;;  %v3949_v59 = vadd.f32 %v6134_v31, %v3929_v44 }
 0x850   :  { %v3906_v62 = vpop.f32.mrb[48].mxu0  ;;  %3950 = vadd.xlane.f32.xlu0 %v3949_v59  ;;  %v3952_v25 = vadd.f32 %v6138_v42, %v3931_v29 }
 0x851   :  { %v4600_v16 = vadd.f32 %v3906_v62, %v2986_v10  ;;  %v3908_v24 = vpop.f32.mrb[49].mxu0 }
 0x852   :  { %v4601_v63 = vadd.f32 %v3908_v24, %v2990_v40  ;;  %v3910_v57 = vpop.f32.mrb[50].mxu0  ;;  %3953 = vadd.xlane.f32.xlu1 %v3952_v25 }
 0x853   :  { %v6143_v26 = vadd.f32 %v4600_v16, %v5872_v17  ;;  %v4602_v33 = vadd.f32 %v3910_v57, %v2986_v10  ;;  %v3912_v22 = vpop.f32.mrb[51].mxu0 }
 0x854   :  { %v6146_v36 = vadd.f32 %v4601_v63, %v5869_v4  ;;  %v4603_v21 = vadd.f32 %v3912_v22, %v2990_v40 }
 0x855   :  { %v6149_v32 = vadd.f32 %v4602_v33, %v5880_v2 }
 0x856   :  { %v6152_v8 = vadd.f32 %v4603_v21, %v5877_v37  ;;  %v3955_v35 = vadd.f32 %v6146_v36, %v6143_v26 }
 0x858   :  { %v3916_v3 = vpop.f32.mrb[52].mxu0  ;;  %3956 = vadd.xlane.f32.xlu0 %v3955_v35  ;;  %v3958_v17 = vadd.f32 %v6152_v8, %v6149_v32 }
 0x859   :  { %v4604_v18 = vadd.f32 %v3916_v3, %v2986_v10  ;;  %v3918_v38 = vpop.f32.mrb[53].mxu0 }
 0x85a   :  { %v4605_v49 = vadd.f32 %v3918_v38, %v2990_v40  ;;  %v3920_v4 = vpop.f32.mrb[54].mxu0  ;;  %3959 = vadd.xlane.f32.xlu1 %v3958_v17 }
 0x85b   :  { %v6159_v61 = vadd.f32 %v4604_v18, %v5907_v28  ;;  %v4606_v2 = vadd.f32 %v3920_v4, %v2986_v10  ;;  %v3922_v9 = vpop.f32.mrb[55].mxu0 }
 0x85c   :  { %v6162_v37 = vadd.f32 %v4605_v49, %v5901_v41  ;;  %v4607_v39 = vadd.f32 %v3922_v9, %v2990_v40 }
 0x85d   :  { %v6165_v23 = vadd.f32 %v4606_v2, %v5910_v5 }
 0x85e   :  { %v6168_v1 = vadd.f32 %v4607_v39, %v5904_v52  ;;  %v3961_v30 = vadd.f32 %v6162_v37, %v6159_v61 }
 0x860   :  { %3962 = vadd.xlane.f32.xlu0 %v3961_v30  ;;  %v3964_v28 = vadd.f32 %v6168_v1, %v6165_v23 }
 0x862   :  { %3965 = vadd.xlane.f32.xlu1 %v3964_v28 }
 0x8d5   :  { %v3945_v10 = vpop.xlane.xlu0 %3944 }
 0x8d6   :  { %v3967_v53 = vmul.f32 0.007142857, %v3945_v10 }
 0x8d7   :  { %v3948_v60 = vpop.xlane.xlu1 %3947 }
 0x8d8   :  { %v6174_v41 = vsub.f32 %v3925_v6, %v3967_v53  ;;  %v3976_v40 = vsub.f32 %v6124_v50, %v3967_v53  ;;  %v3968_v5 = vmul.f32 0.007142857, %v3948_v60 }
 0x8da   :  { %v6178_v7 = vmul.f32 %v5666_v20, %v3976_v40  ;;  %v6180_v52 = vsub.f32 %v3927_v14, %v3968_v5  ;;  %v3978_v54 = vsub.f32 %v6128_v45, %v3968_v5  ;;  %v4007_v13 = vmul.f32 %v6174_v41, %v6174_v41 }
 0x8dc   :  { %v6184_v43 = vmul.f32 %v5666_v20, %v3978_v54  ;;  %v4008_v6 = vmul.f32 %v6178_v7, %v6178_v7  ;;  %v4009_v12 = vmul.f32 %v6180_v52, %v6180_v52 }
 0x8dd   :  { %v3951_v15 = vpop.xlane.xlu0 %3950 }
 0x8de   :  { %v3969_v58 = vmul.f32 0.007142857, %v3951_v15  ;;  %v4023_v50 = vadd.f32 %v4008_v6, %v4007_v13  ;;  %v4010_v14 = vmul.f32 %v6184_v43, %v6184_v43 }
 0x8df   :  { %v3954_v48 = vpop.xlane.xlu1 %3953 }
 0x8e0   :  { %v6194_v45 = vsub.f32 %v3929_v44, %v3969_v58  ;;  %v3980_v34 = vsub.f32 %v6134_v31, %v3969_v58  ;;  %v3970_v56 = vmul.f32 0.007142857, %v3954_v48  ;;  %4024 = vadd.xlane.f32.xlu0 %v4023_v50  ;;  %v4026_v11 = vadd.f32 %v4010_v14, %v4009_v12 }
 0x8e2   :  { %v6198_v55 = vmul.f32 %v5666_v20, %v3980_v34  ;;  %v6200_v46 = vsub.f32 %v3931_v29, %v3970_v56  ;;  %v3982_v27 = vsub.f32 %v6138_v42, %v3970_v56  ;;  %4027 = vadd.xlane.f32.xlu1 %v4026_v11  ;;  %v4011_v44 = vmul.f32 %v6194_v45, %v6194_v45 }
 0x8e4   :  { %v6204_v19 = vmul.f32 %v5666_v20, %v3982_v27  ;;  %v4012_v31 = vmul.f32 %v6198_v55, %v6198_v55  ;;  %v4013_v25 = vmul.f32 %v6200_v46, %v6200_v46 }
 0x8e5   :  { %v3957_v51 = vpop.xlane.xlu0 %3956 }
 0x8e6   :  { %v3971_v59 = vmul.f32 0.007142857, %v3957_v51  ;;  %v4029_v62 = vadd.f32 %v4012_v31, %v4011_v44  ;;  %v4014_v29 = vmul.f32 %v6204_v19, %v6204_v19 }
 0x8e7   :  { %v3960_v42 = vpop.xlane.xlu1 %3959 }
 0x8e8   :  { %v6215_v16 = vsub.f32 %v6143_v26, %v3971_v59  ;;  %v3984_v24 = vsub.f32 %v6146_v36, %v3971_v59  ;;  %v3972_v63 = vmul.f32 0.007142857, %v3960_v42  ;;  %4030 = vadd.xlane.f32.xlu0 %v4029_v62  ;;  %v4032_v57 = vadd.f32 %v4014_v29, %v4013_v25 }
 0x8ea   :  { %v6219_v33 = vmul.f32 %v5666_v20, %v3984_v24  ;;  %v6222_v22 = vsub.f32 %v6149_v32, %v3972_v63  ;;  %v3986_v21 = vsub.f32 %v6152_v8, %v3972_v63  ;;  %4033 = vadd.xlane.f32.xlu1 %v4032_v57  ;;  %v4015_v26 = vmul.f32 %v6215_v16, %v6215_v16 }
 0x8ec   :  { %v6226_v35 = vmul.f32 %v5666_v20, %v3986_v21  ;;  %v4016_v36 = vmul.f32 %v6219_v33, %v6219_v33  ;;  %v4017_v38 = vmul.f32 %v6222_v22, %v6222_v22 }
 0x8ed   :  { %v3963_v3 = vpop.xlane.xlu0 %3962 }
 0x8ee   :  { %v3973_v17 = vmul.f32 0.007142857, %v3963_v3  ;;  %v4035_v18 = vadd.f32 %v4016_v36, %v4015_v26  ;;  %v4018_v32 = vmul.f32 %v6226_v35, %v6226_v35 }
 0x8ef   :  { %v3966_v8 = vpop.xlane.xlu1 %3965 }
 0x8f0   :  { %v6237_v49 = vsub.f32 %v6159_v61, %v3973_v17  ;;  %v3988_v4 = vsub.f32 %v6162_v37, %v3973_v17  ;;  %v3974_v2 = vmul.f32 0.007142857, %v3966_v8  ;;  %4036 = vadd.xlane.f32.xlu0 %v4035_v18  ;;  %v4038_v9 = vadd.f32 %v4018_v32, %v4017_v38 }
 0x8f2   :  { %v6241_v39 = vmul.f32 %v5666_v20, %v3988_v4  ;;  %v6244_v30 = vsub.f32 %v6165_v23, %v3974_v2  ;;  %v3990_v28 = vsub.f32 %v6168_v1, %v3974_v2  ;;  %4039 = vadd.xlane.f32.xlu1 %v4038_v9  ;;  %v4019_v61 = vmul.f32 %v6237_v49, %v6237_v49 }
 0x8f4   :  { %v6248_v10 = vmul.f32 %v5666_v20, %v3990_v28  ;;  %v4020_v37 = vmul.f32 %v6241_v39, %v6241_v39  ;;  %v4021_v60 = vmul.f32 %v6244_v30, %v6244_v30 }
 0x8f6   :  { %v4041_v53 = vadd.f32 %v4020_v37, %v4019_v61  ;;  %v4022_v23 = vmul.f32 %v6248_v10, %v6248_v10 }
 0x8f8   :  { %4042 = vadd.xlane.f32.xlu0 %v4041_v53  ;;  %v4044_v40 = vadd.f32 %v4022_v23, %v4021_v60 }
 0x8fa   :  { %4045 = vadd.xlane.f32.xlu1 %v4044_v40 }
 0x8fb   :  { %5164 = shalt.err (!%p5161_p0)
}
 0x8fc   :  { %s5165_s1 = scalar_lea.hbm %s6364_s13, 1024 }
 0x8fd   :  { %p5166_p1 = scmp.ne.s32.totalorder %s6364_s13, %s5165_s1  ;;  %p5169_p2 = scmp.lt.u32.totalorder %s5165_s1, %s6364_s13 }
 0x8ff   :  { %p5171_p3 = pnand %p5169_p2, %p5166_p1 }
 0x901   :  { %5174 = shalt.err (!%p5171_p3)
}
 0x902   :  { %4188 = dma.vmem_to_hbm [thread:$0]  %s4183_s3, 1024, %s6364_s13, [#allocation10], %s5212_s2, %s5212_s2, %s5213_s23  }
 0x903   :  { %v3941_v12 = vld [vmem:[%s6361_s10] sm:$0x3]  ;;  %s5217_s10 = smov [#allocation8]  }
 0x904   :  { %v3942_v34 = vld [vmem:[%s6362_s11] sm:$0x3]  ;;  %v6280_v11 = vrot.slane %v3941_v12, %v5469_v47  ;;  %v6283_v27 = vrot.slane %v3941_v12, %v5421_v0  ;;  %s4170_s11 = sshll.u32 %s5217_s10, 4  ;;  %s4171_s11 = int_to_ptr.vmem [resolvable:$true] %s4170_s11 }
 0x905   :  { %v6286_v31 = vrot.slane %v3942_v34, %v5469_v47  ;;  %v6289_v51 = vrot.slane %v3942_v34, %v5421_v0  ;;  %s5175_s13 = scalar_lea.vmem %s4171_s11, 2048  ;;  %p5180_p5 = scmp.lt.s32.totalorder %s4171_s11, %s4171_s11 }
 0x906   :  { %p5176_p4 = scmp.ne.s32.totalorder %s4171_s11, %s5175_s13  ;;  %p5181_p6 = scmp.lt.s32.totalorder %s5175_s13, %s5175_s13 }
 0x908   :  { %p5182_p7 = por %p5181_p6, %p5180_p5 }
 0x90a   :  { %p5183_p8 = pnand %p5182_p7, %p5176_p4 }
 0x96d   :  { %v4025_v20 = vpop.xlane.xlu0 %4024 }
 0x96e   :  { %v4047_v1 = vmul.f32 0.007142857, %v4025_v20 }
 0x96f   :  { %v4028_v5 = vpop.xlane.xlu1 %4027 }
 0x970   :  { %v4055_v54 = vadd.f32 1e-05, %v4047_v1  ;;  %v4048_v13 = vmul.f32 0.007142857, %v4028_v5 }
 0x972   :  { %5055 = vrsqrt.f32 %v4055_v54  ;;  %v4056_v6 = vadd.f32 1e-05, %v4048_v13 }
 0x974   :  { %5057 = vrsqrt.f32 %v4056_v6 }
 0x975   :  { %v4031_v15 = vpop.xlane.xlu0 %4030 }
 0x976   :  { %v4049_v58 = vmul.f32 0.007142857, %v4031_v15 }
 0x977   :  { %v4034_v50 = vpop.xlane.xlu1 %4033 }
 0x978   :  { %v4057_v14 = vadd.f32 1e-05, %v4049_v58  ;;  %v4050_v48 = vmul.f32 0.007142857, %v4034_v50 }
 0x97a   :  { %5059 = vrsqrt.f32 %v4057_v14  ;;  %v4058_v56 = vadd.f32 1e-05, %v4050_v48 }
 0x97c   :  { %v5056_v44 = vpop.eup %5055  ;;  %5061 = vrsqrt.f32 %v4058_v56 }
 0x97d   :  { %v4071_v59 = vmul.f32 %v5056_v44, %v6174_v41  ;;  %v4072_v62 = vmul.f32 %v5056_v44, %v6178_v7  ;;  %v4037_v25 = vpop.xlane.xlu0 %4036 }
 0x97e   :  { %v5058_v29 = vpop.eup %5057  ;;  %v4051_v42 = vmul.f32 0.007142857, %v4037_v25 }
 0x97f   :  { %v4098_v24 = vmul.f32 %v6280_v11, %v4071_v59  ;;  %v4099_v63 = vmul.f32 %v6283_v27, %v4072_v62  ;;  %v4073_v57 = vmul.f32 %v5058_v29, %v6180_v52  ;;  %v4074_v21 = vmul.f32 %v5058_v29, %v6184_v43  ;;  %v4040_v47 = vpop.xlane.xlu1 %4039 }
 0x980   :  { %v4059_v26 = vadd.f32 1e-05, %v4051_v42  ;;  %v4052_v36 = vmul.f32 0.007142857, %v4040_v47 }
 0x981   :  { %v4125_v0 = vadd.f32 %v6286_v31, %v4098_v24  ;;  %v4126_v41 = vadd.f32 %v6289_v51, %v4099_v63  ;;  %v4100_v7 = vmul.f32 %v6280_v11, %v4073_v57  ;;  %v4101_v3 = vmul.f32 %v6283_v27, %v4074_v21 }
 0x982   :  { %5063 = vrsqrt.f32 %v4059_v26  ;;  %v4060_v17 = vadd.f32 1e-05, %v4052_v36 }
 0x983   :  { %4141 = vst [vmem:[#allocation8] sm:$0xff] %v4125_v0  ;;  %4142 = vst [vmem:[#allocation8 + $0x8] sm:$0xff] %v4126_v41  ;;  %v4127_v18 = vadd.f32 %v6286_v31, %v4100_v7  ;;  %v4128_v52 = vadd.f32 %v6289_v51, %v4101_v3 }
 0x984   :  { %v5060_v43 = vpop.eup %5059  ;;  %5065 = vrsqrt.f32 %v4060_v17 }
 0x985   :  { %4143 = vst [vmem:[#allocation8 + $0x10] sm:$0xff] %v4127_v18  ;;  %4144 = vst [vmem:[#allocation8 + $0x18] sm:$0xff] %v4128_v52  ;;  %v4075_v38 = vmul.f32 %v5060_v43, %v6194_v45  ;;  %v4076_v32 = vmul.f32 %v5060_v43, %v6198_v55  ;;  %v4043_v8 = vpop.xlane.xlu0 %4042 }
 0x986   :  { %v5062_v4 = vpop.eup %5061  ;;  %v4053_v2 = vmul.f32 0.007142857, %v4043_v8 }
 0x987   :  { %v4102_v9 = vmul.f32 %v6280_v11, %v4075_v38  ;;  %v4103_v28 = vmul.f32 %v6283_v27, %v4076_v32  ;;  %v4077_v61 = vmul.f32 %v5062_v4, %v6200_v46  ;;  %v4078_v37 = vmul.f32 %v5062_v4, %v6204_v19  ;;  %v4046_v53 = vpop.xlane.xlu1 %4045 }
 0x988   :  { %v4061_v60 = vadd.f32 1e-05, %v4053_v2  ;;  %v4054_v23 = vmul.f32 0.007142857, %v4046_v53 }
 0x989   :  { %v4129_v40 = vadd.f32 %v6286_v31, %v4102_v9  ;;  %v4130_v45 = vadd.f32 %v6289_v51, %v4103_v28  ;;  %v4104_v55 = vmul.f32 %v6280_v11, %v4077_v61  ;;  %v4105_v20 = vmul.f32 %v6283_v27, %v4078_v37 }
 0x98a   :  { %5067 = vrsqrt.f32 %v4061_v60  ;;  %v4062_v1 = vadd.f32 1e-05, %v4054_v23 }
 0x98b   :  { %4145 = vst [vmem:[#allocation8 + $0x20] sm:$0xff] %v4129_v40  ;;  %4146 = vst [vmem:[#allocation8 + $0x28] sm:$0xff] %v4130_v45  ;;  %v4131_v5 = vadd.f32 %v6286_v31, %v4104_v55  ;;  %v4132_v46 = vadd.f32 %v6289_v51, %v4105_v20 }
 0x98c   :  { %v5064_v19 = vpop.eup %5063  ;;  %5069 = vrsqrt.f32 %v4062_v1 }
 0x98d   :  { %4147 = vst [vmem:[#allocation8 + $0x30] sm:$0xff] %v4131_v5  ;;  %4148 = vst [vmem:[#allocation8 + $0x38] sm:$0xff] %v4132_v46  ;;  %v4079_v54 = vmul.f32 %v5064_v19, %v6215_v16  ;;  %v4080_v13 = vmul.f32 %v5064_v19, %v6219_v33 }
 0x98e   :  { %v5066_v6 = vpop.eup %5065 }
 0x98f   :  { %v4106_v15 = vmul.f32 %v6280_v11, %v4079_v54  ;;  %v4107_v58 = vmul.f32 %v6283_v27, %v4080_v13  ;;  %v4081_v50 = vmul.f32 %v5066_v6, %v6222_v22  ;;  %v4082_v12 = vmul.f32 %v5066_v6, %v6226_v35 }
 0x991   :  { %v4133_v14 = vadd.f32 %v6286_v31, %v4106_v15  ;;  %v4134_v48 = vadd.f32 %v6289_v51, %v4107_v58  ;;  %v4108_v34 = vmul.f32 %v6280_v11, %v4081_v50  ;;  %v4109_v56 = vmul.f32 %v6283_v27, %v4082_v12 }
 0x993   :  { %4149 = vst [vmem:[#allocation8 + $0x40] sm:$0xff] %v4133_v14  ;;  %4150 = vst [vmem:[#allocation8 + $0x48] sm:$0xff] %v4134_v48  ;;  %v4135_v16 = vadd.f32 %v6286_v31, %v4108_v34  ;;  %v4136_v33 = vadd.f32 %v6289_v51, %v4109_v56 }
 0x994   :  { %v5068_v44 = vpop.eup %5067 }
 0x995   :  { %4151 = vst [vmem:[#allocation8 + $0x50] sm:$0xff] %v4135_v16  ;;  %4152 = vst [vmem:[#allocation8 + $0x58] sm:$0xff] %v4136_v33  ;;  %v4083_v22 = vmul.f32 %v5068_v44, %v6237_v49  ;;  %v4084_v35 = vmul.f32 %v5068_v44, %v6241_v39 }
 0x996   :  { %v5070_v59 = vpop.eup %5069 }
 0x997   :  { %v4110_v62 = vmul.f32 %v6280_v11, %v4083_v22  ;;  %v4111_v25 = vmul.f32 %v6283_v27, %v4084_v35  ;;  %v4085_v29 = vmul.f32 %v5070_v59, %v6244_v30  ;;  %v4086_v42 = vmul.f32 %v5070_v59, %v6248_v10 }
 0x999   :  { %v4137_v24 = vadd.f32 %v6286_v31, %v4110_v62  ;;  %v4138_v63 = vadd.f32 %v6289_v51, %v4111_v25  ;;  %v4112_v57 = vmul.f32 %v6280_v11, %v4085_v29  ;;  %v4113_v49 = vmul.f32 %v6283_v27, %v4086_v42 }
 0x99b   :  { %4153 = vst [vmem:[#allocation8 + $0x60] sm:$0xff] %v4137_v24  ;;  %4154 = vst [vmem:[#allocation8 + $0x68] sm:$0xff] %v4138_v63  ;;  %v4139_v39 = vadd.f32 %v6286_v31, %v4112_v57  ;;  %v4140_v21 = vadd.f32 %v6289_v51, %v4113_v49 }
 0x99d   :  { %4155 = vst [vmem:[#allocation8 + $0x70] sm:$0xff] %v4139_v39  ;;  %4156 = vst [vmem:[#allocation8 + $0x78] sm:$0xff] %v4140_v21 }
 0x99e   :  { %5186 = shalt.err (!%p5183_p8)
}
 0x99f   :  { %s5187_s24 = scalar_lea.hbm %s6363_s12, 2048 }
 0x9a0   :  { %p5188_p9 = scmp.ne.s32.totalorder %s6363_s12, %s5187_s24  ;;  %p5191_p10 = scmp.lt.u32.totalorder %s5187_s24, %s6363_s12 }
 0x9a2   :  { %p5193_p11 = pnand %p5191_p10, %p5188_p9 }
 0x9a4   :  { %5196 = shalt.err (!%p5193_p11)
}
 0x9a5   :  { %s5218_s8 = smov 256   ;;  %s5219_s9 = smov 16  }
 0x9a6   :  { %4176 = dma.vmem_to_hbm [thread:$0]  %s4171_s11, 2048, %s6363_s12, [#allocation4], %s5218_s8, %s5218_s8, %s5219_s9  }
 0x9a7   :  { %5201 = dma.done.wait [#allocation4], 2048  }
 0x9a8   :  { %5202 = vsyncadd [#allocation4], 4294965248 }
 0x9a9   :  { %5203 = dma.done.wait [#allocation10], 1024  }
 0x9aa   :  { %5204 = vsyncadd [#allocation10], 4294966272 }
 0x9ab   :  { %4195 = vsyncpa [#allocation3], 1 }
 0x9ac   :  { %4196 = vsyncpa [#allocation6], 1 }
 0x9ad   :  { %4197 = vsyncpa [#allocation4], 1 }
 0x9ae   :  { %4198 = vsyncpa [#allocation10], 1 }

</bundles_post_ra>
